<compile_context>
chip_gen: v7x
topology: tpu7x:2x2x1
jax: 0.10.0
libtpu: 0.0.40
codegen_flags: <defaults>
</compile_context>

<pallas_src>
import functools

import jax
import jax.numpy as jnp
from jax.experimental import pallas as pl
from jax.experimental.pallas import tpu as pltpu


def _patch_merging_kernel(x_ref, g_ref, b_ref, w_ref, o_ref, *,
                          C, W, Wp, rows_out, eps):
    # x_ref: [1, C, rows_in, W]   (rows_in = 2*rows_out input rows, NCHW block)
    # g_ref: [1, W]   LayerNorm gamma (indexed by last axis, W == dim)
    # b_ref: [1, W]   LayerNorm beta
    # w_ref: [E, 4*C] conv weight, column index = kw*2C + kh*C + c
    # o_ref: [1, E, rows_out*Wp]  lane-dense NCHW-flattened output block
    g = g_ref[...].astype(jnp.float32)          # [1, W]
    b = b_ref[...].astype(jnp.float32)          # [1, W]
    wmat = w_ref[...].astype(jnp.float32)       # [E, 4C]

    # One-hot stride-2 lane-selection matrices (even / odd columns of W).
    w_idx = jax.lax.broadcasted_iota(jnp.int32, (W, Wp), 0)
    j_idx = jax.lax.broadcasted_iota(jnp.int32, (W, Wp), 1)
    s0 = (w_idx == 2 * j_idx).astype(jnp.float32)        # [W, Wp] -> w = 2j
    s1 = (w_idx == 2 * j_idx + 1).astype(jnp.float32)    # [W, Wp] -> w = 2j+1

    for i in range(rows_out):                    # static, small trip count
        # All channels of the two input rows feeding output row i.
        r0 = x_ref[0, :, 2 * i, :].astype(jnp.float32)       # [C, W], kh = 0
        r1 = x_ref[0, :, 2 * i + 1, :].astype(jnp.float32)   # [C, W], kh = 1
        rows = jnp.concatenate([r0, r1], axis=0)             # [2C, W]

        # LayerNorm over the last axis (biased variance, PyTorch eps inside sqrt).
        mu = jnp.mean(rows, axis=-1, keepdims=True)
        xc = rows - mu
        var = jnp.mean(xc * xc, axis=-1, keepdims=True)
        y = xc * jax.lax.rsqrt(var + eps) * g + b            # [2C, W]

        # Stride-2 downsample along W on the MXU (kw = 0 / kw = 1 taps).
        d0 = jnp.dot(y, s0, preferred_element_type=jnp.float32)   # [2C, Wp]
        d1 = jnp.dot(y, s1, preferred_element_type=jnp.float32)   # [2C, Wp]
        dcat = jnp.concatenate([d0, d1], axis=0)                  # [4C, Wp]
        # rows of dcat: index = kw*2C + kh*C + c  (matches w_ref columns)

        out_i = jnp.dot(wmat, dcat, preferred_element_type=jnp.float32)  # [E, Wp]
        o_ref[0, :, i * Wp:(i + 1) * Wp] = out_i.astype(o_ref.dtype)


def patch_merging_s(x, norm_weight, norm_bias, conv_weight, eps=1e-5):
    """x: [B, dim, H, W] NCHW (requires W == dim, H and W even).
    norm_weight/norm_bias: [dim].  conv_weight: [2*dim, dim, 2, 2].
    Returns [B, 2*dim, H//2, W//2] (NCHW), matching the PyTorch module."""
    B, C, H, W = x.shape
    E = conv_weight.shape[0]
    assert conv_weight.shape == (E, C, 2, 2)
    assert H % 2 == 0 and W % 2 == 0
    assert norm_weight.shape == (W,) and norm_bias.shape == (W,), \
        "nn.LayerNorm(dim) acts on the last axis -> needs W == dim"
    Hp, Wp = H // 2, W // 2

    # Row tiling: pipeline over H when the blocks stay (8,128)-legal,
    # otherwise process a full image per grid step.
    rows_in = 16 if (H % 16 == 0 and ((8 * Wp) % 128 == 0 or H == 16)) else H
    rows_out = rows_in // 2
    n_hb = H // rows_in

    # Conv weight as a [E, 4C] matrix; column index = kw*2C + kh*C + c.
    w_mat = conv_weight.transpose(0, 3, 2, 1).reshape(E, 4 * C)
    g2 = norm_weight.reshape(1, W)
    b2 = norm_bias.reshape(1, W)

    kernel = functools.partial(_patch_merging_kernel,
                               C=C, W=W, Wp=Wp, rows_out=rows_out, eps=eps)

    flops = B * Hp * (8 * C * W * Wp + 8 * E * C * Wp + 16 * C * W)
    bytes_accessed = 4 * (B * C * H * W + B * E * Hp * Wp + E * 4 * C + 2 * W)

    out_flat = pl.pallas_call(
        kernel,
        out_shape=jax.ShapeDtypeStruct((B, E, Hp * Wp), x.dtype),
        grid=(B, n_hb),
        in_specs=[
            pl.BlockSpec((1, C, rows_in, W), lambda bi, hi: (bi, 0, hi, 0)),
            pl.BlockSpec((1, W), lambda bi, hi: (0, 0)),
            pl.BlockSpec((1, W), lambda bi, hi: (0, 0)),
            pl.BlockSpec((E, 4 * C), lambda bi, hi: (0, 0)),
        ],
        out_specs=pl.BlockSpec((1, E, rows_out * Wp), lambda bi, hi: (bi, 0, hi)),
        compiler_params=pltpu.CompilerParams(
            dimension_semantics=("parallel", "parallel")),
        cost_estimate=pl.CostEstimate(
            flops=flops, transcendentals=B * C * H,
            bytes_accessed=bytes_accessed),
    )(x, g2, b2, w_mat)

    # Free reshape (no transpose): [B, E, Hp*Wp] -> [B, E, Hp, Wp] NCHW.
    return out_flat.reshape(B, E, Hp, Wp)


if __name__ == "__main__":
    # Small shapes consistent with the module: dim=16 (so W == dim), H=W=16,
    # batch=2.  Output: [2, 32, 8, 8].
    B, dim = 2, 16
    C, H, W = dim, 16, 16
    E = 2 * dim

    key = jax.random.PRNGKey(0)
    kx, kg, kb, kw = jax.random.split(key, 4)
    x = jax.random.normal(kx, (B, C, H, W), dtype=jnp.float32)
    gamma = 1.0 + 0.1 * jax.random.normal(kg, (dim,), dtype=jnp.float32)
    beta = 0.1 * jax.random.normal(kb, (dim,), dtype=jnp.float32)
    w_conv = 0.1 * jax.random.normal(kw, (E, C, 2, 2), dtype=jnp.float32)

    y = patch_merging_s(x, gamma, beta, w_conv)
    y = jax.block_until_ready(y)

    # Reference: LayerNorm over the last axis + stride-2 2x2 conv (no bias).
    mu = jnp.mean(x, axis=-1, keepdims=True)
    var = jnp.mean((x - mu) ** 2, axis=-1, keepdims=True)
    xn = (x - mu) * jax.lax.rsqrt(var + 1e-5) * gamma + beta
    ref = jax.lax.conv_general_dilated(
        xn, w_conv, window_strides=(2, 2), padding="VALID",
        dimension_numbers=("NCHW", "OIHW", "NCHW"),
        precision=jax.lax.Precision.HIGHEST)

    assert y.shape == (B, E, H // 2, W // 2)
    assert jnp.allclose(y, ref, atol=2e-3, rtol=2e-3)

    print("KERNEL_OK")
</pallas_src>

<mosaic_0001>
module attributes {stable_mosaic.version = 11 : i64} {
  func.func @_patch_merging_kernel(%arg0: i32, %arg1: i32, %arg2: memref<1x16x16x16xf32, #tpu.memory_space<vmem>>, %arg3: memref<1x16xf32, #tpu.memory_space<vmem>>, %arg4: memref<1x16xf32, #tpu.memory_space<vmem>>, %arg5: memref<32x64xf32, #tpu.memory_space<vmem>>, %arg6: memref<1x32x64xf32, #tpu.memory_space<vmem>>) attributes {dimension_semantics = [#tpu.dimension_semantics<parallel>, #tpu.dimension_semantics<parallel>], iteration_bounds = array<i64: 2, 1>, scalar_prefetch = 0 : i64, scratch_operands = 0 : i64, tpu.core_type = #tpu.core_type<tc>, window_params = [{transform_indices = @transform_0, window_bounds = array<i64: 1, 16, 16, 16>}, {pipeline_mode = #tpu.pipeline_mode<synchronous>, transform_indices = @transform_1, window_bounds = array<i64: 1, 16>}, {pipeline_mode = #tpu.pipeline_mode<synchronous>, transform_indices = @transform_2, window_bounds = array<i64: 1, 16>}, {pipeline_mode = #tpu.pipeline_mode<synchronous>, transform_indices = @transform_3, window_bounds = array<i64: 32, 64>}, {transform_indices = @transform_4, window_bounds = array<i64: 1, 32, 64>}]} {
    %c0 = arith.constant 0 : index
    %c0_0 = arith.constant 0 : index
    %0 = vector.load %arg3[%c0, %c0_0] : memref<1x16xf32, #tpu.memory_space<vmem>>, vector<1x16xf32>
    %c0_1 = arith.constant 0 : index
    %c0_2 = arith.constant 0 : index
    %1 = vector.load %arg4[%c0_1, %c0_2] : memref<1x16xf32, #tpu.memory_space<vmem>>, vector<1x16xf32>
    %c0_3 = arith.constant 0 : index
    %c0_4 = arith.constant 0 : index
    %2 = vector.load %arg5[%c0_3, %c0_4] : memref<32x64xf32, #tpu.memory_space<vmem>>, vector<32x64xf32>
    %3 = tpu.iota {dimensions = array<i32: 0>} : vector<16x8xi32>
    %4 = tpu.iota {dimensions = array<i32: 1>} : vector<16x8xi32>
    %c2_i32 = arith.constant 2 : i32
    %5 = vector.broadcast %c2_i32 : i32 to vector<16x8xi32>
    %6 = arith.muli %5, %4 : vector<16x8xi32>
    %7 = arith.cmpi eq, %3, %6 : vector<16x8xi32>
    %8 = arith.extui %7 : vector<16x8xi1> to vector<16x8xi32>
    %9 = arith.sitofp %8 : vector<16x8xi32> to vector<16x8xf32>
    %c2_i32_5 = arith.constant 2 : i32
    %10 = vector.broadcast %c2_i32_5 : i32 to vector<16x8xi32>
    %11 = arith.muli %10, %4 : vector<16x8xi32>
    %c1_i32 = arith.constant 1 : i32
    %12 = vector.broadcast %c1_i32 : i32 to vector<16x8xi32>
    %13 = arith.addi %11, %12 : vector<16x8xi32>
    %14 = arith.cmpi eq, %3, %13 : vector<16x8xi32>
    %15 = arith.extui %14 : vector<16x8xi1> to vector<16x8xi32>
    %16 = arith.sitofp %15 : vector<16x8xi32> to vector<16x8xf32>
    %c0_6 = arith.constant 0 : index
    %c0_7 = arith.constant 0 : index
    %c0_8 = arith.constant 0 : index
    %c0_9 = arith.constant 0 : index
    %17 = vector.load %arg2[%c0_6, %c0_7, %c0_8, %c0_9] : memref<1x16x16x16xf32, #tpu.memory_space<vmem>>, vector<1x16x1x16xf32>
    %18 = vector.shape_cast %17 : vector<1x16x1x16xf32> to vector<16x16xf32>
    %c0_10 = arith.constant 0 : index
    %c0_11 = arith.constant 0 : index
    %c1 = arith.constant 1 : index
    %c0_12 = arith.constant 0 : index
    %19 = vector.load %arg2[%c0_10, %c0_11, %c1, %c0_12] : memref<1x16x16x16xf32, #tpu.memory_space<vmem>>, vector<1x16x1x16xf32>
    %20 = vector.shape_cast %19 : vector<1x16x1x16xf32> to vector<16x16xf32>
    %21 = tpu.concatenate %18, %20 in 0 : vector<16x16xf32>, vector<16x16xf32> -> vector<32x16xf32>
    %cst = arith.constant dense<0.000000e+00> : vector<32xf32>
    %22 = vector.multi_reduction <add>, %21, %cst [1] : vector<32x16xf32> to vector<32xf32>
    %23 = vector.shape_cast %22 : vector<32xf32> to vector<32x1xf32>
    %cst_13 = arith.constant 1.600000e+01 : f32
    %24 = vector.broadcast %cst_13 : f32 to vector<32x1xf32>
    %25 = arith.divf %23, %24 : vector<32x1xf32>
    %26 = vector.broadcast %25 : vector<32x1xf32> to vector<32x16xf32>
    %27 = arith.subf %21, %26 : vector<32x16xf32>
    %28 = arith.mulf %27, %27 : vector<32x16xf32>
    %cst_14 = arith.constant dense<0.000000e+00> : vector<32xf32>
    %29 = vector.multi_reduction <add>, %28, %cst_14 [1] : vector<32x16xf32> to vector<32xf32>
    %30 = vector.shape_cast %29 : vector<32xf32> to vector<32x1xf32>
    %cst_15 = arith.constant 1.600000e+01 : f32
    %31 = vector.broadcast %cst_15 : f32 to vector<32x1xf32>
    %32 = arith.divf %30, %31 : vector<32x1xf32>
    %cst_16 = arith.constant 9.99999974E-6 : f32
    %33 = vector.broadcast %cst_16 : f32 to vector<32x1xf32>
    %34 = arith.addf %32, %33 : vector<32x1xf32>
    %35 = math.rsqrt %34 : vector<32x1xf32>
    %36 = vector.broadcast %35 : vector<32x1xf32> to vector<32x16xf32>
    %37 = arith.mulf %27, %36 : vector<32x16xf32>
    %38 = vector.broadcast %0 : vector<1x16xf32> to vector<32x16xf32>
    %39 = arith.mulf %37, %38 : vector<32x16xf32>
    %40 = vector.broadcast %1 : vector<1x16xf32> to vector<32x16xf32>
    %41 = arith.addf %39, %40 : vector<32x16xf32>
    %cst_17 = arith.constant dense<0.000000e+00> : vector<32x8xf32>
    %42 = tpu.matmul %41, %9, %cst_17 {dimension_numbers = #tpu.dot_dimension_numbers<[1], [0], [0], [1], [0, 0, 1, 1], [], []>} : vector<32x16xf32>, vector<16x8xf32>, vector<32x8xf32> -> vector<32x8xf32>
    %cst_18 = arith.constant dense<0.000000e+00> : vector<32x8xf32>
    %43 = tpu.matmul %41, %16, %cst_18 {dimension_numbers = #tpu.dot_dimension_numbers<[1], [0], [0], [1], [0, 0, 1, 1], [], []>} : vector<32x16xf32>, vector<16x8xf32>, vector<32x8xf32> -> vector<32x8xf32>
    %44 = tpu.concatenate %42, %43 in 0 : vector<32x8xf32>, vector<32x8xf32> -> vector<64x8xf32>
    %cst_19 = arith.constant dense<0.000000e+00> : vector<32x8xf32>
    %45 = tpu.matmul %2, %44, %cst_19 {dimension_numbers = #tpu.dot_dimension_numbers<[1], [0], [0], [1], [0, 0, 1, 1], [], []>} : vector<32x64xf32>, vector<64x8xf32>, vector<32x8xf32> -> vector<32x8xf32>
    %c0_20 = arith.constant 0 : index
    %c0_21 = arith.constant 0 : index
    %c0_22 = arith.constant 0 : index
    %46 = vector.load %arg6[%c0_20, %c0_21, %c0_22] : memref<1x32x64xf32, #tpu.memory_space<vmem>>, vector<1x32x8xf32>
    %47 = vector.shape_cast %46 : vector<1x32x8xf32> to vector<32x8xf32>
    %48 = vector.shape_cast %45 : vector<32x8xf32> to vector<1x32x8xf32>
    tpu.vector_store %arg6[%c0_20, %c0_21, %c0_22], %48 {strides = array<i32>} : memref<1x32x64xf32, #tpu.memory_space<vmem>>, vector<1x32x8xf32>,
    %c0_23 = arith.constant 0 : index
    %c0_24 = arith.constant 0 : index
    %c2 = arith.constant 2 : index
    %c0_25 = arith.constant 0 : index
    %49 = vector.load %arg2[%c0_23, %c0_24, %c2, %c0_25] : memref<1x16x16x16xf32, #tpu.memory_space<vmem>>, vector<1x16x1x16xf32>
    %50 = vector.shape_cast %49 : vector<1x16x1x16xf32> to vector<16x16xf32>
    %c0_26 = arith.constant 0 : index
    %c0_27 = arith.constant 0 : index
    %c3 = arith.constant 3 : index
    %c0_28 = arith.constant 0 : index
    %51 = vector.load %arg2[%c0_26, %c0_27, %c3, %c0_28] : memref<1x16x16x16xf32, #tpu.memory_space<vmem>>, vector<1x16x1x16xf32>
    %52 = vector.shape_cast %51 : vector<1x16x1x16xf32> to vector<16x16xf32>
    %53 = tpu.concatenate %50, %52 in 0 : vector<16x16xf32>, vector<16x16xf32> -> vector<32x16xf32>
    %cst_29 = arith.constant dense<0.000000e+00> : vector<32xf32>
    %54 = vector.multi_reduction <add>, %53, %cst_29 [1] : vector<32x16xf32> to vector<32xf32>
    %55 = vector.shape_cast %54 : vector<32xf32> to vector<32x1xf32>
    %cst_30 = arith.constant 1.600000e+01 : f32
    %56 = vector.broadcast %cst_30 : f32 to vector<32x1xf32>
    %57 = arith.divf %55, %56 : vector<32x1xf32>
    %58 = vector.broadcast %57 : vector<32x1xf32> to vector<32x16xf32>
    %59 = arith.subf %53, %58 : vector<32x16xf32>
    %60 = arith.mulf %59, %59 : vector<32x16xf32>
    %cst_31 = arith.constant dense<0.000000e+00> : vector<32xf32>
    %61 = vector.multi_reduction <add>, %60, %cst_31 [1] : vector<32x16xf32> to vector<32xf32>
    %62 = vector.shape_cast %61 : vector<32xf32> to vector<32x1xf32>
    %cst_32 = arith.constant 1.600000e+01 : f32
    %63 = vector.broadcast %cst_32 : f32 to vector<32x1xf32>
    %64 = arith.divf %62, %63 : vector<32x1xf32>
    %cst_33 = arith.constant 9.99999974E-6 : f32
    %65 = vector.broadcast %cst_33 : f32 to vector<32x1xf32>
    %66 = arith.addf %64, %65 : vector<32x1xf32>
    %67 = math.rsqrt %66 : vector<32x1xf32>
    %68 = vector.broadcast %67 : vector<32x1xf32> to vector<32x16xf32>
    %69 = arith.mulf %59, %68 : vector<32x16xf32>
    %70 = vector.broadcast %0 : vector<1x16xf32> to vector<32x16xf32>
    %71 = arith.mulf %69, %70 : vector<32x16xf32>
    %72 = vector.broadcast %1 : vector<1x16xf32> to vector<32x16xf32>
    %73 = arith.addf %71, %72 : vector<32x16xf32>
    %cst_34 = arith.constant dense<0.000000e+00> : vector<32x8xf32>
    %74 = tpu.matmul %73, %9, %cst_34 {dimension_numbers = #tpu.dot_dimension_numbers<[1], [0], [0], [1], [0, 0, 1, 1], [], []>} : vector<32x16xf32>, vector<16x8xf32>, vector<32x8xf32> -> vector<32x8xf32>
    %cst_35 = arith.constant dense<0.000000e+00> : vector<32x8xf32>
    %75 = tpu.matmul %73, %16, %cst_35 {dimension_numbers = #tpu.dot_dimension_numbers<[1], [0], [0], [1], [0, 0, 1, 1], [], []>} : vector<32x16xf32>, vector<16x8xf32>, vector<32x8xf32> -> vector<32x8xf32>
    %76 = tpu.concatenate %74, %75 in 0 : vector<32x8xf32>, vector<32x8xf32> -> vector<64x8xf32>
    %cst_36 = arith.constant dense<0.000000e+00> : vector<32x8xf32>
    %77 = tpu.matmul %2, %76, %cst_36 {dimension_numbers = #tpu.dot_dimension_numbers<[1], [0], [0], [1], [0, 0, 1, 1], [], []>} : vector<32x64xf32>, vector<64x8xf32>, vector<32x8xf32> -> vector<32x8xf32>
    %c0_37 = arith.constant 0 : index
    %c0_38 = arith.constant 0 : index
    %c8 = arith.constant 8 : index
    %78 = vector.load %arg6[%c0_37, %c0_38, %c8] : memref<1x32x64xf32, #tpu.memory_space<vmem>>, vector<1x32x8xf32>
    %79 = vector.shape_cast %78 : vector<1x32x8xf32> to vector<32x8xf32>
    %80 = vector.shape_cast %77 : vector<32x8xf32> to vector<1x32x8xf32>
    tpu.vector_store %arg6[%c0_37, %c0_38, %c8], %80 {strides = array<i32>} : memref<1x32x64xf32, #tpu.memory_space<vmem>>, vector<1x32x8xf32>,
    %c0_39 = arith.constant 0 : index
    %c0_40 = arith.constant 0 : index
    %c4 = arith.constant 4 : index
    %c0_41 = arith.constant 0 : index
    %81 = vector.load %arg2[%c0_39, %c0_40, %c4, %c0_41] : memref<1x16x16x16xf32, #tpu.memory_space<vmem>>, vector<1x16x1x16xf32>
    %82 = vector.shape_cast %81 : vector<1x16x1x16xf32> to vector<16x16xf32>
    %c0_42 = arith.constant 0 : index
    %c0_43 = arith.constant 0 : index
    %c5 = arith.constant 5 : index
    %c0_44 = arith.constant 0 : index
    %83 = vector.load %arg2[%c0_42, %c0_43, %c5, %c0_44] : memref<1x16x16x16xf32, #tpu.memory_space<vmem>>, vector<1x16x1x16xf32>
    %84 = vector.shape_cast %83 : vector<1x16x1x16xf32> to vector<16x16xf32>
    %85 = tpu.concatenate %82, %84 in 0 : vector<16x16xf32>, vector<16x16xf32> -> vector<32x16xf32>
    %cst_45 = arith.constant dense<0.000000e+00> : vector<32xf32>
    %86 = vector.multi_reduction <add>, %85, %cst_45 [1] : vector<32x16xf32> to vector<32xf32>
    %87 = vector.shape_cast %86 : vector<32xf32> to vector<32x1xf32>
    %cst_46 = arith.constant 1.600000e+01 : f32
    %88 = vector.broadcast %cst_46 : f32 to vector<32x1xf32>
    %89 = arith.divf %87, %88 : vector<32x1xf32>
    %90 = vector.broadcast %89 : vector<32x1xf32> to vector<32x16xf32>
    %91 = arith.subf %85, %90 : vector<32x16xf32>
    %92 = arith.mulf %91, %91 : vector<32x16xf32>
    %cst_47 = arith.constant dense<0.000000e+00> : vector<32xf32>
    %93 = vector.multi_reduction <add>, %92, %cst_47 [1] : vector<32x16xf32> to vector<32xf32>
    %94 = vector.shape_cast %93 : vector<32xf32> to vector<32x1xf32>
    %cst_48 = arith.constant 1.600000e+01 : f32
    %95 = vector.broadcast %cst_48 : f32 to vector<32x1xf32>
    %96 = arith.divf %94, %95 : vector<32x1xf32>
    %cst_49 = arith.constant 9.99999974E-6 : f32
    %97 = vector.broadcast %cst_49 : f32 to vector<32x1xf32>
    %98 = arith.addf %96, %97 : vector<32x1xf32>
    %99 = math.rsqrt %98 : vector<32x1xf32>
    %100 = vector.broadcast %99 : vector<32x1xf32> to vector<32x16xf32>
    %101 = arith.mulf %91, %100 : vector<32x16xf32>
    %102 = vector.broadcast %0 : vector<1x16xf32> to vector<32x16xf32>
    %103 = arith.mulf %101, %102 : vector<32x16xf32>
    %104 = vector.broadcast %1 : vector<1x16xf32> to vector<32x16xf32>
    %105 = arith.addf %103, %104 : vector<32x16xf32>
    %cst_50 = arith.constant dense<0.000000e+00> : vector<32x8xf32>
    %106 = tpu.matmul %105, %9, %cst_50 {dimension_numbers = #tpu.dot_dimension_numbers<[1], [0], [0], [1], [0, 0, 1, 1], [], []>} : vector<32x16xf32>, vector<16x8xf32>, vector<32x8xf32> -> vector<32x8xf32>
    %cst_51 = arith.constant dense<0.000000e+00> : vector<32x8xf32>
    %107 = tpu.matmul %105, %16, %cst_51 {dimension_numbers = #tpu.dot_dimension_numbers<[1], [0], [0], [1], [0, 0, 1, 1], [], []>} : vector<32x16xf32>, vector<16x8xf32>, vector<32x8xf32> -> vector<32x8xf32>
    %108 = tpu.concatenate %106, %107 in 0 : vector<32x8xf32>, vector<32x8xf32> -> vector<64x8xf32>
    %cst_52 = arith.constant dense<0.000000e+00> : vector<32x8xf32>
    %109 = tpu.matmul %2, %108, %cst_52 {dimension_numbers = #tpu.dot_dimension_numbers<[1], [0], [0], [1], [0, 0, 1, 1], [], []>} : vector<32x64xf32>, vector<64x8xf32>, vector<32x8xf32> -> vector<32x8xf32>
    %c0_53 = arith.constant 0 : index
    %c0_54 = arith.constant 0 : index
    %c16 = arith.constant 16 : index
    %110 = vector.load %arg6[%c0_53, %c0_54, %c16] : memref<1x32x64xf32, #tpu.memory_space<vmem>>, vector<1x32x8xf32>
    %111 = vector.shape_cast %110 : vector<1x32x8xf32> to vector<32x8xf32>
    %112 = vector.shape_cast %109 : vector<32x8xf32> to vector<1x32x8xf32>
    tpu.vector_store %arg6[%c0_53, %c0_54, %c16], %112 {strides = array<i32>} : memref<1x32x64xf32, #tpu.memory_space<vmem>>, vector<1x32x8xf32>,
    %c0_55 = arith.constant 0 : index
    %c0_56 = arith.constant 0 : index
    %c6 = arith.constant 6 : index
    %c0_57 = arith.constant 0 : index
    %113 = vector.load %arg2[%c0_55, %c0_56, %c6, %c0_57] : memref<1x16x16x16xf32, #tpu.memory_space<vmem>>, vector<1x16x1x16xf32>
    %114 = vector.shape_cast %113 : vector<1x16x1x16xf32> to vector<16x16xf32>
    %c0_58 = arith.constant 0 : index
    %c0_59 = arith.constant 0 : index
    %c7 = arith.constant 7 : index
    %c0_60 = arith.constant 0 : index
    %115 = vector.load %arg2[%c0_58, %c0_59, %c7, %c0_60] : memref<1x16x16x16xf32, #tpu.memory_space<vmem>>, vector<1x16x1x16xf32>
    %116 = vector.shape_cast %115 : vector<1x16x1x16xf32> to vector<16x16xf32>
    %117 = tpu.concatenate %114, %116 in 0 : vector<16x16xf32>, vector<16x16xf32> -> vector<32x16xf32>
    %cst_61 = arith.constant dense<0.000000e+00> : vector<32xf32>
    %118 = vector.multi_reduction <add>, %117, %cst_61 [1] : vector<32x16xf32> to vector<32xf32>
    %119 = vector.shape_cast %118 : vector<32xf32> to vector<32x1xf32>
    %cst_62 = arith.constant 1.600000e+01 : f32
    %120 = vector.broadcast %cst_62 : f32 to vector<32x1xf32>
    %121 = arith.divf %119, %120 : vector<32x1xf32>
    %122 = vector.broadcast %121 : vector<32x1xf32> to vector<32x16xf32>
    %123 = arith.subf %117, %122 : vector<32x16xf32>
    %124 = arith.mulf %123, %123 : vector<32x16xf32>
    %cst_63 = arith.constant dense<0.000000e+00> : vector<32xf32>
    %125 = vector.multi_reduction <add>, %124, %cst_63 [1] : vector<32x16xf32> to vector<32xf32>
    %126 = vector.shape_cast %125 : vector<32xf32> to vector<32x1xf32>
    %cst_64 = arith.constant 1.600000e+01 : f32
    %127 = vector.broadcast %cst_64 : f32 to vector<32x1xf32>
    %128 = arith.divf %126, %127 : vector<32x1xf32>
    %cst_65 = arith.constant 9.99999974E-6 : f32
    %129 = vector.broadcast %cst_65 : f32 to vector<32x1xf32>
    %130 = arith.addf %128, %129 : vector<32x1xf32>
    %131 = math.rsqrt %130 : vector<32x1xf32>
    %132 = vector.broadcast %131 : vector<32x1xf32> to vector<32x16xf32>
    %133 = arith.mulf %123, %132 : vector<32x16xf32>
    %134 = vector.broadcast %0 : vector<1x16xf32> to vector<32x16xf32>
    %135 = arith.mulf %133, %134 : vector<32x16xf32>
    %136 = vector.broadcast %1 : vector<1x16xf32> to vector<32x16xf32>
    %137 = arith.addf %135, %136 : vector<32x16xf32>
    %cst_66 = arith.constant dense<0.000000e+00> : vector<32x8xf32>
    %138 = tpu.matmul %137, %9, %cst_66 {dimension_numbers = #tpu.dot_dimension_numbers<[1], [0], [0], [1], [0, 0, 1, 1], [], []>} : vector<32x16xf32>, vector<16x8xf32>, vector<32x8xf32> -> vector<32x8xf32>
    %cst_67 = arith.constant dense<0.000000e+00> : vector<32x8xf32>
    %139 = tpu.matmul %137, %16, %cst_67 {dimension_numbers = #tpu.dot_dimension_numbers<[1], [0], [0], [1], [0, 0, 1, 1], [], []>} : vector<32x16xf32>, vector<16x8xf32>, vector<32x8xf32> -> vector<32x8xf32>
    %140 = tpu.concatenate %138, %139 in 0 : vector<32x8xf32>, vector<32x8xf32> -> vector<64x8xf32>
    %cst_68 = arith.constant dense<0.000000e+00> : vector<32x8xf32>
    %141 = tpu.matmul %2, %140, %cst_68 {dimension_numbers = #tpu.dot_dimension_numbers<[1], [0], [0], [1], [0, 0, 1, 1], [], []>} : vector<32x64xf32>, vector<64x8xf32>, vector<32x8xf32> -> vector<32x8xf32>
    %c0_69 = arith.constant 0 : index
    %c0_70 = arith.constant 0 : index
    %c24 = arith.constant 24 : index
    %142 = vector.load %arg6[%c0_69, %c0_70, %c24] : memref<1x32x64xf32, #tpu.memory_space<vmem>>, vector<1x32x8xf32>
    %143 = vector.shape_cast %142 : vector<1x32x8xf32> to vector<32x8xf32>
    %144 = vector.shape_cast %141 : vector<32x8xf32> to vector<1x32x8xf32>
    tpu.vector_store %arg6[%c0_69, %c0_70, %c24], %144 {strides = array<i32>} : memref<1x32x64xf32, #tpu.memory_space<vmem>>, vector<1x32x8xf32>,
    %c0_71 = arith.constant 0 : index
    %c0_72 = arith.constant 0 : index
    %c8_73 = arith.constant 8 : index
    %c0_74 = arith.constant 0 : index
    %145 = vector.load %arg2[%c0_71, %c0_72, %c8_73, %c0_74] : memref<1x16x16x16xf32, #tpu.memory_space<vmem>>, vector<1x16x1x16xf32>
    %146 = vector.shape_cast %145 : vector<1x16x1x16xf32> to vector<16x16xf32>
    %c0_75 = arith.constant 0 : index
    %c0_76 = arith.constant 0 : index
    %c9 = arith.constant 9 : index
    %c0_77 = arith.constant 0 : index
    %147 = vector.load %arg2[%c0_75, %c0_76, %c9, %c0_77] : memref<1x16x16x16xf32, #tpu.memory_space<vmem>>, vector<1x16x1x16xf32>
    %148 = vector.shape_cast %147 : vector<1x16x1x16xf32> to vector<16x16xf32>
    %149 = tpu.concatenate %146, %148 in 0 : vector<16x16xf32>, vector<16x16xf32> -> vector<32x16xf32>
    %cst_78 = arith.constant dense<0.000000e+00> : vector<32xf32>
    %150 = vector.multi_reduction <add>, %149, %cst_78 [1] : vector<32x16xf32> to vector<32xf32>
    %151 = vector.shape_cast %150 : vector<32xf32> to vector<32x1xf32>
    %cst_79 = arith.constant 1.600000e+01 : f32
    %152 = vector.broadcast %cst_79 : f32 to vector<32x1xf32>
    %153 = arith.divf %151, %152 : vector<32x1xf32>
    %154 = vector.broadcast %153 : vector<32x1xf32> to vector<32x16xf32>
    %155 = arith.subf %149, %154 : vector<32x16xf32>
    %156 = arith.mulf %155, %155 : vector<32x16xf32>
    %cst_80 = arith.constant dense<0.000000e+00> : vector<32xf32>
    %157 = vector.multi_reduction <add>, %156, %cst_80 [1] : vector<32x16xf32> to vector<32xf32>
    %158 = vector.shape_cast %157 : vector<32xf32> to vector<32x1xf32>
    %cst_81 = arith.constant 1.600000e+01 : f32
    %159 = vector.broadcast %cst_81 : f32 to vector<32x1xf32>
    %160 = arith.divf %158, %159 : vector<32x1xf32>
    %cst_82 = arith.constant 9.99999974E-6 : f32
    %161 = vector.broadcast %cst_82 : f32 to vector<32x1xf32>
    %162 = arith.addf %160, %161 : vector<32x1xf32>
    %163 = math.rsqrt %162 : vector<32x1xf32>
    %164 = vector.broadcast %163 : vector<32x1xf32> to vector<32x16xf32>
    %165 = arith.mulf %155, %164 : vector<32x16xf32>
    %166 = vector.broadcast %0 : vector<1x16xf32> to vector<32x16xf32>
    %167 = arith.mulf %165, %166 : vector<32x16xf32>
    %168 = vector.broadcast %1 : vector<1x16xf32> to vector<32x16xf32>
    %169 = arith.addf %167, %168 : vector<32x16xf32>
    %cst_83 = arith.constant dense<0.000000e+00> : vector<32x8xf32>
    %170 = tpu.matmul %169, %9, %cst_83 {dimension_numbers = #tpu.dot_dimension_numbers<[1], [0], [0], [1], [0, 0, 1, 1], [], []>} : vector<32x16xf32>, vector<16x8xf32>, vector<32x8xf32> -> vector<32x8xf32>
    %cst_84 = arith.constant dense<0.000000e+00> : vector<32x8xf32>
    %171 = tpu.matmul %169, %16, %cst_84 {dimension_numbers = #tpu.dot_dimension_numbers<[1], [0], [0], [1], [0, 0, 1, 1], [], []>} : vector<32x16xf32>, vector<16x8xf32>, vector<32x8xf32> -> vector<32x8xf32>
    %172 = tpu.concatenate %170, %171 in 0 : vector<32x8xf32>, vector<32x8xf32> -> vector<64x8xf32>
    %cst_85 = arith.constant dense<0.000000e+00> : vector<32x8xf32>
    %173 = tpu.matmul %2, %172, %cst_85 {dimension_numbers = #tpu.dot_dimension_numbers<[1], [0], [0], [1], [0, 0, 1, 1], [], []>} : vector<32x64xf32>, vector<64x8xf32>, vector<32x8xf32> -> vector<32x8xf32>
    %c0_86 = arith.constant 0 : index
    %c0_87 = arith.constant 0 : index
    %c32 = arith.constant 32 : index
    %174 = vector.load %arg6[%c0_86, %c0_87, %c32] : memref<1x32x64xf32, #tpu.memory_space<vmem>>, vector<1x32x8xf32>
    %175 = vector.shape_cast %174 : vector<1x32x8xf32> to vector<32x8xf32>
    %176 = vector.shape_cast %173 : vector<32x8xf32> to vector<1x32x8xf32>
    tpu.vector_store %arg6[%c0_86, %c0_87, %c32], %176 {strides = array<i32>} : memref<1x32x64xf32, #tpu.memory_space<vmem>>, vector<1x32x8xf32>,
    %c0_88 = arith.constant 0 : index
    %c0_89 = arith.constant 0 : index
    %c10 = arith.constant 10 : index
    %c0_90 = arith.constant 0 : index
    %177 = vector.load %arg2[%c0_88, %c0_89, %c10, %c0_90] : memref<1x16x16x16xf32, #tpu.memory_space<vmem>>, vector<1x16x1x16xf32>
    %178 = vector.shape_cast %177 : vector<1x16x1x16xf32> to vector<16x16xf32>
    %c0_91 = arith.constant 0 : index
    %c0_92 = arith.constant 0 : index
    %c11 = arith.constant 11 : index
    %c0_93 = arith.constant 0 : index
    %179 = vector.load %arg2[%c0_91, %c0_92, %c11, %c0_93] : memref<1x16x16x16xf32, #tpu.memory_space<vmem>>, vector<1x16x1x16xf32>
    %180 = vector.shape_cast %179 : vector<1x16x1x16xf32> to vector<16x16xf32>
    %181 = tpu.concatenate %178, %180 in 0 : vector<16x16xf32>, vector<16x16xf32> -> vector<32x16xf32>
    %cst_94 = arith.constant dense<0.000000e+00> : vector<32xf32>
    %182 = vector.multi_reduction <add>, %181, %cst_94 [1] : vector<32x16xf32> to vector<32xf32>
    %183 = vector.shape_cast %182 : vector<32xf32> to vector<32x1xf32>
    %cst_95 = arith.constant 1.600000e+01 : f32
    %184 = vector.broadcast %cst_95 : f32 to vector<32x1xf32>
    %185 = arith.divf %183, %184 : vector<32x1xf32>
    %186 = vector.broadcast %185 : vector<32x1xf32> to vector<32x16xf32>
    %187 = arith.subf %181, %186 : vector<32x16xf32>
    %188 = arith.mulf %187, %187 : vector<32x16xf32>
    %cst_96 = arith.constant dense<0.000000e+00> : vector<32xf32>
    %189 = vector.multi_reduction <add>, %188, %cst_96 [1] : vector<32x16xf32> to vector<32xf32>
    %190 = vector.shape_cast %189 : vector<32xf32> to vector<32x1xf32>
    %cst_97 = arith.constant 1.600000e+01 : f32
    %191 = vector.broadcast %cst_97 : f32 to vector<32x1xf32>
    %192 = arith.divf %190, %191 : vector<32x1xf32>
    %cst_98 = arith.constant 9.99999974E-6 : f32
    %193 = vector.broadcast %cst_98 : f32 to vector<32x1xf32>
    %194 = arith.addf %192, %193 : vector<32x1xf32>
    %195 = math.rsqrt %194 : vector<32x1xf32>
    %196 = vector.broadcast %195 : vector<32x1xf32> to vector<32x16xf32>
    %197 = arith.mulf %187, %196 : vector<32x16xf32>
    %198 = vector.broadcast %0 : vector<1x16xf32> to vector<32x16xf32>
    %199 = arith.mulf %197, %198 : vector<32x16xf32>
    %200 = vector.broadcast %1 : vector<1x16xf32> to vector<32x16xf32>
    %201 = arith.addf %199, %200 : vector<32x16xf32>
    %cst_99 = arith.constant dense<0.000000e+00> : vector<32x8xf32>
    %202 = tpu.matmul %201, %9, %cst_99 {dimension_numbers = #tpu.dot_dimension_numbers<[1], [0], [0], [1], [0, 0, 1, 1], [], []>} : vector<32x16xf32>, vector<16x8xf32>, vector<32x8xf32> -> vector<32x8xf32>
    %cst_100 = arith.constant dense<0.000000e+00> : vector<32x8xf32>
    %203 = tpu.matmul %201, %16, %cst_100 {dimension_numbers = #tpu.dot_dimension_numbers<[1], [0], [0], [1], [0, 0, 1, 1], [], []>} : vector<32x16xf32>, vector<16x8xf32>, vector<32x8xf32> -> vector<32x8xf32>
    %204 = tpu.concatenate %202, %203 in 0 : vector<32x8xf32>, vector<32x8xf32> -> vector<64x8xf32>
    %cst_101 = arith.constant dense<0.000000e+00> : vector<32x8xf32>
    %205 = tpu.matmul %2, %204, %cst_101 {dimension_numbers = #tpu.dot_dimension_numbers<[1], [0], [0], [1], [0, 0, 1, 1], [], []>} : vector<32x64xf32>, vector<64x8xf32>, vector<32x8xf32> -> vector<32x8xf32>
    %c0_102 = arith.constant 0 : index
    %c0_103 = arith.constant 0 : index
    %c40 = arith.constant 40 : index
    %206 = vector.load %arg6[%c0_102, %c0_103, %c40] : memref<1x32x64xf32, #tpu.memory_space<vmem>>, vector<1x32x8xf32>
    %207 = vector.shape_cast %206 : vector<1x32x8xf32> to vector<32x8xf32>
    %208 = vector.shape_cast %205 : vector<32x8xf32> to vector<1x32x8xf32>
    tpu.vector_store %arg6[%c0_102, %c0_103, %c40], %208 {strides = array<i32>} : memref<1x32x64xf32, #tpu.memory_space<vmem>>, vector<1x32x8xf32>,
    %c0_104 = arith.constant 0 : index
    %c0_105 = arith.constant 0 : index
    %c12 = arith.constant 12 : index
    %c0_106 = arith.constant 0 : index
    %209 = vector.load %arg2[%c0_104, %c0_105, %c12, %c0_106] : memref<1x16x16x16xf32, #tpu.memory_space<vmem>>, vector<1x16x1x16xf32>
    %210 = vector.shape_cast %209 : vector<1x16x1x16xf32> to vector<16x16xf32>
    %c0_107 = arith.constant 0 : index
    %c0_108 = arith.constant 0 : index
    %c13 = arith.constant 13 : index
    %c0_109 = arith.constant 0 : index
    %211 = vector.load %arg2[%c0_107, %c0_108, %c13, %c0_109] : memref<1x16x16x16xf32, #tpu.memory_space<vmem>>, vector<1x16x1x16xf32>
    %212 = vector.shape_cast %211 : vector<1x16x1x16xf32> to vector<16x16xf32>
    %213 = tpu.concatenate %210, %212 in 0 : vector<16x16xf32>, vector<16x16xf32> -> vector<32x16xf32>
    %cst_110 = arith.constant dense<0.000000e+00> : vector<32xf32>
    %214 = vector.multi_reduction <add>, %213, %cst_110 [1] : vector<32x16xf32> to vector<32xf32>
    %215 = vector.shape_cast %214 : vector<32xf32> to vector<32x1xf32>
    %cst_111 = arith.constant 1.600000e+01 : f32
    %216 = vector.broadcast %cst_111 : f32 to vector<32x1xf32>
    %217 = arith.divf %215, %216 : vector<32x1xf32>
    %218 = vector.broadcast %217 : vector<32x1xf32> to vector<32x16xf32>
    %219 = arith.subf %213, %218 : vector<32x16xf32>
    %220 = arith.mulf %219, %219 : vector<32x16xf32>
    %cst_112 = arith.constant dense<0.000000e+00> : vector<32xf32>
    %221 = vector.multi_reduction <add>, %220, %cst_112 [1] : vector<32x16xf32> to vector<32xf32>
    %222 = vector.shape_cast %221 : vector<32xf32> to vector<32x1xf32>
    %cst_113 = arith.constant 1.600000e+01 : f32
    %223 = vector.broadcast %cst_113 : f32 to vector<32x1xf32>
    %224 = arith.divf %222, %223 : vector<32x1xf32>
    %cst_114 = arith.constant 9.99999974E-6 : f32
    %225 = vector.broadcast %cst_114 : f32 to vector<32x1xf32>
    %226 = arith.addf %224, %225 : vector<32x1xf32>
    %227 = math.rsqrt %226 : vector<32x1xf32>
    %228 = vector.broadcast %227 : vector<32x1xf32> to vector<32x16xf32>
    %229 = arith.mulf %219, %228 : vector<32x16xf32>
    %230 = vector.broadcast %0 : vector<1x16xf32> to vector<32x16xf32>
    %231 = arith.mulf %229, %230 : vector<32x16xf32>
    %232 = vector.broadcast %1 : vector<1x16xf32> to vector<32x16xf32>
    %233 = arith.addf %231, %232 : vector<32x16xf32>
    %cst_115 = arith.constant dense<0.000000e+00> : vector<32x8xf32>
    %234 = tpu.matmul %233, %9, %cst_115 {dimension_numbers = #tpu.dot_dimension_numbers<[1], [0], [0], [1], [0, 0, 1, 1], [], []>} : vector<32x16xf32>, vector<16x8xf32>, vector<32x8xf32> -> vector<32x8xf32>
    %cst_116 = arith.constant dense<0.000000e+00> : vector<32x8xf32>
    %235 = tpu.matmul %233, %16, %cst_116 {dimension_numbers = #tpu.dot_dimension_numbers<[1], [0], [0], [1], [0, 0, 1, 1], [], []>} : vector<32x16xf32>, vector<16x8xf32>, vector<32x8xf32> -> vector<32x8xf32>
    %236 = tpu.concatenate %234, %235 in 0 : vector<32x8xf32>, vector<32x8xf32> -> vector<64x8xf32>
    %cst_117 = arith.constant dense<0.000000e+00> : vector<32x8xf32>
    %237 = tpu.matmul %2, %236, %cst_117 {dimension_numbers = #tpu.dot_dimension_numbers<[1], [0], [0], [1], [0, 0, 1, 1], [], []>} : vector<32x64xf32>, vector<64x8xf32>, vector<32x8xf32> -> vector<32x8xf32>
    %c0_118 = arith.constant 0 : index
    %c0_119 = arith.constant 0 : index
    %c48 = arith.constant 48 : index
    %238 = vector.load %arg6[%c0_118, %c0_119, %c48] : memref<1x32x64xf32, #tpu.memory_space<vmem>>, vector<1x32x8xf32>
    %239 = vector.shape_cast %238 : vector<1x32x8xf32> to vector<32x8xf32>
    %240 = vector.shape_cast %237 : vector<32x8xf32> to vector<1x32x8xf32>
    tpu.vector_store %arg6[%c0_118, %c0_119, %c48], %240 {strides = array<i32>} : memref<1x32x64xf32, #tpu.memory_space<vmem>>, vector<1x32x8xf32>,
    %c0_120 = arith.constant 0 : index
    %c0_121 = arith.constant 0 : index
    %c14 = arith.constant 14 : index
    %c0_122 = arith.constant 0 : index
    %241 = vector.load %arg2[%c0_120, %c0_121, %c14, %c0_122] : memref<1x16x16x16xf32, #tpu.memory_space<vmem>>, vector<1x16x1x16xf32>
    %242 = vector.shape_cast %241 : vector<1x16x1x16xf32> to vector<16x16xf32>
    %c0_123 = arith.constant 0 : index
    %c0_124 = arith.constant 0 : index
    %c15 = arith.constant 15 : index
    %c0_125 = arith.constant 0 : index
    %243 = vector.load %arg2[%c0_123, %c0_124, %c15, %c0_125] : memref<1x16x16x16xf32, #tpu.memory_space<vmem>>, vector<1x16x1x16xf32>
    %244 = vector.shape_cast %243 : vector<1x16x1x16xf32> to vector<16x16xf32>
    %245 = tpu.concatenate %242, %244 in 0 : vector<16x16xf32>, vector<16x16xf32> -> vector<32x16xf32>
    %cst_126 = arith.constant dense<0.000000e+00> : vector<32xf32>
    %246 = vector.multi_reduction <add>, %245, %cst_126 [1] : vector<32x16xf32> to vector<32xf32>
    %247 = vector.shape_cast %246 : vector<32xf32> to vector<32x1xf32>
    %cst_127 = arith.constant 1.600000e+01 : f32
    %248 = vector.broadcast %cst_127 : f32 to vector<32x1xf32>
    %249 = arith.divf %247, %248 : vector<32x1xf32>
    %250 = vector.broadcast %249 : vector<32x1xf32> to vector<32x16xf32>
    %251 = arith.subf %245, %250 : vector<32x16xf32>
    %252 = arith.mulf %251, %251 : vector<32x16xf32>
    %cst_128 = arith.constant dense<0.000000e+00> : vector<32xf32>
    %253 = vector.multi_reduction <add>, %252, %cst_128 [1] : vector<32x16xf32> to vector<32xf32>
    %254 = vector.shape_cast %253 : vector<32xf32> to vector<32x1xf32>
    %cst_129 = arith.constant 1.600000e+01 : f32
    %255 = vector.broadcast %cst_129 : f32 to vector<32x1xf32>
    %256 = arith.divf %254, %255 : vector<32x1xf32>
    %cst_130 = arith.constant 9.99999974E-6 : f32
    %257 = vector.broadcast %cst_130 : f32 to vector<32x1xf32>
    %258 = arith.addf %256, %257 : vector<32x1xf32>
    %259 = math.rsqrt %258 : vector<32x1xf32>
    %260 = vector.broadcast %259 : vector<32x1xf32> to vector<32x16xf32>
    %261 = arith.mulf %251, %260 : vector<32x16xf32>
    %262 = vector.broadcast %0 : vector<1x16xf32> to vector<32x16xf32>
    %263 = arith.mulf %261, %262 : vector<32x16xf32>
    %264 = vector.broadcast %1 : vector<1x16xf32> to vector<32x16xf32>
    %265 = arith.addf %263, %264 : vector<32x16xf32>
    %cst_131 = arith.constant dense<0.000000e+00> : vector<32x8xf32>
    %266 = tpu.matmul %265, %9, %cst_131 {dimension_numbers = #tpu.dot_dimension_numbers<[1], [0], [0], [1], [0, 0, 1, 1], [], []>} : vector<32x16xf32>, vector<16x8xf32>, vector<32x8xf32> -> vector<32x8xf32>
    %cst_132 = arith.constant dense<0.000000e+00> : vector<32x8xf32>
    %267 = tpu.matmul %265, %16, %cst_132 {dimension_numbers = #tpu.dot_dimension_numbers<[1], [0], [0], [1], [0, 0, 1, 1], [], []>} : vector<32x16xf32>, vector<16x8xf32>, vector<32x8xf32> -> vector<32x8xf32>
    %268 = tpu.concatenate %266, %267 in 0 : vector<32x8xf32>, vector<32x8xf32> -> vector<64x8xf32>
    %cst_133 = arith.constant dense<0.000000e+00> : vector<32x8xf32>
    %269 = tpu.matmul %2, %268, %cst_133 {dimension_numbers = #tpu.dot_dimension_numbers<[1], [0], [0], [1], [0, 0, 1, 1], [], []>} : vector<32x64xf32>, vector<64x8xf32>, vector<32x8xf32> -> vector<32x8xf32>
    %c0_134 = arith.constant 0 : index
    %c0_135 = arith.constant 0 : index
    %c56 = arith.constant 56 : index
    %270 = vector.load %arg6[%c0_134, %c0_135, %c56] : memref<1x32x64xf32, #tpu.memory_space<vmem>>, vector<1x32x8xf32>
    %271 = vector.shape_cast %270 : vector<1x32x8xf32> to vector<32x8xf32>
    %272 = vector.shape_cast %269 : vector<32x8xf32> to vector<1x32x8xf32>
    tpu.vector_store %arg6[%c0_134, %c0_135, %c56], %272 {strides = array<i32>} : memref<1x32x64xf32, #tpu.memory_space<vmem>>, vector<1x32x8xf32>,
    return
  }
  func.func @transform_0(%arg0: i32, %arg1: i32) -> (i32, i32, i32, i32) {
    %c0_i32 = arith.constant 0 : i32
    %c0_i32_0 = arith.constant 0 : i32
    %c0_i32_1 = arith.constant 0 : i32
    return %arg0, %c0_i32, %arg1, %c0_i32_0 : i32, i32, i32, i32
  }
  func.func @transform_1(%arg0: i32, %arg1: i32) -> (i32, i32) {
    %c0_i32 = arith.constant 0 : i32
    %c0_i32_0 = arith.constant 0 : i32
    %c0_i32_1 = arith.constant 0 : i32
    return %c0_i32, %c0_i32_0 : i32, i32
  }
  func.func @transform_2(%arg0: i32, %arg1: i32) -> (i32, i32) {
    %c0_i32 = arith.constant 0 : i32
    %c0_i32_0 = arith.constant 0 : i32
    %c0_i32_1 = arith.constant 0 : i32
    return %c0_i32, %c0_i32_0 : i32, i32
  }
  func.func @transform_3(%arg0: i32, %arg1: i32) -> (i32, i32) {
    %c0_i32 = arith.constant 0 : i32
    %c0_i32_0 = arith.constant 0 : i32
    %c0_i32_1 = arith.constant 0 : i32
    return %c0_i32, %c0_i32_0 : i32, i32
  }
  func.func @transform_4(%arg0: i32, %arg1: i32) -> (i32, i32, i32) {
    %c0_i32 = arith.constant 0 : i32
    %c0_i32_0 = arith.constant 0 : i32
    return %arg0, %c0_i32, %arg1 : i32, i32, i32
  }
}

</mosaic_0001>

<bundles_post_ra>
// kernel: tpu_custom_call.1
= control target key start
LH: loop header
LB: loop body
LE: loop exit
PB: predicated region body
PF: predicated region fallthrough
CT: control target
= control target key end

     0   :  { %9 = vsyncpa [#allocation3], 0  ;;  %s6800_s0 = inlined_call_operand.hbm [shape: f32[2,16,16,16], index: 0, kind: input, shape index: {}]   ;;  %s6801_s1 = inlined_call_operand.vmem [shape: f32[1,16], index: 1, kind: input, shape index: {}]   ;;  %s6802_s2 = inlined_call_operand.vmem [shape: f32[1,16], index: 2, kind: input, shape index: {}]   ;;  %s6803_s3 = inlined_call_operand.hbm [shape: f32[32,64], index: 3, kind: input, shape index: {}]   ;;  %s6804_s4 = inlined_call_operand.hbm [shape: f32[2,32,64], index: 4, kind: output, shape index: {}]  }
   0x1   :  { %11 = vsyncpa [#allocation3 + $0x1], 0 }
   0x2   :  { %12 = vsyncpa [#allocation6], 0 }
   0x3   :  { %13 = vsyncpa [#allocation4], 0 }
   0x4   :  { %15 = vsyncpa [#allocation4 + $0x1], 0  ;;  %s5386_s15 = smov 0   ;;  %s5388_s16 = smov 0  }
   0x5   :  { %s5390_s17 = smov 0   ;;  %s5392_s18 = smov 0  }
   0x6   :  { %s5394_s19 = smov 0   ;;  %s5396_s20 = smov 0  }
   0x7 LB: > { %s4180_s21 = sadd.s32 4294967295, %s5345_s20   ;;  %s4181_s22 = sadd.s32 4294967294, %s5345_s20   ;;  %s5345_s20 = sphi %s5396_s20, %s21_s20   ;;  %s5341_s19 = sphi %s5394_s19, %s6832_s19   ;;  %s5337_s18 = sphi %s5392_s18, %s6831_s18   ;;  %s5333_s17 = sphi %s5390_s17, %s6830_s17   ;;  %s5329_s16 = sphi %s5388_s16, %s6829_s16   ;;  %s5325_s15 = sphi %s5386_s15, %s6828_s15  }
   0x8   : > { %p55_p0 = scmp.ne.s32.totalorder %s5329_s16, %s5325_s15  ;;  %p5420_p1 = scmp.eq.s32.totalorder %s4180_s21, 0 }
   0x9   : > { %p5424_p2 = scmp.eq.s32.totalorder %s4180_s21, 1  ;;  %p150_p3 = scmp.eq.s32.totalorder %s4181_s22, 1 }
   0xa   : > { %s6809_s23 = scalar_select %p5420_p1, 1, 0 }
   0xb   : > { %s6810_s24 = scalar_select %p5424_p2, 1, 0 }
   0xc   : > { %p5430_p4 = por %p5420_p1, %p55_p0  ;;  %p4182_p5 = scmp.ge.s32.totalorder %s5345_s20, 1 }
   0xd   : > { %p5435_p6 = por %p150_p3, %p55_p0  ;;  %p157_p7 = scmp.lt.s32.totalorder %s5345_s20, 3 }
   0xe   : > { %s6811_s25 = scalar_select %p5430_p4, 1, 0 }
   0xf   : > { %s6812_s26 = scalar_select %p5435_p6, 1, 0 }
  0x10   : > { %p5440_p8 = pnand %p4182_p5, %p157_p7  ;;  %s5347_s28 = smov [#allocation5]  }
  0x11   : > { %s175_s29 = sshll.u32 %s5347_s28, 4  ;;  %s33_s5 = sadd.s32 1, %s5341_s19  ;;  %s176_s29 = int_to_ptr.vmem [resolvable:$true] %s175_s29 }
  0x12   : > { %s6813_s27 = scalar_select %p5440_p8, 1, 0 }
  0x13   : > { %p5061_p9 = pneg %p5440_p8  ;;  %s5201_s8 = scalar_lea.hbm %s6803_s3, 512 }
  0x14   : > { %p5202_p12 = scmp.ne.s32.totalorder %s6803_s3, %s5201_s8  ;;  %p5208_p5 = scmp.lt.u32.totalorder %s5201_s8, %s6803_s3 }
  0x15   : > { %p5449_p11 = pnand %p5061_p9, %p5420_p1 }
  0x17   : > { %p5203_p13 = pneg %p5449_p11 }
  0x19   : > { %p5204_p0 = pnand %p5203_p13, %p5202_p12 }
  0x1b   : > { %p5205_p3 = pneg %p5204_p0 }
  0x1d   : > { %p5210_p7 = pnand %p5208_p5, %p5205_p3 }
  0x1f   : > { %5213 = shalt.err (!%p5210_p7)
}
  0x20   : > { %s5214_s13 = scalar_lea.vmem %s176_s29, 512  ;;  %p5222_p1 = scmp.lt.s32.totalorder %s176_s29, %s176_s29 }
  0x21   : > { %p5215_p9 = scmp.ne.s32.totalorder %s176_s29, %s5214_s13  ;;  %p5223_p4 = scmp.lt.s32.totalorder %s5214_s13, %s5214_s13 }
  0x23   : > { %p5217_p10 = pnand %p5215_p9, %p5203_p13  ;;  %p5224_p8 = por %p5223_p4, %p5222_p1 }
  0x25   : > { %p5218_p6 = pneg %p5217_p10 }
  0x27   : > { %p5225_p2 = pnand %p5224_p8, %p5218_p6 }
  0x29   : > { %5228 = shalt.err (!%p5225_p2)
}
  0x2a   : > { %s5348_s14 = smov 128   ;;  %s5349_s21 = smov 8  }
  0x2b   : > { %5064 = dma.hbm_to_vmem [thread:$0]  (!%p5449_p11), %s6803_s3, 512, %s176_s29, [#allocation6], %s5348_s14, %s5348_s14, %s5349_s21  }
  0x2c   : > { %p35_p1 = scmp.ge.s32.totalorder %s33_s5, 2  ;;  %s42_s6 = sadd.s32 1, %s5333_s17 }
  0x2d   : > { %p49_p2 = scmp.ne.s32.totalorder %s5333_s17, %s5329_s16  ;;  %p50_p4 = scmp.eq.s32.totalorder %s5345_s20, 0 }
  0x2e   : > { %s6834_s5 = smov (%p35_p1, %s33_s5), 0  ;;  %p6816_p8 = scmp.ne.s32.totalorder %s6810_s24, 0 }
  0x2f   : > { %p5479_p6 = por %p50_p4, %p49_p2  ;;  %s37_s8 = ssub.s32 %s5341_s19, %s6834_s5 }
  0x30   : > { %p5485_p10 = por %p6816_p8, %p49_p2  ;;  %p5074_p12 = scmp.lt.s32.totalorder %s5345_s20, 2 }
  0x31   : > { %p40_p11 = scmp.eq.s32.totalorder %s37_s8, 0  ;;  %s189_s29 = sand.u32 1, %s5333_s17  }
  0x32   : > { %s4185_s9 = sshll.u32 %s189_s29, 8  ;;  %s4331_s11 = sshll.u32 %s5341_s19, 12 }
  0x33   : > { %s5494_s10 = scalar_select %p40_p11, %s5333_s17, %s42_s6  }
  0x34   : > { %s5500_s22 = scalar_lea.hbm %s6800_s0, %s4331_s11  ;;  %s193_s24 = scalar_lea.vmem [#allocation2], %s4185_s9 }
  0x35   : > { %s202_s28 = sshll.u32 %s193_s24, 4  ;;  %p5506_p13 = pnand %p5074_p12, %p5479_p6  ;;  %s5502_s28 = int_to_ptr.vmem [resolvable:$true] %s202_s28 }
  0x36   : > { %s5510_s6 = scalar_lea.sflag [#allocation3], %s189_s29  ;;  %s5229_s12 = scalar_lea.hbm %s5500_s22, 4096 }
  0x37   : > { %p5230_p0 = scmp.ne.s32.totalorder %s5500_s22, %s5229_s12  ;;  %p5231_p3 = pneg %p5506_p13 }
  0x38   : > { %s5234_s7 = scalar_lea.hbm %s6800_s0, 8192  ;;  %p5235_p9 = scmp.lt.u32.totalorder %s5500_s22, %s6800_s0 }
  0x39   : > { %p5232_p5 = pnand %p5231_p3, %p5230_p0  ;;  %p5236_p1 = scmp.lt.u32.totalorder %s5234_s7, %s5229_s12 }
  0x3a   : > { %p5238_p4 = scmp.lt.u32.totalorder %s5229_s12, %s5500_s22 }
  0x3b   : > { %p5233_p7 = pneg %p5232_p5  ;;  %p5237_p2 = por %p5236_p1, %p5235_p9 }
  0x3d   : > { %p5239_p6 = por %p5238_p4, %p5237_p2 }
  0x3f   : > { %p5240_p8 = pnand %p5239_p6, %p5233_p7 }
  0x41   : > { %5243 = shalt.err (!%p5240_p8)
}
  0x42   : > { %s5244_s29 = scalar_lea.vmem %s5502_s28, 4096  ;;  %s5350_s9 = smov [#allocation2]  }
  0x43   : > { %p5245_p12 = scmp.ne.s32.totalorder %s5502_s28, %s5244_s29  ;;  %s5249_s11 = sshll.u32 %s5350_s9, 4  ;;  %s5250_s11 = int_to_ptr.vmem [resolvable:$false] %s5249_s11 }
  0x44   : > { %s5251_s13 = scalar_lea.vmem %s5250_s11, 8192  ;;  %p5252_p5 = scmp.lt.s32.totalorder %s5502_s28, %s5250_s11 }
  0x45   : > { %p5247_p11 = pnand %p5245_p12, %p5231_p3  ;;  %p5253_p9 = scmp.lt.s32.totalorder %s5251_s13, %s5244_s29 }
  0x47   : > { %p5248_p0 = pneg %p5247_p11  ;;  %p5254_p1 = por %p5253_p9, %p5252_p5 }
  0x49   : > { %p5255_p2 = pnand %p5254_p1, %p5248_p0 }
  0x4b   : > { %5258 = shalt.err (!%p5255_p2)
}
  0x4c   : > { %5068 = dma.hbm_to_vmem [thread:$0]  (!%p5506_p13), %s5500_s22, 4096, %s5502_s28, %s5510_s6, %s5348_s14, %s5348_s14, %s5349_s21  }
  0x4d   : > { %p6819_p3 = scmp.ne.s32.totalorder %s6813_s27, 0 }
  0x4e   : > { %s5544_s12 = sand.u32 (!%p6819_p3), 1, %s5329_s16   ;;  %p6820_p7 = scmp.ne.s32.totalorder (!%p6819_p3), %s6811_s25, 0 }
  0x4f   : > { %214 = sbr.rel (%p6819_p3) target bundleno = 1186 (0x4a2), region = 36  ;;  %s4189_s7 = sshll.u32 (!%p6819_p3), %s5544_s12, 8 }
  0x50   : > { %s217_s24 = scalar_lea.sflag (!%p6819_p3), [#allocation3], %s5544_s12  ;;  %s5548_s29 = scalar_lea.vmem (!%p6819_p3), [#allocation2], %s4189_s7 }
  0x56   : > { %5312 = dma.done.wait (%p6820_p7), %s217_s24, 4096  }
  0x57   : > { %5314 = vsyncadd (%p6820_p7), %s217_s24, 4294963200  ;;  %p6821_p13 = scmp.ne.s32.totalorder %s6809_s23, 0 }
  0x59   : > { %5316 = dma.done.wait (%p6821_p13), [#allocation6], 512  }
  0x5a   : > { %5318 = vsyncadd (%p6821_p13), [#allocation6], 4294966784  ;;  %vm324_vm0 = vcmask 1041409   ;;  %vm327_vm1 = vcmask 1042434   ;;  %vm330_vm2 = vcmask 1043459   ;;  %vm333_vm3 = vcmask 1044484  }
  0x5b   : > { %vm336_vm4 = vcmask 1045509   ;;  %vm339_vm5 = vcmask 1046534   ;;  %vm342_vm6 = vcmask 1047559   ;;  %v275_v0 = vld [vmem:[%s5548_s29] sm:$0x1]  ;;  %vm406_vm7 = vcmask 130048  }
  0x5c   : > { %v276_v1 = vld [vmem:[%s5548_s29 + $0x10] sm:$0x1]  ;;  %v277_v2 = vld [vmem:[%s5548_s29 + $0x20] sm:$0x1]  ;;  %v291_v13 = vld [vmem:[%s5548_s29 + $0x1] sm:$0x1] }
  0x5d   : > { %v278_v3 = vld [vmem:[%s5548_s29 + $0x30] sm:$0x1]  ;;  %v279_v4 = vld [vmem:[%s5548_s29 + $0x40] sm:$0x1]  ;;  %v323_v8 = vrot.slane %v276_v1, 7  ;;  %v326_v9 = vrot.slane %v277_v2, 6 }
  0x5e   : > { %v280_v5 = vld [vmem:[%s5548_s29 + $0x50] sm:$0x1]  ;;  %v281_v6 = vld [vmem:[%s5548_s29 + $0x60] sm:$0x1]  ;;  %v329_v10 = vrot.slane %v278_v3, 5  ;;  %v332_v11 = vrot.slane %v279_v4, 4 }
  0x5f   : > { %v282_v7 = vld [vmem:[%s5548_s29 + $0x70] sm:$0x1]  ;;  %v335_v12 = vrot.slane %v280_v5, 3  ;;  %v325_v14 = vsel %vm324_vm0, %v323_v8, %v275_v0  ;;  %v338_v15 = vrot.slane %v281_v6, 2  ;;  %v292_v17 = vld [vmem:[%s5548_s29 + $0x11] sm:$0x1] }
  0x60   : > { %v341_v16 = vrot.slane %v282_v7, 1  ;;  %v293_v18 = vld [vmem:[%s5548_s29 + $0x21] sm:$0x1]  ;;  %v328_v19 = vsel %vm327_vm1, %v326_v9, %v325_v14  ;;  %v294_v20 = vld [vmem:[%s5548_s29 + $0x31] sm:$0x1]  ;;  %v376_v26 = vrot.slane %v292_v17, 7 }
  0x61   : > { %v295_v21 = vld [vmem:[%s5548_s29 + $0x41] sm:$0x1]  ;;  %v296_v22 = vld [vmem:[%s5548_s29 + $0x51] sm:$0x1]  ;;  %v331_v23 = vsel %vm330_vm2, %v329_v10, %v328_v19  ;;  %v378_v27 = vrot.slane %v293_v18, 6  ;;  %v380_v29 = vrot.slane %v294_v20, 5 }
  0x62   : > { %v297_v24 = vld [vmem:[%s5548_s29 + $0x61] sm:$0x1]  ;;  %v298_v25 = vld [vmem:[%s5548_s29 + $0x71] sm:$0x1]  ;;  %v334_v28 = vsel %vm333_vm3, %v332_v11, %v331_v23  ;;  %v382_v30 = vrot.slane %v295_v21, 4  ;;  %v384_v31 = vrot.slane %v296_v22, 3  ;;  %v377_v34 = vsel %vm324_vm0, %v376_v26, %v291_v13 }
  0x63   : > { %v283_v32 = vld [vmem:[%s5548_s29 + $0x80] sm:$0x1]  ;;  %v337_v33 = vsel %vm336_vm4, %v335_v12, %v334_v28  ;;  %v386_v35 = vrot.slane %v297_v24, 2  ;;  %v388_v36 = vrot.slane %v298_v25, 1  ;;  %v284_v37 = vld [vmem:[%s5548_s29 + $0x90] sm:$0x1]  ;;  %v379_v40 = vsel %vm327_vm1, %v378_v27, %v377_v34 }
  0x64   : > { %v285_v38 = vld [vmem:[%s5548_s29 + $0xa0] sm:$0x1]  ;;  %v340_v39 = vsel %vm339_vm5, %v338_v15, %v337_v33  ;;  %v286_v41 = vld [vmem:[%s5548_s29 + $0xb0] sm:$0x1]  ;;  %v381_v45 = vsel %vm330_vm2, %v380_v29, %v379_v40  ;;  %v344_v48 = vrot.slane %v284_v37, 7  ;;  %vm662_vm14 = vcmask 523264  }
  0x65   : > { %v287_v42 = vld [vmem:[%s5548_s29 + $0xc0] sm:$0x1]  ;;  %v288_v43 = vld [vmem:[%s5548_s29 + $0xd0] sm:$0x1]  ;;  %v5589_v44 = vsel %vm342_vm6, %v341_v16, %v340_v39  ;;  %v346_v49 = vrot.slane %v285_v38, 6  ;;  %v383_v51 = vsel %vm333_vm3, %v382_v30, %v381_v45  ;;  %v348_v52 = vrot.slane %v286_v41, 5 }
  0x66   : > { %v289_v46 = vld [vmem:[%s5548_s29 + $0xe0] sm:$0x1]  ;;  %v290_v47 = vld [vmem:[%s5548_s29 + $0xf0] sm:$0x1]  ;;  %v407_v50 = vsel %vm406_vm7, %v5589_v44, 0.0  ;;  %v350_v53 = vrot.slane %v287_v42, 4  ;;  %v385_v55 = vsel %vm336_vm4, %v384_v31, %v383_v51  ;;  %v345_v56 = vsel %vm324_vm0, %v344_v48, %v283_v32 }
  0x67   : > { %v299_v54 = vld [vmem:[%s5548_s29 + $0x81] sm:$0x1]  ;;  %408 = vadd.xlane.f32.xlu0 %v407_v50  ;;  %v352_v57 = vrot.slane %v288_v43, 3  ;;  %v354_v58 = vrot.slane %v289_v46, 2  ;;  %v300_v59 = vld [vmem:[%s5548_s29 + $0x91] sm:$0x1]  ;;  %v387_v61 = vsel %vm339_vm5, %v386_v35, %v385_v55  ;;  %v347_v62 = vsel %vm327_vm1, %v346_v49, %v345_v56 }
  0x68   : > { %v301_v60 = vld [vmem:[%s5548_s29 + $0xa1] sm:$0x1]  ;;  %v356_v63 = vrot.slane %v290_v47, 1  ;;  %v302_v0 = vld [vmem:[%s5548_s29 + $0xb1] sm:$0x1]  ;;  %v390_v2 = vrot.slane %v300_v59, 7  ;;  %v5607_v3 = vsel %vm342_vm6, %v388_v36, %v387_v61  ;;  %v349_v4 = vsel %vm330_vm2, %v348_v52, %v347_v62 }
  0x69   : > { %v303_v1 = vld [vmem:[%s5548_s29 + $0xc1] sm:$0x1]  ;;  %v304_v5 = vld [vmem:[%s5548_s29 + $0xd1] sm:$0x1]  ;;  %v413_v8 = vsel %vm406_vm7, %v5607_v3, 0.0  ;;  %v351_v9 = vsel %vm333_vm3, %v350_v53, %v349_v4  ;;  %v392_v11 = vrot.slane %v301_v60, 6 }
  0x6a   : > { %v305_v6 = vld [vmem:[%s5548_s29 + $0xe1] sm:$0x1]  ;;  %v306_v7 = vld [vmem:[%s5548_s29 + $0xf1] sm:$0x1]  ;;  %v391_v10 = vsel %vm324_vm0, %v390_v2, %v299_v54  ;;  %v766_v12 = vld [vmem:[%s5548_s29 + $0x12] sm:$0x1]  ;;  %414 = vadd.xlane.f32.xlu1 %v413_v8  ;;  %v353_v13 = vsel %vm336_vm4, %v352_v57, %v351_v9 }
  0x6b   : > { %v394_v14 = vrot.slane %v302_v0, 5  ;;  %v396_v15 = vrot.slane %v303_v1, 4  ;;  %v398_v16 = vrot.slane %v304_v5, 3  ;;  %v765_v17 = vld [vmem:[%s5548_s29 + $0x2] sm:$0x1]  ;;  %v355_v19 = vsel %vm339_vm5, %v354_v58, %v353_v13  ;;  %s4191_s21 = sshll.u32 %s5544_s12, 5 }
  0x6c   : > { %v767_v18 = vld [vmem:[%s5548_s29 + $0x22] sm:$0x1]  ;;  %v393_v20 = vsel %vm327_vm1, %v392_v11, %v391_v10  ;;  %v400_v21 = vrot.slane %v305_v6, 2  ;;  %v402_v22 = vrot.slane %v306_v7, 1  ;;  %v768_v23 = vld [vmem:[%s5548_s29 + $0x32] sm:$0x1]  ;;  %v5626_v25 = vsel %vm342_vm6, %v356_v63, %v355_v19 }
  0x6d   : > { %v769_v24 = vld [vmem:[%s5548_s29 + $0x42] sm:$0x1]  ;;  %v395_v26 = vsel %vm330_vm2, %v394_v14, %v393_v20  ;;  %v770_v27 = vld [vmem:[%s5548_s29 + $0x52] sm:$0x1]  ;;  %v410_v30 = vsel %vm406_vm7, %v5626_v25, 0.0  ;;  %v813_v32 = vrot.slane %v766_v12, 7 }
  0x6e   : > { %v771_v28 = vld [vmem:[%s5548_s29 + $0x62] sm:$0x1]  ;;  %v772_v29 = vld [vmem:[%s5548_s29 + $0x72] sm:$0x1]  ;;  %v397_v31 = vsel %vm333_vm3, %v396_v15, %v395_v26  ;;  %v815_v33 = vrot.slane %v767_v18, 6  ;;  %411 = vadd.xlane.f32.xlu0 %v410_v30  ;;  %v817_v35 = vrot.slane %v768_v23, 5 }
  0x6f   : > { %v399_v34 = vsel %vm336_vm4, %v398_v16, %v397_v31  ;;  %v819_v36 = vrot.slane %v769_v24, 4  ;;  %v821_v37 = vrot.slane %v770_v27, 3  ;;  %v773_v38 = vld [vmem:[%s5548_s29 + $0x82] sm:$0x1]  ;;  %v774_v39 = vld [vmem:[%s5548_s29 + $0x92] sm:$0x1]  ;;  %v814_v41 = vsel %vm324_vm0, %v813_v32, %v765_v17 }
  0x70   : > { %v401_v40 = vsel %vm339_vm5, %v400_v21, %v399_v34  ;;  %v823_v42 = vrot.slane %v771_v28, 2  ;;  %v825_v43 = vrot.slane %v772_v29, 1  ;;  %v775_v45 = vld [vmem:[%s5548_s29 + $0xa2] sm:$0x1]  ;;  %v776_v46 = vld [vmem:[%s5548_s29 + $0xb2] sm:$0x1]  ;;  %v816_v48 = vsel %vm327_vm1, %v815_v33, %v814_v41 }
  0x71   : > { %v5643_v47 = vsel %vm342_vm6, %v402_v22, %v401_v40  ;;  %v777_v49 = vld [vmem:[%s5548_s29 + $0xc2] sm:$0x1]  ;;  %v778_v50 = vld [vmem:[%s5548_s29 + $0xd2] sm:$0x1]  ;;  %v818_v53 = vsel %vm330_vm2, %v817_v35, %v816_v48  ;;  %v827_v55 = vrot.slane %v774_v39, 7  ;;  %v829_v56 = vrot.slane %v775_v45, 6 }
  0x72   : > { %v779_v51 = vld [vmem:[%s5548_s29 + $0xe2] sm:$0x1]  ;;  %v416_v52 = vsel %vm406_vm7, %v5643_v47, 0.0  ;;  %v780_v54 = vld [vmem:[%s5548_s29 + $0xf2] sm:$0x1]  ;;  %v820_v57 = vsel %vm333_vm3, %v819_v36, %v818_v53  ;;  %v831_v58 = vrot.slane %v776_v46, 5 }
  0x73   : > { %417 = vadd.xlane.f32.xlu1 %v416_v52  ;;  %v833_v59 = vrot.slane %v777_v49, 4  ;;  %v835_v60 = vrot.slane %v778_v50, 3  ;;  %v781_v61 = vld [vmem:[%s5548_s29 + $0x3] sm:$0x1]  ;;  %v822_v62 = vsel %vm336_vm4, %v821_v37, %v820_v57  ;;  %v828_v63 = vsel %vm324_vm0, %v827_v55, %v773_v38  ;;  %v782_v2 = vld [vmem:[%s5548_s29 + $0x13] sm:$0x1] }
  0x74   : > { %v837_v0 = vrot.slane %v779_v51, 2  ;;  %v839_v1 = vrot.slane %v780_v54, 1  ;;  %v783_v4 = vld [vmem:[%s5548_s29 + $0x23] sm:$0x1]  ;;  %v824_v5 = vsel %vm339_vm5, %v823_v42, %v822_v62  ;;  %v830_v6 = vsel %vm327_vm1, %v829_v56, %v828_v63  ;;  %v784_v7 = vld [vmem:[%s5548_s29 + $0x33] sm:$0x1] }
  0x75   : > { %v785_v8 = vld [vmem:[%s5548_s29 + $0x43] sm:$0x1]  ;;  %v786_v9 = vld [vmem:[%s5548_s29 + $0x53] sm:$0x1]  ;;  %v5665_v10 = vsel %vm342_vm6, %v825_v43, %v824_v5  ;;  %v832_v11 = vsel %vm330_vm2, %v831_v58, %v830_v6  ;;  %v859_v14 = vrot.slane %v782_v2, 7  ;;  %v861_v15 = vrot.slane %v783_v4, 6 }
  0x76   : > { %v787_v12 = vld [vmem:[%s5548_s29 + $0x63] sm:$0x1]  ;;  %v788_v13 = vld [vmem:[%s5548_s29 + $0x73] sm:$0x1]  ;;  %v889_v16 = vsel %vm406_vm7, %v5665_v10, 0.0  ;;  %v834_v17 = vsel %vm333_vm3, %v833_v59, %v832_v11  ;;  %v863_v18 = vrot.slane %v784_v7, 5 }
  0x77   : > { %v865_v19 = vrot.slane %v785_v8, 4  ;;  %v789_v20 = vld [vmem:[%s5548_s29 + $0x83] sm:$0x1]  ;;  %890 = vadd.xlane.f32.xlu0 %v889_v16  ;;  %v836_v21 = vsel %vm336_vm4, %v835_v60, %v834_v17  ;;  %v860_v22 = vsel %vm324_vm0, %v859_v14, %v781_v61  ;;  %v867_v23 = vrot.slane %v786_v9, 3  ;;  %v790_v26 = vld [vmem:[%s5548_s29 + $0x93] sm:$0x1] }
  0x78   : > { %v869_v24 = vrot.slane %v787_v12, 2  ;;  %v791_v27 = vld [vmem:[%s5548_s29 + $0xa3] sm:$0x1]  ;;  %v838_v28 = vsel %vm339_vm5, %v837_v0, %v836_v21  ;;  %v862_v29 = vsel %vm327_vm1, %v861_v15, %v860_v22  ;;  %v871_v30 = vrot.slane %v788_v13, 1  ;;  %v792_v31 = vld [vmem:[%s5548_s29 + $0xb3] sm:$0x1] }
  0x79   : > { %v793_v32 = vld [vmem:[%s5548_s29 + $0xc3] sm:$0x1]  ;;  %v873_v33 = vrot.slane %v790_v26, 7  ;;  %v5683_v34 = vsel %vm342_vm6, %v839_v1, %v838_v28  ;;  %v864_v35 = vsel %vm330_vm2, %v863_v18, %v862_v29  ;;  %v794_v36 = vld [vmem:[%s5548_s29 + $0xd3] sm:$0x1]  ;;  %v875_v42 = vrot.slane %v791_v27, 6 }
  0x7a   : > { %v795_v37 = vld [vmem:[%s5548_s29 + $0xe3] sm:$0x1]  ;;  %v796_v38 = vld [vmem:[%s5548_s29 + $0xf3] sm:$0x1]  ;;  %v892_v39 = vsel %vm406_vm7, %v5683_v34, 0.0  ;;  %v866_v40 = vsel %vm333_vm3, %v865_v19, %v864_v35  ;;  %v877_v46 = vrot.slane %v792_v31, 5 }
  0x7b   : > { %v874_v41 = vsel %vm324_vm0, %v873_v33, %v789_v20  ;;  %v1238_v43 = vld [vmem:[%s5548_s29 + $0x14] sm:$0x1]  ;;  %893 = vadd.xlane.f32.xlu1 %v892_v39  ;;  %v868_v45 = vsel %vm336_vm4, %v867_v23, %v866_v40  ;;  %v879_v48 = vrot.slane %v793_v32, 4  ;;  %v881_v49 = vrot.slane %v794_v36, 3  ;;  %v1237_v50 = vld [vmem:[%s5548_s29 + $0x4] sm:$0x1] }
  0x7c   : > { %v1239_v51 = vld [vmem:[%s5548_s29 + $0x24] sm:$0x1]  ;;  %v870_v52 = vsel %vm339_vm5, %v869_v24, %v868_v45  ;;  %v876_v53 = vsel %vm327_vm1, %v875_v42, %v874_v41  ;;  %v883_v54 = vrot.slane %v795_v37, 2  ;;  %v885_v55 = vrot.slane %v796_v38, 1  ;;  %v1240_v56 = vld [vmem:[%s5548_s29 + $0x34] sm:$0x1] }
  0x7d   : > { %v1241_v57 = vld [vmem:[%s5548_s29 + $0x44] sm:$0x1]  ;;  %v5702_v58 = vsel %vm342_vm6, %v871_v30, %v870_v52  ;;  %v878_v59 = vsel %vm330_vm2, %v877_v46, %v876_v53  ;;  %v1242_v60 = vld [vmem:[%s5548_s29 + $0x54] sm:$0x1]  ;;  %v1285_v1 = vrot.slane %v1238_v43, 7  ;;  %v1287_v2 = vrot.slane %v1239_v51, 6 }
  0x7e   : > { %v1243_v61 = vld [vmem:[%s5548_s29 + $0x64] sm:$0x1]  ;;  %v1244_v62 = vld [vmem:[%s5548_s29 + $0x74] sm:$0x1]  ;;  %v895_v63 = vsel %vm406_vm7, %v5702_v58, 0.0  ;;  %v880_v0 = vsel %vm333_vm3, %v879_v48, %v878_v59  ;;  %v1289_v5 = vrot.slane %v1240_v56, 5 }
  0x7f   : > { %896 = vadd.xlane.f32.xlu0 %v895_v63  ;;  %v882_v4 = vsel %vm336_vm4, %v881_v49, %v880_v0  ;;  %v1291_v6 = vrot.slane %v1241_v57, 4  ;;  %v1293_v7 = vrot.slane %v1242_v60, 3  ;;  %v1245_v8 = vld [vmem:[%s5548_s29 + $0x84] sm:$0x1]  ;;  %v1246_v9 = vld [vmem:[%s5548_s29 + $0x94] sm:$0x1]  ;;  %v1286_v12 = vsel %vm324_vm0, %v1285_v1, %v1237_v50 }
  0x80   : > { %v884_v11 = vsel %vm339_vm5, %v883_v54, %v882_v4  ;;  %v1295_v13 = vrot.slane %v1243_v61, 2  ;;  %v1297_v14 = vrot.slane %v1244_v62, 1  ;;  %v1247_v15 = vld [vmem:[%s5548_s29 + $0xa4] sm:$0x1]  ;;  %v1248_v16 = vld [vmem:[%s5548_s29 + $0xb4] sm:$0x1]  ;;  %v1288_v18 = vsel %vm327_vm1, %v1287_v2, %v1286_v12 }
  0x81   : > { %v5719_v17 = vsel %vm342_vm6, %v885_v55, %v884_v11  ;;  %v1249_v19 = vld [vmem:[%s5548_s29 + $0xc4] sm:$0x1]  ;;  %v1250_v20 = vld [vmem:[%s5548_s29 + $0xd4] sm:$0x1]  ;;  %v1290_v23 = vsel %vm330_vm2, %v1289_v5, %v1288_v18  ;;  %v1299_v26 = vrot.slane %v1246_v9, 7  ;;  %v1301_v27 = vrot.slane %v1247_v15, 6 }
  0x82   : > { %v1251_v21 = vld [vmem:[%s5548_s29 + $0xe4] sm:$0x1]  ;;  %v898_v22 = vsel %vm406_vm7, %v5719_v17, 0.0  ;;  %v1252_v24 = vld [vmem:[%s5548_s29 + $0xf4] sm:$0x1]  ;;  %v1292_v28 = vsel %vm333_vm3, %v1291_v6, %v1290_v23  ;;  %v1303_v29 = vrot.slane %v1248_v16, 5 }
  0x83   : > { %899 = vadd.xlane.f32.xlu1 %v898_v22  ;;  %v1305_v30 = vrot.slane %v1249_v19, 4  ;;  %v1307_v31 = vrot.slane %v1250_v20, 3  ;;  %v1253_v32 = vld [vmem:[%s5548_s29 + $0x5] sm:$0x1]  ;;  %v1294_v33 = vsel %vm336_vm4, %v1293_v7, %v1292_v28  ;;  %v1300_v35 = vsel %vm324_vm0, %v1299_v26, %v1245_v8  ;;  %v1254_v38 = vld [vmem:[%s5548_s29 + $0x15] sm:$0x1] }
  0x84   : > { %v1309_v36 = vrot.slane %v1251_v21, 2  ;;  %v1311_v37 = vrot.slane %v1252_v24, 1  ;;  %v1255_v39 = vld [vmem:[%s5548_s29 + $0x25] sm:$0x1]  ;;  %v1296_v40 = vsel %vm339_vm5, %v1295_v13, %v1294_v33  ;;  %v1302_v41 = vsel %vm327_vm1, %v1301_v27, %v1300_v35  ;;  %v1256_v42 = vld [vmem:[%s5548_s29 + $0x35] sm:$0x1] }
  0x85   : > { %v1257_v43 = vld [vmem:[%s5548_s29 + $0x45] sm:$0x1]  ;;  %v1258_v45 = vld [vmem:[%s5548_s29 + $0x55] sm:$0x1]  ;;  %v5741_v46 = vsel %vm342_vm6, %v1297_v14, %v1296_v40  ;;  %v1304_v48 = vsel %vm330_vm2, %v1303_v29, %v1302_v41  ;;  %v1331_v51 = vrot.slane %v1254_v38, 7  ;;  %v1333_v52 = vrot.slane %v1255_v39, 6 }
  0x86   : > { %v1259_v49 = vld [vmem:[%s5548_s29 + $0x65] sm:$0x1]  ;;  %v1260_v50 = vld [vmem:[%s5548_s29 + $0x75] sm:$0x1]  ;;  %v1361_v53 = vsel %vm406_vm7, %v5741_v46, 0.0  ;;  %v1306_v54 = vsel %vm333_vm3, %v1305_v30, %v1304_v48  ;;  %v1335_v55 = vrot.slane %v1256_v42, 5 }
  0x87   : > { %v1337_v56 = vrot.slane %v1257_v43, 4  ;;  %v1261_v57 = vld [vmem:[%s5548_s29 + $0x85] sm:$0x1]  ;;  %1362 = vadd.xlane.f32.xlu0 %v1361_v53  ;;  %v1308_v59 = vsel %vm336_vm4, %v1307_v31, %v1306_v54  ;;  %v1332_v60 = vsel %vm324_vm0, %v1331_v51, %v1253_v32  ;;  %v1339_v61 = vrot.slane %v1258_v45, 3  ;;  %v1262_v63 = vld [vmem:[%s5548_s29 + $0x95] sm:$0x1] }
  0x88   : > { %v1341_v62 = vrot.slane %v1259_v49, 2  ;;  %v1263_v0 = vld [vmem:[%s5548_s29 + $0xa5] sm:$0x1]  ;;  %v1310_v1 = vsel %vm339_vm5, %v1309_v36, %v1308_v59  ;;  %v1334_v2 = vsel %vm327_vm1, %v1333_v52, %v1332_v60  ;;  %v1343_v4 = vrot.slane %v1260_v50, 1  ;;  %v1264_v5 = vld [vmem:[%s5548_s29 + $0xb5] sm:$0x1] }
  0x89   : > { %v1265_v6 = vld [vmem:[%s5548_s29 + $0xc5] sm:$0x1]  ;;  %v1345_v7 = vrot.slane %v1262_v63, 7  ;;  %v5759_v8 = vsel %vm342_vm6, %v1311_v37, %v1310_v1  ;;  %v1336_v9 = vsel %vm330_vm2, %v1335_v55, %v1334_v2  ;;  %v1266_v11 = vld [vmem:[%s5548_s29 + $0xd5] sm:$0x1]  ;;  %v1347_v18 = vrot.slane %v1263_v0, 6 }
  0x8a   : > { %v1267_v12 = vld [vmem:[%s5548_s29 + $0xe5] sm:$0x1]  ;;  %v1268_v13 = vld [vmem:[%s5548_s29 + $0xf5] sm:$0x1]  ;;  %v1364_v14 = vsel %vm406_vm7, %v5759_v8, 0.0  ;;  %v1338_v15 = vsel %vm333_vm3, %v1337_v56, %v1336_v9  ;;  %v1349_v21 = vrot.slane %v1264_v5, 5 }
  0x8b   : > { %v1346_v16 = vsel %vm324_vm0, %v1345_v7, %v1261_v57  ;;  %v1710_v19 = vld [vmem:[%s5548_s29 + $0x16] sm:$0x1]  ;;  %1365 = vadd.xlane.f32.xlu1 %v1364_v14  ;;  %v1340_v20 = vsel %vm336_vm4, %v1339_v61, %v1338_v15  ;;  %v1351_v22 = vrot.slane %v1265_v6, 4  ;;  %v1353_v23 = vrot.slane %v1266_v11, 3  ;;  %v1709_v24 = vld [vmem:[%s5548_s29 + $0x6] sm:$0x1] }
  0x8c   : > { %v1711_v26 = vld [vmem:[%s5548_s29 + $0x26] sm:$0x1]  ;;  %v1342_v27 = vsel %vm339_vm5, %v1341_v62, %v1340_v20  ;;  %v1348_v28 = vsel %vm327_vm1, %v1347_v18, %v1346_v16  ;;  %v1355_v29 = vrot.slane %v1267_v12, 2  ;;  %v1357_v30 = vrot.slane %v1268_v13, 1  ;;  %v1712_v31 = vld [vmem:[%s5548_s29 + $0x36] sm:$0x1] }
  0x8d   : > { %v1713_v32 = vld [vmem:[%s5548_s29 + $0x46] sm:$0x1]  ;;  %v5778_v33 = vsel %vm342_vm6, %v1343_v4, %v1342_v27  ;;  %v1350_v35 = vsel %vm330_vm2, %v1349_v21, %v1348_v28  ;;  %v1714_v36 = vld [vmem:[%s5548_s29 + $0x56] sm:$0x1]  ;;  %v1757_v41 = vrot.slane %v1710_v19, 7  ;;  %v1759_v42 = vrot.slane %v1711_v26, 6 }
  0x8e   : > { %v1715_v37 = vld [vmem:[%s5548_s29 + $0x66] sm:$0x1]  ;;  %v1716_v38 = vld [vmem:[%s5548_s29 + $0x76] sm:$0x1]  ;;  %v1367_v39 = vsel %vm406_vm7, %v5778_v33, 0.0  ;;  %v1352_v40 = vsel %vm333_vm3, %v1351_v22, %v1350_v35  ;;  %v1761_v45 = vrot.slane %v1712_v31, 5 }
  0x8f   : > { %1368 = vadd.xlane.f32.xlu0 %v1367_v39  ;;  %v1354_v43 = vsel %vm336_vm4, %v1353_v23, %v1352_v40  ;;  %v1763_v48 = vrot.slane %v1713_v32, 4  ;;  %v1765_v49 = vrot.slane %v1714_v36, 3  ;;  %v1717_v50 = vld [vmem:[%s5548_s29 + $0x86] sm:$0x1]  ;;  %v1718_v51 = vld [vmem:[%s5548_s29 + $0x96] sm:$0x1]  ;;  %v1758_v53 = vsel %vm324_vm0, %v1757_v41, %v1709_v24 }
  0x90   : > { %v1356_v52 = vsel %vm339_vm5, %v1355_v29, %v1354_v43  ;;  %v1767_v54 = vrot.slane %v1715_v37, 2  ;;  %v1769_v55 = vrot.slane %v1716_v38, 1  ;;  %v1719_v56 = vld [vmem:[%s5548_s29 + $0xa6] sm:$0x1]  ;;  %v1720_v57 = vld [vmem:[%s5548_s29 + $0xb6] sm:$0x1]  ;;  %v1760_v60 = vsel %vm327_vm1, %v1759_v42, %v1758_v53 }
  0x91   : > { %v5795_v59 = vsel %vm342_vm6, %v1357_v30, %v1356_v52  ;;  %v1721_v61 = vld [vmem:[%s5548_s29 + $0xc6] sm:$0x1]  ;;  %v1722_v62 = vld [vmem:[%s5548_s29 + $0xd6] sm:$0x1]  ;;  %v1762_v1 = vsel %vm330_vm2, %v1761_v45, %v1760_v60  ;;  %v1771_v4 = vrot.slane %v1718_v51, 7  ;;  %v1773_v5 = vrot.slane %v1719_v56, 6 }
  0x92   : > { %v1723_v63 = vld [vmem:[%s5548_s29 + $0xe6] sm:$0x1]  ;;  %v1370_v0 = vsel %vm406_vm7, %v5795_v59, 0.0  ;;  %v1724_v2 = vld [vmem:[%s5548_s29 + $0xf6] sm:$0x1]  ;;  %v1764_v6 = vsel %vm333_vm3, %v1763_v48, %v1762_v1  ;;  %v1775_v7 = vrot.slane %v1720_v57, 5 }
  0x93   : > { %1371 = vadd.xlane.f32.xlu1 %v1370_v0  ;;  %v1777_v9 = vrot.slane %v1721_v61, 4  ;;  %v1779_v11 = vrot.slane %v1722_v62, 3  ;;  %v1725_v12 = vld [vmem:[%s5548_s29 + $0x7] sm:$0x1]  ;;  %v1766_v13 = vsel %vm336_vm4, %v1765_v49, %v1764_v6  ;;  %v1772_v14 = vsel %vm324_vm0, %v1771_v4, %v1717_v50  ;;  %v1726_v18 = vld [vmem:[%s5548_s29 + $0x17] sm:$0x1] }
  0x94   : > { %v1781_v15 = vrot.slane %v1723_v63, 2  ;;  %v1783_v16 = vrot.slane %v1724_v2, 1  ;;  %v1727_v19 = vld [vmem:[%s5548_s29 + $0x27] sm:$0x1]  ;;  %v1768_v20 = vsel %vm339_vm5, %v1767_v54, %v1766_v13  ;;  %v1774_v21 = vsel %vm327_vm1, %v1773_v5, %v1772_v14  ;;  %v1728_v22 = vld [vmem:[%s5548_s29 + $0x37] sm:$0x1] }
  0x95   : > { %v1729_v23 = vld [vmem:[%s5548_s29 + $0x47] sm:$0x1]  ;;  %v1730_v24 = vld [vmem:[%s5548_s29 + $0x57] sm:$0x1]  ;;  %v5817_v26 = vsel %vm342_vm6, %v1769_v55, %v1768_v20  ;;  %v1776_v27 = vsel %vm330_vm2, %v1775_v7, %v1774_v21  ;;  %v1803_v30 = vrot.slane %v1726_v18, 7  ;;  %v1805_v31 = vrot.slane %v1727_v19, 6 }
  0x96   : > { %v1731_v28 = vld [vmem:[%s5548_s29 + $0x67] sm:$0x1]  ;;  %v1732_v29 = vld [vmem:[%s5548_s29 + $0x77] sm:$0x1]  ;;  %v1833_v32 = vsel %vm406_vm7, %v5817_v26, 0.0  ;;  %v1778_v35 = vsel %vm333_vm3, %v1777_v9, %v1776_v27  ;;  %v1807_v36 = vrot.slane %v1728_v22, 5 }
  0x97   : > { %v1809_v37 = vrot.slane %v1729_v23, 4  ;;  %v1733_v38 = vld [vmem:[%s5548_s29 + $0x87] sm:$0x1]  ;;  %1834 = vadd.xlane.f32.xlu0 %v1833_v32  ;;  %v1780_v39 = vsel %vm336_vm4, %v1779_v11, %v1778_v35  ;;  %v1804_v40 = vsel %vm324_vm0, %v1803_v30, %v1725_v12  ;;  %v1811_v41 = vrot.slane %v1730_v24, 3  ;;  %v1734_v43 = vld [vmem:[%s5548_s29 + $0x97] sm:$0x1] }
  0x98   : > { %v1813_v42 = vrot.slane %v1731_v28, 2  ;;  %v1735_v45 = vld [vmem:[%s5548_s29 + $0xa7] sm:$0x1]  ;;  %v1782_v48 = vsel %vm339_vm5, %v1781_v15, %v1780_v39  ;;  %v1806_v49 = vsel %vm327_vm1, %v1805_v31, %v1804_v40  ;;  %v1815_v50 = vrot.slane %v1732_v29, 1  ;;  %v1736_v51 = vld [vmem:[%s5548_s29 + $0xb7] sm:$0x1] }
  0x99   : > { %v1737_v52 = vld [vmem:[%s5548_s29 + $0xc7] sm:$0x1]  ;;  %v1817_v53 = vrot.slane %v1734_v43, 7  ;;  %v5835_v54 = vsel %vm342_vm6, %v1783_v16, %v1782_v48  ;;  %v1808_v55 = vsel %vm330_vm2, %v1807_v36, %v1806_v49  ;;  %v1738_v56 = vld [vmem:[%s5548_s29 + $0xd7] sm:$0x1]  ;;  %v1819_v0 = vrot.slane %v1735_v45, 6 }
  0x9a   : > { %v1739_v57 = vld [vmem:[%s5548_s29 + $0xe7] sm:$0x1]  ;;  %v1740_v60 = vld [vmem:[%s5548_s29 + $0xf7] sm:$0x1]  ;;  %v1836_v61 = vsel %vm406_vm7, %v5835_v54, 0.0  ;;  %v1810_v62 = vsel %vm333_vm3, %v1809_v37, %v1808_v55  ;;  %v1821_v4 = vrot.slane %v1736_v51, 5 }
  0x9b   : > { %v1818_v63 = vsel %vm324_vm0, %v1817_v53, %v1733_v38  ;;  %v2182_v1 = vld [vmem:[%s5548_s29 + $0x18] sm:$0x1]  ;;  %1837 = vadd.xlane.f32.xlu1 %v1836_v61  ;;  %v1812_v2 = vsel %vm336_vm4, %v1811_v41, %v1810_v62  ;;  %v1823_v5 = vrot.slane %v1737_v52, 4  ;;  %v1825_v6 = vrot.slane %v1738_v56, 3  ;;  %v2181_v7 = vld [vmem:[%s5548_s29 + $0x8] sm:$0x1] }
  0x9c   : > { %v2183_v9 = vld [vmem:[%s5548_s29 + $0x28] sm:$0x1]  ;;  %v1814_v11 = vsel %vm339_vm5, %v1813_v42, %v1812_v2  ;;  %v1820_v12 = vsel %vm327_vm1, %v1819_v0, %v1818_v63  ;;  %v1827_v13 = vrot.slane %v1739_v57, 2  ;;  %v1829_v14 = vrot.slane %v1740_v60, 1  ;;  %v2184_v15 = vld [vmem:[%s5548_s29 + $0x38] sm:$0x1] }
  0x9d   : > { %v2185_v16 = vld [vmem:[%s5548_s29 + $0x48] sm:$0x1]  ;;  %v5854_v18 = vsel %vm342_vm6, %v1815_v50, %v1814_v11  ;;  %v1822_v19 = vsel %vm330_vm2, %v1821_v4, %v1820_v12  ;;  %v2186_v20 = vld [vmem:[%s5548_s29 + $0x58] sm:$0x1]  ;;  %v2229_v27 = vrot.slane %v2182_v1, 7  ;;  %v2231_v28 = vrot.slane %v2183_v9, 6 }
  0x9e   : > { %v2187_v21 = vld [vmem:[%s5548_s29 + $0x68] sm:$0x1]  ;;  %v2188_v22 = vld [vmem:[%s5548_s29 + $0x78] sm:$0x1]  ;;  %v1839_v23 = vsel %vm406_vm7, %v5854_v18, 0.0  ;;  %v1824_v24 = vsel %vm333_vm3, %v1823_v5, %v1822_v19  ;;  %v2233_v30 = vrot.slane %v2184_v15, 5 }
  0x9f   : > { %1840 = vadd.xlane.f32.xlu0 %v1839_v23  ;;  %v1826_v29 = vsel %vm336_vm4, %v1825_v6, %v1824_v24  ;;  %v2235_v31 = vrot.slane %v2185_v16, 4  ;;  %v2237_v32 = vrot.slane %v2186_v20, 3  ;;  %v2189_v35 = vld [vmem:[%s5548_s29 + $0x88] sm:$0x1]  ;;  %v2190_v36 = vld [vmem:[%s5548_s29 + $0x98] sm:$0x1]  ;;  %v2230_v38 = vsel %vm324_vm0, %v2229_v27, %v2181_v7 }
  0xa0   : > { %v1828_v37 = vsel %vm339_vm5, %v1827_v13, %v1826_v29  ;;  %v2239_v39 = vrot.slane %v2187_v21, 2  ;;  %v2241_v40 = vrot.slane %v2188_v22, 1  ;;  %v2191_v41 = vld [vmem:[%s5548_s29 + $0xa8] sm:$0x1]  ;;  %v2192_v42 = vld [vmem:[%s5548_s29 + $0xb8] sm:$0x1]  ;;  %v2232_v45 = vsel %vm327_vm1, %v2231_v28, %v2230_v38 }
  0xa1   : > { %v5871_v43 = vsel %vm342_vm6, %v1829_v14, %v1828_v37  ;;  %v2193_v48 = vld [vmem:[%s5548_s29 + $0xc8] sm:$0x1]  ;;  %v2194_v49 = vld [vmem:[%s5548_s29 + $0xd8] sm:$0x1]  ;;  %v2234_v52 = vsel %vm330_vm2, %v2233_v30, %v2232_v45  ;;  %v2243_v55 = vrot.slane %v2190_v36, 7  ;;  %v2245_v56 = vrot.slane %v2191_v41, 6 }
  0xa2   : > { %v2195_v50 = vld [vmem:[%s5548_s29 + $0xe8] sm:$0x1]  ;;  %v1842_v51 = vsel %vm406_vm7, %v5871_v43, 0.0  ;;  %v2196_v53 = vld [vmem:[%s5548_s29 + $0xf8] sm:$0x1]  ;;  %v2236_v57 = vsel %vm333_vm3, %v2235_v31, %v2234_v52  ;;  %v2247_v60 = vrot.slane %v2192_v42, 5 }
  0xa3   : > { %1843 = vadd.xlane.f32.xlu1 %v1842_v51  ;;  %v2249_v61 = vrot.slane %v2193_v48, 4  ;;  %v2251_v62 = vrot.slane %v2194_v49, 3  ;;  %v2197_v63 = vld [vmem:[%s5548_s29 + $0x9] sm:$0x1]  ;;  %v2238_v0 = vsel %vm336_vm4, %v2237_v32, %v2236_v57  ;;  %v2244_v1 = vsel %vm324_vm0, %v2243_v55, %v2189_v35  ;;  %v2198_v5 = vld [vmem:[%s5548_s29 + $0x19] sm:$0x1] }
  0xa4   : > { %v2253_v2 = vrot.slane %v2195_v50, 2  ;;  %v2255_v4 = vrot.slane %v2196_v53, 1  ;;  %v2199_v6 = vld [vmem:[%s5548_s29 + $0x29] sm:$0x1]  ;;  %v2240_v7 = vsel %vm339_vm5, %v2239_v39, %v2238_v0  ;;  %v2246_v9 = vsel %vm327_vm1, %v2245_v56, %v2244_v1  ;;  %v2200_v11 = vld [vmem:[%s5548_s29 + $0x39] sm:$0x1] }
  0xa5   : > { %v2201_v12 = vld [vmem:[%s5548_s29 + $0x49] sm:$0x1]  ;;  %v2202_v13 = vld [vmem:[%s5548_s29 + $0x59] sm:$0x1]  ;;  %v5893_v14 = vsel %vm342_vm6, %v2241_v40, %v2240_v7  ;;  %v2248_v15 = vsel %vm330_vm2, %v2247_v60, %v2246_v9  ;;  %v2275_v20 = vrot.slane %v2198_v5, 7  ;;  %v2277_v21 = vrot.slane %v2199_v6, 6 }
  0xa6   : > { %v2203_v16 = vld [vmem:[%s5548_s29 + $0x69] sm:$0x1]  ;;  %v2204_v19 = vld [vmem:[%s5548_s29 + $0x79] sm:$0x1]  ;;  %v2305_v22 = vsel %vm406_vm7, %v5893_v14, 0.0  ;;  %v2250_v23 = vsel %vm333_vm3, %v2249_v61, %v2248_v15  ;;  %v2279_v24 = vrot.slane %v2200_v11, 5 }
  0xa7   : > { %v2281_v27 = vrot.slane %v2201_v12, 4  ;;  %v2205_v28 = vld [vmem:[%s5548_s29 + $0x89] sm:$0x1]  ;;  %2306 = vadd.xlane.f32.xlu0 %v2305_v22  ;;  %v2252_v29 = vsel %vm336_vm4, %v2251_v62, %v2250_v23  ;;  %v2276_v30 = vsel %vm324_vm0, %v2275_v20, %v2197_v63  ;;  %v2283_v31 = vrot.slane %v2202_v13, 3  ;;  %v2206_v32 = vld [vmem:[%s5548_s29 + $0x99] sm:$0x1] }
  0xa8   : > { %v2207_v35 = vld [vmem:[%s5548_s29 + $0xa9] sm:$0x1]  ;;  %v2254_v36 = vsel %vm339_vm5, %v2253_v2, %v2252_v29  ;;  %v2278_v37 = vsel %vm327_vm1, %v2277_v21, %v2276_v30  ;;  %v2285_v38 = vrot.slane %v2203_v16, 2  ;;  %v2208_v39 = vld [vmem:[%s5548_s29 + $0xb9] sm:$0x1]  ;;  %v2289_v41 = vrot.slane %v2206_v32, 7 }
  0xa9   : > { %v2209_v40 = vld [vmem:[%s5548_s29 + $0xc9] sm:$0x1]  ;;  %v5911_v42 = vsel %vm342_vm6, %v2255_v4, %v2254_v36  ;;  %v2280_v45 = vsel %vm330_vm2, %v2279_v24, %v2278_v37  ;;  %v2287_v48 = vrot.slane %v2204_v19, 1  ;;  %v2210_v49 = vld [vmem:[%s5548_s29 + $0xd9] sm:$0x1]  ;;  %v2291_v56 = vrot.slane %v2207_v35, 6 }
  0xaa   : > { %v2211_v50 = vld [vmem:[%s5548_s29 + $0xe9] sm:$0x1]  ;;  %v2308_v51 = vsel %vm406_vm7, %v5911_v42, 0.0  ;;  %v2282_v52 = vsel %vm333_vm3, %v2281_v27, %v2280_v45  ;;  %v2212_v53 = vld [vmem:[%s5548_s29 + $0xf9] sm:$0x1]  ;;  %v2290_v55 = vsel %vm324_vm0, %v2289_v41, %v2205_v28  ;;  %v2293_v61 = vrot.slane %v2208_v39, 5 }
  0xab   : > { %v2654_v57 = vld [vmem:[%s5548_s29 + $0x1a] sm:$0x1]  ;;  %2309 = vadd.xlane.f32.xlu1 %v2308_v51  ;;  %v2284_v60 = vsel %vm336_vm4, %v2283_v31, %v2282_v52  ;;  %v2295_v62 = vrot.slane %v2209_v40, 4  ;;  %v2297_v63 = vrot.slane %v2210_v49, 3  ;;  %v2653_v0 = vld [vmem:[%s5548_s29 + $0xa] sm:$0x1]  ;;  %v2292_v4 = vsel %vm327_vm1, %v2291_v56, %v2290_v55 }
  0xac   : > { %v2655_v1 = vld [vmem:[%s5548_s29 + $0x2a] sm:$0x1]  ;;  %v2286_v2 = vsel %vm339_vm5, %v2285_v38, %v2284_v60  ;;  %v2299_v5 = vrot.slane %v2211_v50, 2  ;;  %v2656_v6 = vld [vmem:[%s5548_s29 + $0x3a] sm:$0x1]  ;;  %v2294_v11 = vsel %vm330_vm2, %v2293_v61, %v2292_v4  ;;  %v2301_v12 = vrot.slane %v2212_v53, 1 }
  0xad   : > { %v2657_v7 = vld [vmem:[%s5548_s29 + $0x4a] sm:$0x1]  ;;  %v5930_v9 = vsel %vm342_vm6, %v2287_v48, %v2286_v2  ;;  %v2658_v13 = vld [vmem:[%s5548_s29 + $0x5a] sm:$0x1]  ;;  %v2296_v19 = vsel %vm333_vm3, %v2295_v62, %v2294_v11  ;;  %v2701_v21 = vrot.slane %v2654_v57, 7  ;;  %v2703_v22 = vrot.slane %v2655_v1, 6 }
  0xae   : > { %v2659_v15 = vld [vmem:[%s5548_s29 + $0x6a] sm:$0x1]  ;;  %v2311_v16 = vsel %vm406_vm7, %v5930_v9, 0.0  ;;  %v2660_v20 = vld [vmem:[%s5548_s29 + $0x7a] sm:$0x1]  ;;  %v2298_v23 = vsel %vm336_vm4, %v2297_v63, %v2296_v19  ;;  %v2705_v24 = vrot.slane %v2656_v6, 5 }
  0xaf   : > { %2312 = vadd.xlane.f32.xlu0 %v2311_v16  ;;  %v2707_v27 = vrot.slane %v2657_v7, 4  ;;  %v2661_v28 = vld [vmem:[%s5548_s29 + $0x8a] sm:$0x1]  ;;  %v2662_v29 = vld [vmem:[%s5548_s29 + $0x9a] sm:$0x1]  ;;  %v2300_v30 = vsel %vm339_vm5, %v2299_v5, %v2298_v23  ;;  %v2702_v31 = vsel %vm324_vm0, %v2701_v21, %v2653_v0  ;;  %v2709_v32 = vrot.slane %v2658_v13, 3 }
  0xb0   : > { %v2663_v35 = vld [vmem:[%s5548_s29 + $0xaa] sm:$0x1]  ;;  %v2664_v36 = vld [vmem:[%s5548_s29 + $0xba] sm:$0x1]  ;;  %v5947_v37 = vsel %vm342_vm6, %v2301_v12, %v2300_v30  ;;  %v2704_v38 = vsel %vm327_vm1, %v2703_v22, %v2702_v31  ;;  %v2711_v39 = vrot.slane %v2659_v15, 2  ;;  %v2713_v40 = vrot.slane %v2660_v20, 1 }
  0xb1   : > { %v2665_v41 = vld [vmem:[%s5548_s29 + $0xca] sm:$0x1]  ;;  %v2666_v45 = vld [vmem:[%s5548_s29 + $0xda] sm:$0x1]  ;;  %v2314_v48 = vsel %vm406_vm7, %v5947_v37, 0.0  ;;  %v2706_v49 = vsel %vm330_vm2, %v2705_v24, %v2704_v38  ;;  %v2715_v51 = vrot.slane %v2662_v29, 7 }
  0xb2   : > { %v2667_v50 = vld [vmem:[%s5548_s29 + $0xea] sm:$0x1]  ;;  %v2717_v52 = vrot.slane %v2663_v35, 6  ;;  %2315 = vadd.xlane.f32.xlu1 %v2314_v48  ;;  %v2708_v53 = vsel %vm333_vm3, %v2707_v27, %v2706_v49  ;;  %v2668_v55 = vld [vmem:[%s5548_s29 + $0xfa] sm:$0x1]  ;;  %v2719_v56 = vrot.slane %v2664_v36, 5 }
  0xb3   : > { %v2721_v57 = vrot.slane %v2665_v41, 4  ;;  %v2710_v60 = vsel %vm336_vm4, %v2709_v32, %v2708_v53  ;;  %v2716_v61 = vsel %vm324_vm0, %v2715_v51, %v2661_v28  ;;  %v2723_v62 = vrot.slane %v2666_v45, 3  ;;  %v2670_v16 = vld [vmem:[%s5548_s29 + $0x1b] sm:$0x1]  ;;  %v2671_v19 = vld [vmem:[%s5548_s29 + $0x2b] sm:$0x1] }
  0xb4   : > { %v2712_v63 = vsel %vm339_vm5, %v2711_v39, %v2710_v60  ;;  %v2718_v0 = vsel %vm327_vm1, %v2717_v52, %v2716_v61  ;;  %v2725_v1 = vrot.slane %v2667_v50, 2  ;;  %v2727_v5 = vrot.slane %v2668_v55, 1  ;;  %v2669_v21 = vld [vmem:[%s5548_s29 + $0xb] sm:$0x1]  ;;  %v3126_v22 = vld [vmem:[%s5548_s29 + $0x1c] sm:$0x1] }
  0xb5   : > { %v5963_v2 = vsel %vm342_vm6, %v2713_v40, %v2712_v63  ;;  %v2720_v4 = vsel %vm330_vm2, %v2719_v56, %v2718_v0  ;;  %v2747_v20 = vrot.slane %v2670_v16, 7  ;;  %v2672_v23 = vld [vmem:[%s5548_s29 + $0x3b] sm:$0x1]  ;;  %v2749_v24 = vrot.slane %v2671_v19, 6  ;;  %v3127_v28 = vld [vmem:[%s5548_s29 + $0x2c] sm:$0x1] }
  0xb6   : > { %v2777_v6 = vsel %vm406_vm7, %v5963_v2, 0.0  ;;  %v2722_v7 = vsel %vm333_vm3, %v2721_v57, %v2720_v4  ;;  %v3173_v29 = vrot.slane %v3126_v22, 7  ;;  %v3125_v30 = vld [vmem:[%s5548_s29 + $0xc] sm:$0x1]  ;;  %v2673_v31 = vld [vmem:[%s5548_s29 + $0x4b] sm:$0x1] }
  0xb7   : > { %2778 = vadd.xlane.f32.xlu0 %v2777_v6  ;;  %v2724_v11 = vsel %vm336_vm4, %v2723_v62, %v2722_v7  ;;  %v2748_v27 = vsel %vm324_vm0, %v2747_v20, %v2669_v21  ;;  %v2751_v32 = vrot.slane %v2672_v23, 5  ;;  %v3128_v36 = vld [vmem:[%s5548_s29 + $0x3c] sm:$0x1]  ;;  %v3175_v38 = vrot.slane %v3127_v28, 6  ;;  %v2678_v39 = vld [vmem:[%s5548_s29 + $0x9b] sm:$0x1] }
  0xb8   : > { %v2726_v12 = vsel %vm339_vm5, %v2725_v1, %v2724_v11  ;;  %v2750_v35 = vsel %vm327_vm1, %v2749_v24, %v2748_v27  ;;  %v3174_v40 = vsel %vm324_vm0, %v3173_v29, %v3125_v30  ;;  %v2674_v41 = vld [vmem:[%s5548_s29 + $0x5b] sm:$0x1]  ;;  %v2753_v45 = vrot.slane %v2673_v31, 4  ;;  %v3129_v49 = vld [vmem:[%s5548_s29 + $0x4c] sm:$0x1]  ;;  %s6705_s22 = scalar_lea.vmem [#allocation7], %s4191_s21 }
  0xb9   : > { %v5972_v13 = vsel %vm342_vm6, %v2727_v5, %v2726_v12  ;;  %v2752_v48 = vsel %vm330_vm2, %v2751_v32, %v2750_v35  ;;  %v3177_v50 = vrot.slane %v3128_v36, 5  ;;  %v2679_v51 = vld [vmem:[%s5548_s29 + $0xab] sm:$0x1]  ;;  %v2761_v52 = vrot.slane %v2678_v39, 7  ;;  %v3134_v56 = vld [vmem:[%s5548_s29 + $0x9c] sm:$0x1] }
  0xba   : > { %v2780_v15 = vsel %vm406_vm7, %v5972_v13, 0.0  ;;  %v3176_v53 = vsel %vm327_vm1, %v3175_v38, %v3174_v40  ;;  %v2677_v55 = vld [vmem:[%s5548_s29 + $0x8b] sm:$0x1]  ;;  %v2755_v60 = vrot.slane %v2674_v41, 3  ;;  %v2754_v61 = vsel %vm333_vm3, %v2753_v45, %v2752_v48  ;;  %v3130_v62 = vld [vmem:[%s5548_s29 + $0x5c] sm:$0x1] }
  0xbb   : > { %2781 = vadd.xlane.f32.xlu1 %v2780_v15  ;;  %v2675_v57 = vld [vmem:[%s5548_s29 + $0x6b] sm:$0x1]  ;;  %v3179_v63 = vrot.slane %v3129_v49, 4  ;;  %v2680_v0 = vld [vmem:[%s5548_s29 + $0xbb] sm:$0x1]  ;;  %v2763_v1 = vrot.slane %v2679_v51, 6  ;;  %v3178_v4 = vsel %vm330_vm2, %v3177_v50, %v3176_v53  ;;  %v2762_v5 = vsel %vm324_vm0, %v2761_v52, %v2677_v55 }
  0xbc   : > { %v3135_v6 = vld [vmem:[%s5548_s29 + $0xac] sm:$0x1]  ;;  %v3187_v7 = vrot.slane %v3134_v56, 7  ;;  %v2676_v11 = vld [vmem:[%s5548_s29 + $0x7b] sm:$0x1]  ;;  %v2757_v12 = vrot.slane %v2675_v57, 2  ;;  %v2756_v16 = vsel %vm336_vm4, %v2755_v60, %v2754_v61 }
  0xbd   : > { %v3133_v15 = vld [vmem:[%s5548_s29 + $0x8c] sm:$0x1]  ;;  %v3181_v20 = vrot.slane %v3130_v62, 3  ;;  %v2681_v21 = vld [vmem:[%s5548_s29 + $0xcb] sm:$0x1]  ;;  %v2765_v22 = vrot.slane %v2680_v0, 5  ;;  %v3180_v24 = vsel %vm333_vm3, %v3179_v63, %v3178_v4  ;;  %v2764_v27 = vsel %vm327_vm1, %v2763_v1, %v2762_v5 }
  0xbe   : > { %v3131_v19 = vld [vmem:[%s5548_s29 + $0x6c] sm:$0x1]  ;;  %v3136_v28 = vld [vmem:[%s5548_s29 + $0xbc] sm:$0x1]  ;;  %v3189_v29 = vrot.slane %v3135_v6, 6  ;;  %v2759_v31 = vrot.slane %v2676_v11, 1  ;;  %v3188_v32 = vsel %vm324_vm0, %v3187_v7, %v3133_v15  ;;  %v2758_v36 = vsel %vm339_vm5, %v2757_v12, %v2756_v16 }
  0xbf   : > { %v3142_v35 = vld [vmem:[%s5548_s29 + $0x1d] sm:$0x1]  ;;  %v3132_v38 = vld [vmem:[%s5548_s29 + $0x7c] sm:$0x1]  ;;  %v3183_v39 = vrot.slane %v3131_v19, 2  ;;  %v2767_v40 = vrot.slane %v2681_v21, 4  ;;  %v3182_v45 = vsel %vm336_vm4, %v3181_v20, %v3180_v24  ;;  %v2766_v49 = vsel %vm330_vm2, %v2765_v22, %v2764_v27 }
  0xc0   : > { %v2682_v48 = vld [vmem:[%s5548_s29 + $0xdb] sm:$0x1]  ;;  %v3137_v50 = vld [vmem:[%s5548_s29 + $0xcc] sm:$0x1]  ;;  %v3191_v51 = vrot.slane %v3136_v28, 5  ;;  %v3190_v53 = vsel %vm327_vm1, %v3189_v29, %v3188_v32  ;;  %v3219_v56 = vrot.slane %v3142_v35, 7  ;;  %v6027_v60 = vsel %vm342_vm6, %v2759_v31, %v2758_v36 }
  0xc1   : > { %v3143_v55 = vld [vmem:[%s5548_s29 + $0x2d] sm:$0x1]  ;;  %v3185_v61 = vrot.slane %v3132_v38, 1  ;;  %v2683_v62 = vld [vmem:[%s5548_s29 + $0xeb] sm:$0x1]  ;;  %v3184_v0 = vsel %vm339_vm5, %v3183_v39, %v3182_v45  ;;  %v2768_v4 = vsel %vm333_vm3, %v2767_v40, %v2766_v49  ;;  %v2769_v5 = vrot.slane %v2682_v48, 3 }
  0xc2   : > { %v3141_v63 = vld [vmem:[%s5548_s29 + $0xd] sm:$0x1]  ;;  %v2684_v1 = vld [vmem:[%s5548_s29 + $0xfb] sm:$0x1]  ;;  %v3193_v6 = vrot.slane %v3137_v50, 4  ;;  %v3192_v15 = vsel %vm330_vm2, %v3191_v51, %v3190_v53  ;;  %v3221_v19 = vrot.slane %v3143_v55, 6 }
  0xc3   : > { %v3138_v12 = vld [vmem:[%s5548_s29 + $0xdc] sm:$0x1]  ;;  %v3144_v16 = vld [vmem:[%s5548_s29 + $0x3d] sm:$0x1]  ;;  %v2783_v21 = vsel %vm406_vm7, %v6027_v60, 0.0  ;;  %v2771_v22 = vrot.slane %v2683_v62, 2  ;;  %v6048_v28 = vsel %vm342_vm6, %v3185_v61, %v3184_v0  ;;  %v2770_v31 = vsel %vm336_vm4, %v2769_v5, %v2768_v4 }
  0xc4   : > { %v2773_v29 = vrot.slane %v2684_v1, 1  ;;  %v3139_v32 = vld [vmem:[%s5548_s29 + $0xec] sm:$0x1]  ;;  %v3194_v35 = vsel %vm333_vm3, %v3193_v6, %v3192_v15  ;;  %v3195_v36 = vrot.slane %v3138_v12, 3  ;;  %v3223_v38 = vrot.slane %v3144_v16, 5  ;;  %s5352_s28 = smov 8  }
  0xc5   : > { %v3140_v45 = vld [vmem:[%s5548_s29 + $0xfc] sm:$0x1]  ;;  %v3145_v48 = vld [vmem:[%s5548_s29 + $0x4d] sm:$0x1]  ;;  %v3249_v53 = vsel %vm406_vm7, %v6048_v28, 0.0  ;;  %v2772_v61 = vsel %vm339_vm5, %v2771_v22, %v2770_v31  ;;  %v3197_v62 = vrot.slane %v3139_v32, 2 }
  0xc6   : > { %v3151_v50 = vld [vmem:[%s5548_s29 + $0xad] sm:$0x1]  ;;  %v3606_v0 = vld [vmem:[%s5548_s29 + $0x9e] sm:$0x1]  ;;  %v3196_v1 = vsel %vm336_vm4, %v3195_v36, %v3194_v35  ;;  %v3146_v4 = vld [vmem:[%s5548_s29 + $0x5d] sm:$0x1] }
  0xc7   : > { %v3149_v55 = vld [vmem:[%s5548_s29 + $0x8d] sm:$0x1]  ;;  %v3225_v6 = vrot.slane %v3145_v48, 4  ;;  %v3235_v12 = vrot.slane %v3151_v50, 6  ;;  %v3198_v32 = vsel %vm339_vm5, %v3197_v62, %v3196_v1  ;;  %v3227_v36 = vrot.slane %v3146_v4, 3  ;;  %s5353_s8 = smov 16  }
  0xc8   : > { %v3147_v35 = vld [vmem:[%s5548_s29 + $0x6d] sm:$0x1]  ;;  %vm760_vm15 = vcmask 64512   ;;  %s5354_s6 = smov 24   ;;  %s5355_s9 = smov 32  }
  0xc9   : > { %v3229_v62 = vrot.slane %v3147_v35, 2  ;;  %s5356_s11 = smov 40   ;;  %s5357_s13 = smov 48  }
  0xca   : > { %s5358_s7 = smov 56   ;;  %s4332_s24 = sshll.u32 %s5337_s18, 9 }
  0xcb   : > { %s6746_s27 = scalar_lea.hbm %s6804_s4, %s4332_s24  ;;  %s4070_s14 = scalar_lea.sflag [#allocation4], %s5544_s12 }
  0xcc   : > { %s5359_s21 = smov [#allocation7]  }
  0xf4   : > { %v409_v23 = vpop.xlane.xlu0 %408 }
  0xf5   : > { %v420_v30 = vmul.f32 0.0625, %v409_v23  ;;  %v3150_v23 = vld [vmem:[%s5548_s29 + $0x9d] sm:$0x1] }
  0xf6   : > { %v3233_v51 = vrot.slane %v3150_v23, 7  ;;  %v3199_v23 = vrot.slane %v3140_v45, 1  ;;  %v3153_v45 = vld [vmem:[%s5548_s29 + $0xcd] sm:$0x1] }
  0xf7   : > { %v6016_v41 = vsub.f32 %v5589_v44, %v420_v30  ;;  %v415_v52 = vpop.xlane.xlu1 %414  ;;  %v3598_v30 = vld [vmem:[%s5548_s29 + $0x1e] sm:$0x1] }
  0xf8   : > { %v422_v57 = vmul.f32 0.0625, %v415_v52 }
  0xf9   : > { %v428_v44 = vmul.f32 %v6016_v41, %v6016_v41 }
  0xfa   : > { %v6035_v7 = vsub.f32 %v5607_v3, %v422_v57  ;;  %v3220_v3 = vsel %vm324_vm0, %v3219_v56, %v3141_v63  ;;  %v3645_v56 = vrot.slane %v3598_v30, 7  ;;  %v3597_v63 = vld [vmem:[%s5548_s29 + $0xe] sm:$0x1] }
  0xfb   : > { %v432_v11 = vsel %vm406_vm7, %v428_v44, 0.0  ;;  %v412_v20 = vpop.xlane.xlu0 %411  ;;  %v3222_v49 = vsel %vm327_vm1, %v3221_v19, %v3220_v3  ;;  %v3234_v19 = vsel %vm324_vm0, %v3233_v51, %v3149_v55  ;;  %v6082_v3 = vsel %vm342_vm6, %v2773_v29, %v2772_v61  ;;  %v3148_v61 = vld [vmem:[%s5548_s29 + $0x7d] sm:$0x1] }
  0xfc   : > { %433 = vadd.xlane.f32.xlu0 %v432_v11  ;;  %v421_v24 = vmul.f32 0.0625, %v412_v20  ;;  %v430_v27 = vmul.f32 %v6035_v7, %v6035_v7  ;;  %v3224_v5 = vsel %vm330_vm2, %v3223_v38, %v3222_v49  ;;  %v3152_v11 = vld [vmem:[%s5548_s29 + $0xbd] sm:$0x1]  ;;  %v3600_v20 = vld [vmem:[%s5548_s29 + $0x3e] sm:$0x1]  ;;  %v3236_v48 = vsel %vm327_vm1, %v3235_v12, %v3234_v19 }
  0xfd   : > { %v3237_v38 = vrot.slane %v3152_v11, 5  ;;  %v3601_v49 = vld [vmem:[%s5548_s29 + $0x4e] sm:$0x1]  ;;  %v3649_v50 = vrot.slane %v3600_v20, 5  ;;  %v3602_v11 = vld [vmem:[%s5548_s29 + $0x5e] sm:$0x1] }
  0xfe   : > { %v6055_v39 = vsub.f32 %v5626_v25, %v421_v24  ;;  %v438_v40 = vsel %vm406_vm7, %v430_v27, 0.0  ;;  %v3599_v25 = vld [vmem:[%s5548_s29 + $0x2e] sm:$0x1]  ;;  %v3646_v24 = vsel %vm324_vm0, %v3645_v56, %v3597_v63  ;;  %v3154_v63 = vld [vmem:[%s5548_s29 + $0xdd] sm:$0x1] }
  0xff   : > { %v3647_v22 = vrot.slane %v3599_v25, 6  ;;  %v3607_v27 = vld [vmem:[%s5548_s29 + $0xae] sm:$0x1]  ;;  %v3608_v25 = vld [vmem:[%s5548_s29 + $0xbe] sm:$0x1] }
 0x100   : > { %v418_v52 = vpop.xlane.xlu1 %417  ;;  %439 = vadd.xlane.f32.xlu0 %v438_v40  ;;  %v429_v44 = vmul.f32 %v6055_v39, %v6055_v39  ;;  %v3226_v40 = vsel %vm333_vm3, %v3225_v6, %v3224_v5  ;;  %v3661_v56 = vrot.slane %v3607_v27, 6  ;;  %v3238_v5 = vsel %vm330_vm2, %v3237_v38, %v3236_v48  ;;  %v3609_v20 = vld [vmem:[%s5548_s29 + $0xce] sm:$0x1]  ;;  %v3610_v48 = vld [vmem:[%s5548_s29 + $0xde] sm:$0x1] }
 0x101   : > { %v423_v57 = vmul.f32 0.0625, %v418_v52  ;;  %v2786_v52 = vsel %vm406_vm7, %v6082_v3, 0.0  ;;  %v3648_v55 = vsel %vm327_vm1, %v3647_v22, %v3646_v24  ;;  %v3228_v4 = vsel %vm336_vm4, %v3227_v36, %v3226_v40  ;;  %v3156_v36 = vld [vmem:[%s5548_s29 + $0xfd] sm:$0x1]  ;;  %v3603_v38 = vld [vmem:[%s5548_s29 + $0x6e] sm:$0x1] }
 0x102   : > { %v435_v16 = vsel %vm406_vm7, %v429_v44, 0.0  ;;  %v6104_v44 = vsel %vm342_vm6, %v3199_v23, %v3198_v32  ;;  %v3239_v6 = vrot.slane %v3153_v45, 4  ;;  %v3650_v19 = vsel %vm330_vm2, %v3649_v50, %v3648_v55  ;;  %v3615_v55 = vld [vmem:[%s5548_s29 + $0x2f] sm:$0x1] }
 0x103   : > { %v6076_v15 = vsub.f32 %v5643_v47, %v423_v57  ;;  %436 = vadd.xlane.f32.xlu1 %v435_v16  ;;  %v3659_v47 = vrot.slane %v3606_v0, 7  ;;  %v3155_v16 = vld [vmem:[%s5548_s29 + $0xed] sm:$0x1]  ;;  %v3663_v22 = vrot.slane %v3608_v25, 5  ;;  %v3252_v23 = vsel %vm406_vm7, %v6104_v44, 0.0 }
 0x104   : > { %2784 = vadd.xlane.f32.xlu0 %v2783_v21  ;;  %v891_v31 = vpop.xlane.xlu0 %890  ;;  %v3605_v21 = vld [vmem:[%s5548_s29 + $0x8e] sm:$0x1]  ;;  %v3231_v24 = vrot.slane %v3148_v61, 1  ;;  %v3241_v27 = vrot.slane %v3154_v63, 3  ;;  %v3230_v35 = vsel %vm339_vm5, %v3229_v62, %v3228_v4  ;;  %v3240_v40 = vsel %vm333_vm3, %v3239_v6, %v3238_v5  ;;  %v3613_v62 = vld [vmem:[%s5548_s29 + $0xf] sm:$0x1] }
 0x105   : > { %v431_v30 = vmul.f32 %v6076_v15, %v6076_v15  ;;  %v901_v29 = vmul.f32 0.0625, %v891_v31  ;;  %v3660_v0 = vsel %vm324_vm0, %v3659_v47, %v3605_v21  ;;  %v3653_v21 = vrot.slane %v3602_v11, 3  ;;  %v3622_v63 = vld [vmem:[%s5548_s29 + $0x9f] sm:$0x1]  ;;  %v3604_v4 = vld [vmem:[%s5548_s29 + $0x7e] sm:$0x1] }
 0x106   : > { %v3662_v47 = vsel %vm327_vm1, %v3661_v56, %v3660_v0  ;;  %v3243_v45 = vrot.slane %v3155_v16, 2  ;;  %v3245_v56 = vrot.slane %v3156_v36, 1  ;;  %v3655_v61 = vrot.slane %v3603_v38, 2  ;;  %v3611_v6 = vld [vmem:[%s5548_s29 + $0xee] sm:$0x1] }
 0x107   : > { %v441_v51 = vsel %vm406_vm7, %v431_v30, 0.0  ;;  %v6101_v57 = vsub.f32 %v5665_v10, %v901_v29  ;;  %v3651_v10 = vrot.slane %v3601_v49, 4  ;;  %v3614_v30 = vld [vmem:[%s5548_s29 + $0x1f] sm:$0x1]  ;;  %v3665_v49 = vrot.slane %v3609_v20, 4 }
 0x108   : > { %442 = vadd.xlane.f32.xlu1 %v441_v51  ;;  %3250 = vadd.xlane.f32.xlu0 %v3249_v53  ;;  %v894_v1 = vpop.xlane.xlu1 %893  ;;  %v3691_v25 = vrot.slane %v3614_v30, 7  ;;  %v3667_v11 = vrot.slane %v3610_v48, 3  ;;  %v3616_v16 = vld [vmem:[%s5548_s29 + $0x3f] sm:$0x1]  ;;  %v3669_v36 = vrot.slane %v3611_v6, 2 }
 0x109   : > { %v902_v53 = vmul.f32 0.0625, %v894_v1  ;;  %v909_v12 = vmul.f32 %v6101_v57, %v6101_v57  ;;  %v3242_v1 = vsel %vm336_vm4, %v3241_v27, %v3240_v40  ;;  %v3623_v27 = vld [vmem:[%s5548_s29 + $0xaf] sm:$0x1]  ;;  %v3695_v48 = vrot.slane %v3616_v16, 5 }
 0x10a   : > { %v3244_v30 = vsel %vm339_vm5, %v3243_v45, %v3242_v1  ;;  %v3621_v38 = vld [vmem:[%s5548_s29 + $0x8f] sm:$0x1] }
 0x10b   : > { %v6122_v31 = vsub.f32 %v5683_v34, %v902_v53  ;;  %v913_v32 = vsel %vm406_vm7, %v909_v12, 0.0  ;;  %v3652_v34 = vsel %vm333_vm3, %v3651_v10, %v3650_v19  ;;  %v6146_v12 = vsel %vm342_vm6, %v3231_v24, %v3230_v35  ;;  %v3612_v35 = vld [vmem:[%s5548_s29 + $0xfe] sm:$0x1] }
 0x10c   : > { %2787 = vadd.xlane.f32.xlu1 %v2786_v52  ;;  %v897_v29 = vpop.xlane.xlu0 %896  ;;  %914 = vadd.xlane.f32.xlu0 %v913_v32  ;;  %v3664_v52 = vsel %vm330_vm2, %v3663_v22, %v3662_v47  ;;  %v3654_v5 = vsel %vm336_vm4, %v3653_v21, %v3652_v34  ;;  %v3693_v19 = vrot.slane %v3615_v55, 6  ;;  %v3705_v47 = vrot.slane %v3622_v63, 7  ;;  %v3617_v34 = vld [vmem:[%s5548_s29 + $0x4f] sm:$0x1] }
 0x10d   : > { %v903_v50 = vmul.f32 0.0625, %v897_v29  ;;  %v910_v51 = vmul.f32 %v6122_v31, %v6122_v31  ;;  %v3656_v32 = vsel %vm339_vm5, %v3655_v61, %v3654_v5  ;;  %v3657_v24 = vrot.slane %v3604_v4, 1  ;;  %v3618_v4 = vld [vmem:[%s5548_s29 + $0x5f] sm:$0x1] }
 0x10e   : > { %v3255_v45 = vsel %vm406_vm7, %v6146_v12, 0.0  ;;  %v6171_v55 = vsel %vm342_vm6, %v3245_v56, %v3244_v30  ;;  %v3706_v61 = vsel %vm324_vm0, %v3705_v47, %v3621_v38  ;;  %v3697_v5 = vrot.slane %v3617_v34, 4  ;;  %v3620_v38 = vld [vmem:[%s5548_s29 + $0x7f] sm:$0x1] }
 0x10f   : > { %v6138_v0 = vsub.f32 %v5702_v58, %v903_v50  ;;  %v916_v53 = vsel %vm406_vm7, %v910_v51, 0.0  ;;  %v3666_v58 = vsel %vm333_vm3, %v3665_v49, %v3664_v52  ;;  %v3624_v50 = vld [vmem:[%s5548_s29 + $0xbf] sm:$0x1]  ;;  %v3707_v51 = vrot.slane %v3623_v27, 6 }
 0x110   : > { %3253 = vadd.xlane.f32.xlu1 %v3252_v23  ;;  %v900_v10 = vpop.xlane.xlu1 %899  ;;  %v3692_v23 = vsel %vm324_vm0, %v3691_v25, %v3613_v62  ;;  %v3668_v40 = vsel %vm336_vm4, %v3667_v11, %v3666_v58  ;;  %v3671_v25 = vrot.slane %v3612_v35, 1  ;;  %v6175_v63 = vsel %vm342_vm6, %v3657_v24, %v3656_v32  ;;  %v3626_v32 = vld [vmem:[%s5548_s29 + $0xdf] sm:$0x1] }
 0x111   : > { %v904_v20 = vmul.f32 0.0625, %v900_v10  ;;  %v911_v22 = vmul.f32 %v6138_v0, %v6138_v0  ;;  %v3694_v49 = vsel %vm327_vm1, %v3693_v19, %v3692_v23  ;;  %v3670_v1 = vsel %vm339_vm5, %v3669_v36, %v3668_v40  ;;  %v3625_v10 = vld [vmem:[%s5548_s29 + $0xcf] sm:$0x1] }
 0x112   : > { %v3696_v11 = vsel %vm330_vm2, %v3695_v48, %v3694_v49  ;;  %v3709_v56 = vrot.slane %v3624_v50, 5  ;;  %v3708_v58 = vsel %vm327_vm1, %v3707_v51, %v3706_v61  ;;  %v3258_v19 = vsel %vm406_vm7, %v6171_v55, 0.0  ;;  %v3619_v23 = vld [vmem:[%s5548_s29 + $0x6f] sm:$0x1] }
 0x113   : > { %v6159_v21 = vsub.f32 %v5719_v17, %v904_v20  ;;  %v919_v29 = vsel %vm406_vm7, %v911_v22, 0.0  ;;  %v3721_v20 = vsel %vm406_vm7, %v6175_v63, 0.0  ;;  %v6191_v22 = vsel %vm342_vm6, %v3671_v25, %v3670_v1  ;;  %v3627_v49 = vld [vmem:[%s5548_s29 + $0xef] sm:$0x1] }
 0x114   : > { %917 = vadd.xlane.f32.xlu1 %v916_v53  ;;  %920 = vadd.xlane.f32.xlu0 %v919_v29  ;;  %v1363_v52 = vpop.xlane.xlu0 %1362  ;;  %v3699_v27 = vrot.slane %v3618_v4, 3  ;;  %v3698_v30 = vsel %vm333_vm3, %v3697_v5, %v3696_v11  ;;  %v3711_v24 = vrot.slane %v3625_v10, 4  ;;  %v3710_v35 = vsel %vm330_vm2, %v3709_v56, %v3708_v58 }
 0x115   : > { %v912_v17 = vmul.f32 %v6159_v21, %v6159_v21  ;;  %v1373_v62 = vmul.f32 0.0625, %v1363_v52  ;;  %v3701_v29 = vrot.slane %v3619_v23, 2  ;;  %v3724_v34 = vsel %vm406_vm7, %v6191_v22, 0.0 }
 0x116   : > { %v3713_v50 = vrot.slane %v3626_v32, 3  ;;  %v3703_v52 = vrot.slane %v3620_v38, 1  ;;  %v3715_v1 = vrot.slane %v3627_v49, 2  ;;  %vm1232_vm0 = vcmask 130112  }
 0x117   : > { %v922_v6 = vsel %vm406_vm7, %v912_v17, 0.0  ;;  %v6183_v53 = vsub.f32 %v5741_v46, %v1373_v62  ;;  %v3712_v17 = vsel %vm333_vm3, %v3711_v24, %v3710_v35  ;;  %v3628_v62 = vld [vmem:[%s5548_s29 + $0xff] sm:$0x1]  ;;  %vm1704_vm1 = vcmask 195712   ;;  %s4084_s29 = sshll.u32 %s6705_s22, 4  ;;  %s6748_s29 = int_to_ptr.vmem [resolvable:$true] %s4084_s29 }
 0x118   : > { %923 = vadd.xlane.f32.xlu1 %v922_v6  ;;  %3256 = vadd.xlane.f32.xlu0 %v3255_v45  ;;  %v1366_v16 = vpop.xlane.xlu1 %1365  ;;  %v3700_v45 = vsel %vm336_vm4, %v3699_v27, %v3698_v30  ;;  %v3714_v6 = vsel %vm336_vm4, %v3713_v50, %v3712_v17  ;;  %vm2176_vm2 = vcmask 261312   ;;  %vm2648_vm3 = vcmask 326912   ;;  %s5259_s18 = scalar_lea.vmem %s6748_s29, 512 }
 0x119   : > { %v1374_v47 = vmul.f32 0.0625, %v1366_v16  ;;  %v1381_v46 = vmul.f32 %v6183_v53, %v6183_v53  ;;  %v3702_v61 = vsel %vm339_vm5, %v3701_v29, %v3700_v45  ;;  %v256_v45 = vlaneseq  ;;  %p5260_p4 = scmp.ne.s32.totalorder %s6748_s29, %s5259_s18 }
 0x11a   : > { %v6221_v56 = vsel %vm342_vm6, %v3703_v52, %v3702_v61  ;;  %vm3120_vm4 = vcmask 392512  }
 0x11b   : > { %v6200_v36 = vsub.f32 %v5759_v8, %v1374_v47  ;;  %v1385_v48 = vsel %vm406_vm7, %v1381_v46, 0.0  ;;  %v3727_v27 = vsel %vm406_vm7, %v6221_v56, 0.0  ;;  %p5261_p6 = pnand %p5260_p4, %p5485_p10 }
 0x11c   : > { %3259 = vadd.xlane.f32.xlu1 %v3258_v19  ;;  %3722 = vadd.xlane.f32.xlu0 %v3721_v20  ;;  %v1369_v40 = vpop.xlane.xlu0 %1368  ;;  %v3716_v19 = vsel %vm339_vm5, %v3715_v1, %v3714_v6  ;;  %vm3592_vm5 = vcmask 458112  }
 0x11d   : > { %v1375_v51 = vmul.f32 0.0625, %v1369_v40  ;;  %v1382_v8 = vmul.f32 %v6200_v36, %v6200_v36  ;;  %p5262_p8 = pneg %p5261_p6 }
 0x11f   : > { %v6212_v25 = vsub.f32 %v5778_v33, %v1375_v51  ;;  %v1388_v5 = vsel %vm406_vm7, %v1382_v8, 0.0  ;;  %v3717_v33 = vrot.slane %v3628_v62, 1  ;;  %v257_v51 = vshrl.u32 %v256_v45, 7 }
 0x120   : > { %3725 = vadd.xlane.f32.xlu1 %v3724_v34  ;;  %1386 = vadd.xlane.f32.xlu0 %v1385_v48  ;;  %v1372_v4 = vpop.xlane.xlu1 %1371  ;;  %v260_v8 = vand.u32 127, %v256_v45 }
 0x121   : > { %v1376_v11 = vmul.f32 0.0625, %v1372_v4  ;;  %v1383_v10 = vmul.f32 %v6212_v25, %v6212_v25  ;;  %v6233_v46 = vsel %vm342_vm6, %v3717_v33, %v3716_v19  ;;  %v258_v61 = vadd.s32 8, %v257_v51 }
 0x122   : > { %v3730_v24 = vsel %vm406_vm7, %v6233_v46, 0.0  ;;  %v261_v62 = vmul.u32 2, %v260_v8  ;;  %vm4064_vm6 = vcmask 523712  }
 0x123   : > { %v6224_v58 = vsub.f32 %v5795_v59, %v1376_v11  ;;  %v1391_v16 = vsel %vm406_vm7, %v1383_v10, 0.0  ;;  %v5351_v10 = vmov 1.0|1.0  }
 0x124   : > { %1389 = vadd.xlane.f32.xlu1 %v1388_v5  ;;  %1392 = vadd.xlane.f32.xlu0 %v1391_v16  ;;  %v1835_v20 = vpop.xlane.xlu0 %1834  ;;  %vm262_vm8 = vcmp.eq.s32.totalorder %v257_v51, %v261_v62  ;;  %vm263_vm9 = vcmp.eq.s32.totalorder %v258_v61, %v261_v62  ;;  %v268_v5 = vadd.s32 1, %v261_v62 }
 0x125   : > { %v1384_v23 = vmul.f32 %v6224_v58, %v6224_v58  ;;  %v1845_v47 = vmul.f32 0.0625, %v1835_v20  ;;  %vm6259_vm10 = vmpackc.low %vm263_vm9, %vm262_vm8 }
 0x126   : > { %4862 = vmatprep.subr.msk.bf16.mxu1 %vm6259_vm10, %v5351_v10  ;;  %vm269_vm11 = vcmp.eq.s32.totalorder %v257_v51, %v268_v5  ;;  %vm270_vm12 = vcmp.eq.s32.totalorder %v258_v61, %v268_v5 }
 0x127   : > { %v1394_v59 = vsel %vm406_vm7, %v1384_v23, 0.0  ;;  %v6237_v30 = vsub.f32 %v5817_v26, %v1845_v47  ;;  %4864 = vmatpush3.bf16.msk.msra.mxu1 %vm6259_vm10, %v5351_v10  ;;  %vm6272_vm13 = vmpackc.low %vm270_vm12, %vm269_vm11 }
 0x128   : > { %1395 = vadd.xlane.f32.xlu1 %v1394_v59  ;;  %3728 = vadd.xlane.f32.xlu0 %v3727_v27  ;;  %v1838_v32 = vpop.xlane.xlu1 %1837 }
 0x129   : > { %v1846_v35 = vmul.f32 0.0625, %v1838_v32  ;;  %v1853_v38 = vmul.f32 %v6237_v30, %v6237_v30  ;;  %4866 = vmatprep.subr.msk.bf16.mxu1 %vm6272_vm13, %v5351_v10 }
 0x12b   : > { %v6244_v29 = vsub.f32 %v5835_v54, %v1846_v35  ;;  %v1857_v40 = vsel %vm406_vm7, %v1853_v38, 0.0 }
 0x12c   : > { %3731 = vadd.xlane.f32.xlu1 %v3730_v24  ;;  %v1841_v34 = vpop.xlane.xlu0 %1840  ;;  %1858 = vadd.xlane.f32.xlu0 %v1857_v40 }
 0x12d   : > { %v1847_v26 = vmul.f32 0.0625, %v1841_v34  ;;  %v1854_v48 = vmul.f32 %v6244_v29, %v6244_v29 }
 0x12f   : > { %v6250_v49 = vsub.f32 %v5854_v18, %v1847_v26  ;;  %v1860_v50 = vsel %vm406_vm7, %v1854_v48, 0.0 }
 0x130   : > { %v1844_v17 = vpop.xlane.xlu1 %1843  ;;  %1861 = vadd.xlane.f32.xlu1 %v1860_v50 }
 0x131   : > { %v1848_v54 = vmul.f32 0.0625, %v1844_v17  ;;  %v1855_v52 = vmul.f32 %v6250_v49, %v6250_v49 }
 0x133   : > { %v6256_v1 = vsub.f32 %v5871_v43, %v1848_v54  ;;  %v1863_v4 = vsel %vm406_vm7, %v1855_v52, 0.0 }
 0x134   : > { %1864 = vadd.xlane.f32.xlu0 %v1863_v4  ;;  %v2307_v6 = vpop.xlane.xlu0 %2306 }
 0x135   : > { %v1856_v11 = vmul.f32 %v6256_v1, %v6256_v1  ;;  %v2317_v43 = vmul.f32 0.0625, %v2307_v6 }
 0x137   : > { %v1866_v33 = vsel %vm406_vm7, %v1856_v11, 0.0  ;;  %v6277_v19 = vsub.f32 %v5893_v14, %v2317_v43 }
 0x138   : > { %1867 = vadd.xlane.f32.xlu1 %v1866_v33  ;;  %v2310_v20 = vpop.xlane.xlu1 %2309 }
 0x139   : > { %v2318_v23 = vmul.f32 0.0625, %v2310_v20  ;;  %v2325_v27 = vmul.f32 %v6277_v19, %v6277_v19 }
 0x13b   : > { %v6285_v47 = vsub.f32 %v5911_v42, %v2318_v23  ;;  %v2329_v59 = vsel %vm406_vm7, %v2325_v27, 0.0 }
 0x13c   : > { %v2313_v32 = vpop.xlane.xlu0 %2312  ;;  %2330 = vadd.xlane.f32.xlu0 %v2329_v59 }
 0x13d   : > { %v2319_v24 = vmul.f32 0.0625, %v2313_v32  ;;  %v2326_v14 = vmul.f32 %v6285_v47, %v6285_v47 }
 0x13f   : > { %v6291_v35 = vsub.f32 %v5930_v9, %v2319_v24  ;;  %v2332_v38 = vsel %vm406_vm7, %v2326_v14, 0.0  ;;  %v2316_v40 = vpop.xlane.xlu1 %2315 }
 0x140   : > { %2333 = vadd.xlane.f32.xlu1 %v2332_v38  ;;  %v2320_v34 = vmul.f32 0.0625, %v2316_v40 }
 0x141   : > { %v2327_v42 = vmul.f32 %v6291_v35, %v6291_v35 }
 0x142   : > { %v6297_v26 = vsub.f32 %v5947_v37, %v2320_v34 }
 0x143   : > { %v2335_v48 = vsel %vm406_vm7, %v2327_v42, 0.0 }
 0x144   : > { %2336 = vadd.xlane.f32.xlu0 %v2335_v48  ;;  %v2779_v45 = vpop.xlane.xlu0 %2778  ;;  %v2328_v50 = vmul.f32 %v6297_v26, %v6297_v26 }
 0x145   : > { %v2789_v9 = vmul.f32 0.0625, %v2779_v45 }
 0x146   : > { %v2338_v51 = vsel %vm406_vm7, %v2328_v50, 0.0 }
 0x147   : > { %v6304_v8 = vsub.f32 %v5963_v2, %v2789_v9  ;;  %2339 = vadd.xlane.f32.xlu1 %v2338_v51 }
 0x148   : > { %v2782_v17 = vpop.xlane.xlu1 %2781 }
 0x149   : > { %v2790_v54 = vmul.f32 0.0625, %v2782_v17  ;;  %v2797_v37 = vmul.f32 %v6304_v8, %v6304_v8 }
 0x14b   : > { %v6309_v52 = vsub.f32 %v5972_v13, %v2790_v54  ;;  %v2801_v61 = vsel %vm406_vm7, %v2797_v37, 0.0  ;;  %v6333_v37 = vld [vmem:[%s6802_s2] ss:$0 sm:$0xff] }
 0x14c   : > { %2802 = vadd.xlane.f32.xlu0 %v2801_v61 }
 0x14d   : > { %v2798_v62 = vmul.f32 %v6309_v52, %v6309_v52 }
 0x14f   : > { %v2804_v4 = vsel %vm406_vm7, %v2798_v62, 0.0 }
 0x150   : > { %2805 = vadd.xlane.f32.xlu1 %v2804_v4 }
 0x189   : > { %v434_v2 = vpop.xlane.xlu0 %433 }
 0x18a   : > { %v444_v5 = vmul.f32 0.0625, %v434_v2 }
 0x18c   : > { %v448_v6 = vadd.f32 1e-05, %v444_v5 }
 0x18d   : > { %v440_v11 = vpop.xlane.xlu0 %439 }
 0x18e   : > { %5137 = vrsqrt.f32 %v448_v6  ;;  %v446_v43 = vmul.f32 0.0625, %v440_v11 }
 0x190   : > { %v450_v33 = vadd.f32 1e-05, %v446_v43  ;;  %v437_v20 = vpop.xlane.xlu1 %436 }
 0x191   : > { %v2785_v23 = vpop.xlane.xlu0 %2784  ;;  %v445_v13 = vmul.f32 0.0625, %v437_v20 }
 0x192   : > { %5139 = vrsqrt.f32 %v450_v33  ;;  %v2791_v27 = vmul.f32 0.0625, %v2785_v23 }
 0x193   : > { %v449_v59 = vadd.f32 1e-05, %v445_v13 }
 0x194   : > { %v6316_v32 = vsub.f32 %v6027_v60, %v2791_v27  ;;  %v6327_v60 = vld [vmem:[%s6801_s1] ss:$0 sm:$0xff] }
 0x195   : > { %v443_v24 = vpop.xlane.xlu1 %442  ;;  %v3251_v14 = vpop.xlane.xlu0 %3250  ;;  %5141 = vrsqrt.f32 %v449_v59 }
 0x196   : > { %v447_v38 = vmul.f32 0.0625, %v443_v24  ;;  %v3261_v40 = vmul.f32 0.0625, %v3251_v14  ;;  %v2799_v34 = vmul.f32 %v6316_v32, %v6316_v32 }
 0x198   : > { %v5138_v42 = vpop.eup %5137  ;;  %v451_v48 = vadd.f32 1e-05, %v447_v38  ;;  %v6321_v45 = vsub.f32 %v6048_v28, %v3261_v40  ;;  %v2807_v50 = vsel %vm406_vm7, %v2799_v34, 0.0 }
 0x199   : > { %v2788_v9 = vpop.xlane.xlu1 %2787  ;;  %2808 = vadd.xlane.f32.xlu0 %v2807_v50  ;;  %v456_v51 = vmul.f32 %v5138_v42, %v6016_v41  ;;  %v915_v54 = vpop.xlane.xlu0 %914 }
 0x19a   : > { %5143 = vrsqrt.f32 %v451_v48  ;;  %v2792_v17 = vmul.f32 0.0625, %v2788_v9  ;;  %v3269_v28 = vmul.f32 %v6321_v45, %v6321_v45  ;;  %v925_v61 = vmul.f32 0.0625, %v915_v54 }
 0x19b   : > { %v466_v62 = vmul.f32 %v6327_v60, %v456_v51 }
 0x19c   : > { %v5140_v4 = vpop.eup %5139  ;;  %v6339_v2 = vsub.f32 %v6082_v3, %v2792_v17  ;;  %v3273_v41 = vsel %vm406_vm7, %v3269_v28, 0.0  ;;  %v929_v6 = vadd.f32 1e-05, %v925_v61 }
 0x19d   : > { %v3254_v5 = vpop.xlane.xlu1 %3253  ;;  %3274 = vadd.xlane.f32.xlu0 %v3273_v41  ;;  %v476_v11 = vadd.f32 %v6333_v37, %v466_v62  ;;  %v458_v43 = vmul.f32 %v5140_v4, %v6035_v7 }
 0x19e   : > { %v3262_v33 = vmul.f32 0.0625, %v3254_v5  ;;  %v2800_v20 = vmul.f32 %v6339_v2, %v6339_v2  ;;  %5145 = vrsqrt.f32 %v929_v6 }
 0x19f   : > { %4529 = vmatprep.mubr.msk.f32.mxu1 %vm406_vm7, %v476_v11  ;;  %v5142_v23 = vpop.eup %5141  ;;  %v468_v27 = vmul.f32 %v6327_v60, %v458_v43 }
 0x1a0   : > { %v6348_v3 = vsub.f32 %v6104_v44, %v3262_v33  ;;  %v2810_v13 = vsel %vm406_vm7, %v2800_v20, 0.0  ;;  %v457_v24 = vmul.f32 %v5142_v23, %v6055_v39 }
 0x1a1   : > { %2811 = vadd.xlane.f32.xlu1 %v2810_v13  ;;  %v918_v59 = vpop.xlane.xlu1 %917  ;;  %v921_v14 = vpop.xlane.xlu0 %920  ;;  %v478_v50 = vadd.f32 %v6333_v37, %v468_v27 }
 0x1a2   : > { %v926_v7 = vmul.f32 0.0625, %v918_v59  ;;  %v3270_v38 = vmul.f32 %v6348_v3, %v6348_v3  ;;  %v927_v40 = vmul.f32 0.0625, %v921_v14  ;;  %v467_v34 = vmul.f32 %v6327_v60, %v457_v24 }
 0x1a4   : > { %v5144_v42 = vpop.eup %5143  ;;  %v930_v48 = vadd.f32 1e-05, %v926_v7  ;;  %v3276_v44 = vsel %vm406_vm7, %v3270_v38, 0.0  ;;  %v931_v9 = vadd.f32 1e-05, %v927_v40  ;;  %v477_v51 = vadd.f32 %v6333_v37, %v467_v34 }
 0x1a5   : > { %3277 = vadd.xlane.f32.xlu1 %v3276_v44  ;;  %v459_v39 = vmul.f32 %v5144_v42, %v6076_v15  ;;  %v924_v17 = vpop.xlane.xlu1 %923  ;;  %v3257_v54 = vpop.xlane.xlu0 %3256 }
 0x1a6   : > { %5147 = vrsqrt.f32 %v930_v48  ;;  %v928_v28 = vmul.f32 0.0625, %v924_v17  ;;  %v3263_v61 = vmul.f32 0.0625, %v3257_v54  ;;  %4530 = vmatmul.mubr.msk.f32.vlgmr.msra.gmra.mrb[0].mxu1 %vm406_vm7, %v477_v51 }
 0x1a7   : > { %5149 = vrsqrt.f32 %v931_v9  ;;  %v469_v62 = vmul.f32 %v6327_v60, %v459_v39  ;;  %4532 = vmatprep.mubr.msk.f32.mxu1 %vm406_vm7, %v478_v50  ;;  %4868 = vmatpush3.bf16.msk.msra.mxu1 %vm6272_vm13, %v5351_v10 }
 0x1a8   : > { %v5146_v4 = vpop.eup %5145  ;;  %v932_v41 = vadd.f32 1e-05, %v928_v28  ;;  %v6367_v15 = vsub.f32 %v6146_v12, %v3263_v61  ;;  %4886 = vmatprep.subr.msk.bf16.mxu1 %vm6259_vm10, %v5351_v10 }
 0x1a9   : > { %v479_v5 = vadd.f32 %v6333_v37, %v469_v62  ;;  %v3260_v6 = vpop.xlane.xlu1 %3259  ;;  %v3723_v43 = vpop.xlane.xlu0 %3722  ;;  %v937_v33 = vmul.f32 %v5146_v4, %v6101_v57 }
 0x1aa   : > { %5151 = vrsqrt.f32 %v932_v41  ;;  %v3264_v20 = vmul.f32 0.0625, %v3260_v6  ;;  %v3733_v23 = vmul.f32 0.0625, %v3723_v43  ;;  %v3271_v13 = vmul.f32 %v6367_v15, %v6367_v15 }
 0x1ab   : > { %4533 = vmatmul.mubr.msk.f32.gmra.mrb[2].mxu1 %vm406_vm7, %v479_v5  ;;  %v941_v12 = vmul.f32 %v6327_v60, %v937_v33 }
 0x1ac   : > { %4539 = vmatprep.mubr.msk.f32.mxu1 %vm406_vm7, %v476_v11  ;;  %v6380_v27 = vsub.f32 %v6171_v55, %v3264_v20  ;;  %v6383_v59 = vsub.f32 %v6175_v63, %v3733_v23  ;;  %v3279_v57 = vsel %vm406_vm7, %v3271_v13, 0.0 }
 0x1ad   : > { %v3726_v24 = vpop.xlane.xlu1 %3725  ;;  %3280 = vadd.xlane.f32.xlu0 %v3279_v57  ;;  %v1387_v7 = vpop.xlane.xlu0 %1386  ;;  %v945_v63 = vadd.f32 %v6333_v37, %v941_v12 }
 0x1ae   : > { %v3734_v14 = vmul.f32 0.0625, %v3726_v24  ;;  %v1397_v38 = vmul.f32 0.0625, %v1387_v7  ;;  %v3272_v11 = vmul.f32 %v6380_v27, %v6380_v27  ;;  %v3741_v40 = vmul.f32 %v6383_v59, %v6383_v59 }
 0x1af   : > { %4540 = vmatmul.mubr.msk.f32.vlgmr.msra.gmra.mrb[4].mxu1 %vm406_vm7, %v477_v51 }
 0x1b0   : > { %v5148_v55 = vpop.eup %5147  ;;  %4542 = vmatprep.mubr.msk.f32.mxu1 %vm406_vm7, %v478_v50  ;;  %4888 = vmatpush3.bf16.msk.msra.mxu1 %vm6259_vm10, %v5351_v10  ;;  %v6398_v48 = vsub.f32 %v6191_v22, %v3734_v14  ;;  %v1401_v44 = vadd.f32 1e-05, %v1397_v38  ;;  %v3282_v9 = vsel %vm406_vm7, %v3272_v11, 0.0  ;;  %v3745_v51 = vsel %vm406_vm7, %v3741_v40, 0.0 }
 0x1b1   : > { %v5150_v34 = vpop.eup %5149  ;;  %v938_v42 = vmul.f32 %v5148_v55, %v6122_v31  ;;  %4890 = vmatprep.subr.msk.bf16.mxu1 %vm6272_vm13, %v5351_v10  ;;  %3283 = vadd.xlane.f32.xlu1 %v3282_v9  ;;  %v1390_v50 = vpop.xlane.xlu1 %1389 }
 0x1b2   : > { %v939_v39 = vmul.f32 %v5150_v34, %v6138_v0  ;;  %5153 = vrsqrt.f32 %v1401_v44  ;;  %v1398_v31 = vmul.f32 0.0625, %v1390_v50  ;;  %3746 = vadd.xlane.f32.xlu0 %v3745_v51  ;;  %v1393_v22 = vpop.xlane.xlu0 %1392  ;;  %v3742_v54 = vmul.f32 %v6398_v48, %v6398_v48 }
 0x1b3   : > { %v942_v17 = vmul.f32 %v6327_v60, %v938_v42  ;;  %4543 = vmatmul.mubr.msk.f32.gmra.mrb[6].mxu1 %vm406_vm7, %v479_v5  ;;  %v1399_v28 = vmul.f32 0.0625, %v1393_v22 }
 0x1b4   : > { %4571 = vmatprep.mubr.msk.f32.mxu1 %vm406_vm7, %v945_v63  ;;  %v943_v61 = vmul.f32 %v6327_v60, %v939_v39  ;;  %v5152_v62 = vpop.eup %5151  ;;  %v1402_v0 = vadd.f32 1e-05, %v1398_v31  ;;  %v3748_v41 = vsel %vm406_vm7, %v3742_v54, 0.0 }
 0x1b5   : > { %v946_v4 = vadd.f32 %v6333_v37, %v942_v17  ;;  %v1403_v6 = vadd.f32 1e-05, %v1399_v28  ;;  %3749 = vadd.xlane.f32.xlu1 %v3748_v41  ;;  %v940_v5 = vmul.f32 %v5152_v62, %v6159_v21  ;;  %v1396_v33 = vpop.xlane.xlu1 %1395 }
 0x1b6   : > { %v947_v43 = vadd.f32 %v6333_v37, %v943_v61  ;;  %5155 = vrsqrt.f32 %v1402_v0  ;;  %v3729_v20 = vpop.xlane.xlu0 %3728  ;;  %v1400_v23 = vmul.f32 0.0625, %v1396_v33 }
 0x1b7   : > { %4572 = vmatmul.mubr.msk.f32.vlgmr.msra.gmra.mrb[8].mxu1 %vm406_vm7, %v946_v4  ;;  %5157 = vrsqrt.f32 %v1403_v6  ;;  %v3735_v13 = vmul.f32 0.0625, %v3729_v20  ;;  %v944_v12 = vmul.f32 %v6327_v60, %v940_v5 }
 0x1b8   : > { %4574 = vmatprep.mubr.msk.f32.mxu1 %vm406_vm7, %v947_v43  ;;  %4892 = vmatpush3.bf16.msk.msra.mxu1 %vm6272_vm13, %v5351_v10  ;;  %v1404_v21 = vadd.f32 1e-05, %v1400_v23 }
 0x1b9   : > { %4910 = vmatprep.subr.msk.bf16.mxu1 %vm6259_vm10, %v5351_v10  ;;  %v6426_v57 = vsub.f32 %v6221_v56, %v3735_v13  ;;  %v948_v24 = vadd.f32 %v6333_v37, %v944_v12  ;;  %v3732_v7 = vpop.xlane.xlu1 %3731 }
 0x1ba   : > { %5159 = vrsqrt.f32 %v1404_v21  ;;  %v3736_v14 = vmul.f32 0.0625, %v3732_v7  ;;  %v1859_v38 = vpop.xlane.xlu0 %1858 }
 0x1bb   : > { %4575 = vmatmul.mubr.msk.f32.gmra.mrb[10].mxu1 %vm406_vm7, %v948_v24  ;;  %v3743_v11 = vmul.f32 %v6426_v57, %v6426_v57  ;;  %v1869_v55 = vmul.f32 0.0625, %v1859_v38 }
 0x1bc   : > { %v5154_v40 = vpop.eup %5153  ;;  %4581 = vmatprep.mubr.msk.f32.mxu1 %vm406_vm7, %v945_v63  ;;  %v6434_v34 = vsub.f32 %v6233_v46, %v3736_v14 }
 0x1bd   : > { %v3751_v56 = vsel %vm406_vm7, %v3743_v11, 0.0  ;;  %v1409_v42 = vmul.f32 %v5154_v40, %v6183_v53  ;;  %v1873_v44 = vadd.f32 1e-05, %v1869_v55  ;;  %v1862_v9 = vpop.xlane.xlu1 %1861 }
 0x1be   : > { %3752 = vadd.xlane.f32.xlu0 %v3751_v56  ;;  %v3744_v50 = vmul.f32 %v6434_v34, %v6434_v34  ;;  %v1870_v63 = vmul.f32 0.0625, %v1862_v9 }
 0x1bf   : > { %4582 = vmatmul.mubr.msk.f32.vlgmr.msra.gmra.mrb[12].mxu1 %vm406_vm7, %v946_v4  ;;  %v1413_v51 = vmul.f32 %v6327_v60, %v1409_v42  ;;  %5161 = vrsqrt.f32 %v1873_v44 }
 0x1c0   : > { %v5156_v39 = vpop.eup %5155  ;;  %4584 = vmatprep.mubr.msk.f32.mxu1 %vm406_vm7, %v947_v43  ;;  %4912 = vmatpush3.bf16.msk.msra.mxu1 %vm6259_vm10, %v5351_v10  ;;  %v3754_v17 = vsel %vm406_vm7, %v3744_v50, 0.0  ;;  %v1874_v22 = vadd.f32 1e-05, %v1870_v63 }
 0x1c1   : > { %v5158_v53 = vpop.eup %5157  ;;  %v1410_v46 = vmul.f32 %v5156_v39, %v6200_v36  ;;  %v1417_v31 = vadd.f32 %v6333_v37, %v1413_v51  ;;  %4914 = vmatprep.subr.msk.bf16.mxu1 %vm6272_vm13, %v5351_v10  ;;  %3755 = vadd.xlane.f32.xlu1 %v3754_v17  ;;  %v1865_v61 = vpop.xlane.xlu0 %1864 }
 0x1c2   : > { %v1411_v54 = vmul.f32 %v5158_v53, %v6212_v25  ;;  %5163 = vrsqrt.f32 %v1874_v22  ;;  %v1871_v62 = vmul.f32 0.0625, %v1865_v61 }
 0x1c3   : > { %v1414_v28 = vmul.f32 %v6327_v60, %v1410_v46  ;;  %4585 = vmatmul.mubr.msk.f32.gmra.mrb[14].mxu1 %vm406_vm7, %v948_v24 }
 0x1c4   : > { %4613 = vmatprep.mubr.msk.f32.mxu1 %vm406_vm7, %v1417_v31  ;;  %v1415_v36 = vmul.f32 %v6327_v60, %v1411_v54  ;;  %v5160_v4 = vpop.eup %5159  ;;  %v1875_v41 = vadd.f32 1e-05, %v1871_v62 }
 0x1c5   : > { %v1418_v0 = vadd.f32 %v6333_v37, %v1414_v28  ;;  %v1412_v43 = vmul.f32 %v5160_v4, %v6224_v58  ;;  %v1868_v25 = vpop.xlane.xlu1 %1867 }
 0x1c6   : > { %v1419_v6 = vadd.f32 %v6333_v37, %v1415_v36  ;;  %5165 = vrsqrt.f32 %v1875_v41  ;;  %v1872_v5 = vmul.f32 0.0625, %v1868_v25 }
 0x1c7   : > { %4614 = vmatmul.mubr.msk.f32.vlgmr.msra.gmra.mrb[16].mxu1 %vm406_vm7, %v1418_v0  ;;  %v1416_v33 = vmul.f32 %v6327_v60, %v1412_v43 }
 0x1c8   : > { %4616 = vmatprep.mubr.msk.f32.mxu1 %vm406_vm7, %v1419_v6  ;;  %4916 = vmatpush3.bf16.msk.msra.mxu1 %vm6272_vm13, %v5351_v10  ;;  %v1876_v23 = vadd.f32 1e-05, %v1872_v5 }
 0x1c9   : > { %4934 = vmatprep.subr.msk.bf16.mxu1 %vm6259_vm10, %v5351_v10  ;;  %v5162_v20 = vpop.eup %5161  ;;  %v1420_v58 = vadd.f32 %v6333_v37, %v1416_v33  ;;  %v2331_v12 = vpop.xlane.xlu0 %2330 }
 0x1ca   : > { %v1881_v13 = vmul.f32 %v5162_v20, %v6237_v30  ;;  %5167 = vrsqrt.f32 %v1876_v23  ;;  %v2341_v21 = vmul.f32 0.0625, %v2331_v12 }
 0x1cb   : > { %4617 = vmatmul.mubr.msk.f32.gmra.mrb[18].mxu1 %vm406_vm7, %v1420_v58 }
 0x1cc   : > { %4623 = vmatprep.mubr.msk.f32.mxu1 %vm406_vm7, %v1417_v31  ;;  %v5164_v24 = vpop.eup %5163  ;;  %v2345_v14 = vadd.f32 1e-05, %v2341_v21  ;;  %v1885_v38 = vmul.f32 %v6327_v60, %v1881_v13 }
 0x1cd   : > { %v1882_v7 = vmul.f32 %v5164_v24, %v6244_v29  ;;  %v2334_v11 = vpop.xlane.xlu1 %2333 }
 0x1ce   : > { %5169 = vrsqrt.f32 %v2345_v14  ;;  %v2342_v40 = vmul.f32 0.0625, %v2334_v11  ;;  %v1889_v56 = vadd.f32 %v6333_v37, %v1885_v38 }
 0x1cf   : > { %4624 = vmatmul.mubr.msk.f32.vlgmr.msra.gmra.mrb[20].mxu1 %vm406_vm7, %v1418_v0  ;;  %v1886_v55 = vmul.f32 %v6327_v60, %v1882_v7 }
 0x1d0   : > { %4626 = vmatprep.mubr.msk.f32.mxu1 %vm406_vm7, %v1419_v6  ;;  %4936 = vmatpush3.bf16.msk.msra.mxu1 %vm6259_vm10, %v5351_v10  ;;  %v5166_v30 = vpop.eup %5165  ;;  %v2346_v29 = vadd.f32 1e-05, %v2342_v40  ;;  %v6559_v40 = vld [vmem:[#allocation5] sm:$0xff] }
 0x1d1   : > { %4938 = vmatprep.subr.msk.bf16.mxu1 %vm6272_vm13, %v5351_v10  ;;  %v1883_v42 = vmul.f32 %v5166_v30, %v6250_v49  ;;  %v2337_v44 = vpop.xlane.xlu0 %2336  ;;  %v1890_v39 = vadd.f32 %v6333_v37, %v1886_v55  ;;  %4561 = vmatprep.mubr.msk.f32.mxu0 %vm662_vm14, %v6559_v40 }
 0x1d2   : > { %5171 = vrsqrt.f32 %v2346_v29  ;;  %v2343_v9 = vmul.f32 0.0625, %v2337_v44 }
 0x1d3   : > { %4627 = vmatmul.mubr.msk.f32.gmra.mrb[22].mxu1 %vm406_vm7, %v1420_v58  ;;  %v1887_v50 = vmul.f32 %v6327_v60, %v1883_v42 }
 0x1d4   : > { %4655 = vmatprep.mubr.msk.f32.mxu1 %vm406_vm7, %v1889_v56  ;;  %v5168_v51 = vpop.eup %5167  ;;  %v2347_v63 = vadd.f32 1e-05, %v2343_v9  ;;  %v2340_v17 = vpop.xlane.xlu1 %2339 }
 0x1d5   : > { %v1891_v53 = vadd.f32 %v6333_v37, %v1887_v50  ;;  %v1884_v46 = vmul.f32 %v5168_v51, %v6256_v1  ;;  %v2344_v49 = vmul.f32 0.0625, %v2340_v17 }
 0x1d6   : > { %5173 = vrsqrt.f32 %v2347_v63 }
 0x1d7   : > { %4656 = vmatmul.mubr.msk.f32.vlgmr.msra.gmra.mrb[24].mxu1 %vm406_vm7, %v1890_v39  ;;  %v1888_v31 = vmul.f32 %v6327_v60, %v1884_v46  ;;  %v2348_v54 = vadd.f32 1e-05, %v2344_v49 }
 0x1d8   : > { %4658 = vmatprep.mubr.msk.f32.mxu1 %vm406_vm7, %v1891_v53  ;;  %4940 = vmatpush3.bf16.msk.msra.mxu1 %vm6272_vm13, %v5351_v10  ;;  %v5170_v22 = vpop.eup %5169 }
 0x1d9   : > { %4958 = vmatprep.subr.msk.bf16.mxu1 %vm6259_vm10, %v5351_v10  ;;  %v1892_v1 = vadd.f32 %v6333_v37, %v1888_v31  ;;  %v2353_v28 = vmul.f32 %v5170_v22, %v6277_v19  ;;  %5175 = vrsqrt.f32 %v2348_v54  ;;  %v2803_v61 = vpop.xlane.xlu0 %2802 }
 0x1da   : > { %v2813_v62 = vmul.f32 0.0625, %v2803_v61 }
 0x1db   : > { %4659 = vmatmul.mubr.msk.f32.gmra.mrb[26].mxu1 %vm406_vm7, %v1892_v1  ;;  %v2357_v41 = vmul.f32 %v6327_v60, %v2353_v28 }
 0x1dc   : > { %4665 = vmatprep.mubr.msk.f32.mxu1 %vm406_vm7, %v1889_v56  ;;  %v5172_v36 = vpop.eup %5171  ;;  %v2817_v0 = vadd.f32 1e-05, %v2813_v62 }
 0x1dd   : > { %v2354_v4 = vmul.f32 %v5172_v36, %v6285_v47  ;;  %v2806_v6 = vpop.xlane.xlu1 %2805  ;;  %v2361_v5 = vadd.f32 %v6333_v37, %v2357_v41 }
 0x1de   : > { %5177 = vrsqrt.f32 %v2817_v0  ;;  %v2814_v43 = vmul.f32 0.0625, %v2806_v6 }
 0x1df   : > { %4666 = vmatmul.mubr.msk.f32.vlgmr.msra.gmra.mrb[28].mxu1 %vm406_vm7, %v1890_v39  ;;  %v2358_v25 = vmul.f32 %v6327_v60, %v2354_v4 }
 0x1e0   : > { %4668 = vmatprep.mubr.msk.f32.mxu1 %vm406_vm7, %v1891_v53  ;;  %4960 = vmatpush3.bf16.msk.msra.mxu1 %vm6259_vm10, %v5351_v10  ;;  %v5174_v19 = vpop.eup %5173  ;;  %v2818_v47 = vadd.f32 1e-05, %v2814_v43 }
 0x1e1   : > { %4962 = vmatprep.subr.msk.bf16.mxu1 %vm6272_vm13, %v5351_v10  ;;  %v2355_v33 = vmul.f32 %v5174_v19, %v6291_v35  ;;  %v2362_v58 = vadd.f32 %v6333_v37, %v2358_v25 }
 0x1e2   : > { %5179 = vrsqrt.f32 %v2818_v47 }
 0x1e3   : > { %4669 = vmatmul.mubr.msk.f32.gmra.mrb[30].mxu1 %vm406_vm7, %v1892_v1  ;;  %v2359_v20 = vmul.f32 %v6327_v60, %v2355_v33  ;;  %v5176_v23 = vpop.eup %5175 }
 0x1e4   : > { %4697 = vmatprep.mubr.msk.f32.mxu1 %vm406_vm7, %v2361_v5  ;;  %v2356_v12 = vmul.f32 %v5176_v23, %v6297_v26 }
 0x1e5   : > { %v2363_v13 = vadd.f32 %v6333_v37, %v2359_v20 }
 0x1e6   : > { %v2360_v35 = vmul.f32 %v6327_v60, %v2356_v12 }
 0x1e7   : > { %4698 = vmatmul.mubr.msk.f32.vlgmr.msra.gmra.mrb[32].mxu1 %vm406_vm7, %v2362_v58 }
 0x1e8   : > { %4700 = vmatprep.mubr.msk.f32.mxu1 %vm406_vm7, %v2363_v13  ;;  %4964 = vmatpush3.bf16.msk.msra.mxu1 %vm6272_vm13, %v5351_v10  ;;  %v5178_v21 = vpop.eup %5177  ;;  %v2364_v24 = vadd.f32 %v6333_v37, %v2360_v35 }
 0x1e9   : > { %4982 = vmatprep.subr.msk.bf16.mxu1 %vm6259_vm10, %v5351_v10  ;;  %v2825_v7 = vmul.f32 %v5178_v21, %v6304_v8 }
 0x1eb   : > { %4701 = vmatmul.mubr.msk.f32.gmra.mrb[34].mxu1 %vm406_vm7, %v2364_v24  ;;  %v2829_v38 = vmul.f32 %v6327_v60, %v2825_v7 }
 0x1ec   : > { %4707 = vmatprep.mubr.msk.f32.mxu1 %vm406_vm7, %v2361_v5  ;;  %v5180_v26 = vpop.eup %5179 }
 0x1ed   : > { %v2826_v14 = vmul.f32 %v5180_v26, %v6309_v52  ;;  %v2833_v8 = vadd.f32 %v6333_v37, %v2829_v38 }
 0x1ef   : > { %4708 = vmatmul.mubr.msk.f32.vlgmr.msra.gmra.mrb[36].mxu1 %vm406_vm7, %v2362_v58  ;;  %v2830_v11 = vmul.f32 %v6327_v60, %v2826_v14 }
 0x1f0   : > { %4710 = vmatprep.mubr.msk.f32.mxu1 %vm406_vm7, %v2363_v13  ;;  %4984 = vmatpush3.bf16.msk.msra.mxu1 %vm6259_vm10, %v5351_v10 }
 0x1f1   : > { %4986 = vmatprep.subr.msk.bf16.mxu1 %vm6272_vm13, %v5351_v10  ;;  %v2834_v52 = vadd.f32 %v6333_v37, %v2830_v11 }
 0x1f3   : > { %4711 = vmatmul.mubr.msk.f32.gmra.mrb[38].mxu1 %vm406_vm7, %v2364_v24 }
 0x1f4   : > { %4739 = vmatprep.mubr.msk.f32.mxu1 %vm406_vm7, %v2833_v8 }
 0x1f7   : > { %4740 = vmatmul.mubr.msk.f32.vlgmr.msra.gmra.mrb[40].mxu1 %vm406_vm7, %v2834_v52 }
 0x1f8   : > { %4988 = vmatpush3.bf16.msk.msra.mxu1 %vm6272_vm13, %v5351_v10 }
 0x1f9   : > { %5006 = vmatprep.subr.msk.bf16.mxu1 %vm6259_vm10, %v5351_v10 }
 0x226   : > { %v2809_v30 = vpop.xlane.xlu0 %2808 }
 0x227   : > { %v2815_v55 = vmul.f32 0.0625, %v2809_v30 }
 0x229   : > { %v2819_v29 = vadd.f32 1e-05, %v2815_v55 }
 0x22a   : > { %v3275_v56 = vpop.xlane.xlu0 %3274 }
 0x22b   : > { %5181 = vrsqrt.f32 %v2819_v29  ;;  %v3285_v44 = vmul.f32 0.0625, %v3275_v56 }
 0x22d   : > { %v3289_v51 = vadd.f32 1e-05, %v3285_v44 }
 0x22e   : > { %v2812_v42 = vpop.xlane.xlu1 %2811 }
 0x22f   : > { %v2816_v9 = vmul.f32 0.0625, %v2812_v42 }
 0x231   : > { %v2820_v50 = vadd.f32 1e-05, %v2816_v9 }
 0x232   : > { %v3278_v39 = vpop.xlane.xlu1 %3277 }
 0x233   : > { %5183 = vrsqrt.f32 %v2820_v50  ;;  %v3286_v63 = vmul.f32 0.0625, %v3278_v39 }
 0x234   : > { %5185 = vrsqrt.f32 %v3289_v51 }
 0x235   : > { %v5182_v53 = vpop.eup %5181  ;;  %v3290_v46 = vadd.f32 1e-05, %v3286_v63 }
 0x236   : > { %v2827_v17 = vmul.f32 %v5182_v53, %v6316_v32 }
 0x237   : > { %5187 = vrsqrt.f32 %v3290_v46 }
 0x238   : > { %v2831_v49 = vmul.f32 %v6327_v60, %v2827_v17 }
 0x23a   : > { %v2835_v31 = vadd.f32 %v6333_v37, %v2831_v49  ;;  %v3281_v22 = vpop.xlane.xlu0 %3280 }
 0x23b   : > { %v3287_v54 = vmul.f32 0.0625, %v3281_v22 }
 0x23c   : > { %4742 = vmatprep.mubr.msk.f32.mxu1 %vm406_vm7, %v2835_v31 }
 0x23d   : > { %v5184_v1 = vpop.eup %5183  ;;  %v3291_v28 = vadd.f32 1e-05, %v3287_v54 }
 0x23e   : > { %v2828_v61 = vmul.f32 %v5184_v1, %v6339_v2  ;;  %v3284_v62 = vpop.xlane.xlu1 %3283  ;;  %v5186_v36 = vpop.eup %5185 }
 0x23f   : > { %5189 = vrsqrt.f32 %v3291_v28  ;;  %v3288_v4 = vmul.f32 0.0625, %v3284_v62  ;;  %v3747_v0 = vpop.xlane.xlu0 %3746  ;;  %v3297_v5 = vmul.f32 %v5186_v36, %v6321_v45  ;;  %v6636_v62 = vld [vmem:[#allocation5 + $0x8] sm:$0xff] }
 0x240   : > { %v2832_v32 = vmul.f32 %v6327_v60, %v2828_v61  ;;  %v3757_v41 = vmul.f32 0.0625, %v3747_v0 }
 0x241   : > { %v3292_v6 = vadd.f32 1e-05, %v3288_v4  ;;  %v5188_v19 = vpop.eup %5187  ;;  %v3301_v23 = vmul.f32 %v6327_v60, %v3297_v5  ;;  %v6638_v4 = vld [vmem:[#allocation5 + $0x10] sm:$0xff] }
 0x242   : > { %v2836_v43 = vadd.f32 %v6333_v37, %v2832_v32  ;;  %v3761_v25 = vadd.f32 1e-05, %v3757_v41  ;;  %v3750_v47 = vpop.xlane.xlu1 %3749  ;;  %v3298_v2 = vmul.f32 %v5188_v19, %v6348_v3  ;;  %v6644_v32 = vld [vmem:[#allocation5 + $0x18] sm:$0xff] }
 0x243   : > { %5191 = vrsqrt.f32 %v3292_v6  ;;  %v3758_v33 = vmul.f32 0.0625, %v3750_v47  ;;  %v3305_v3 = vadd.f32 %v6333_v37, %v3301_v23 }
 0x244   : > { %4743 = vmatmul.mubr.msk.f32.gmra.mrb[42].mxu1 %vm406_vm7, %v2836_v43  ;;  %5193 = vrsqrt.f32 %v3761_v25  ;;  %v3302_v58 = vmul.f32 %v6327_v60, %v3298_v2 }
 0x245   : > { %4749 = vmatprep.mubr.msk.f32.mxu1 %vm406_vm7, %v2833_v8  ;;  %v3762_v20 = vadd.f32 1e-05, %v3758_v33 }
 0x246   : > { %v3306_v7 = vadd.f32 %v6333_v37, %v3302_v58 }
 0x247   : > { %5195 = vrsqrt.f32 %v3762_v20 }
 0x248   : > { %4750 = vmatmul.mubr.msk.f32.vlgmr.msra.gmra.mrb[44].mxu1 %vm406_vm7, %v2834_v52 }
 0x249   : > { %5008 = vmatpush3.bf16.msk.msra.mxu1 %vm6259_vm10, %v5351_v10  ;;  %4752 = vmatprep.mubr.msk.f32.mxu1 %vm406_vm7, %v2835_v31  ;;  %v5190_v45 = vpop.eup %5189 }
 0x24a   : > { %5010 = vmatprep.subr.msk.bf16.mxu1 %vm6272_vm13, %v5351_v10  ;;  %v3299_v13 = vmul.f32 %v5190_v45, %v6367_v15 }
 0x24b   : > { %v3753_v12 = vpop.xlane.xlu0 %3752 }
 0x24c   : > { %4753 = vmatmul.mubr.msk.f32.gmra.mrb[46].mxu1 %vm406_vm7, %v2836_v43  ;;  %v3759_v35 = vmul.f32 0.0625, %v3753_v12  ;;  %v3303_v21 = vmul.f32 %v6327_v60, %v3299_v13 }
 0x24d   : > { %4781 = vmatprep.mubr.msk.f32.mxu1 %vm406_vm7, %v3305_v3  ;;  %v5192_v24 = vpop.eup %5191 }
 0x24e   : > { %v3763_v26 = vadd.f32 1e-05, %v3759_v35  ;;  %v3307_v14 = vadd.f32 %v6333_v37, %v3303_v21  ;;  %v3300_v38 = vmul.f32 %v5192_v24, %v6380_v27  ;;  %v3756_v11 = vpop.xlane.xlu1 %3755  ;;  %v5194_v15 = vpop.eup %5193 }
 0x24f   : > { %v3760_v8 = vmul.f32 0.0625, %v3756_v11  ;;  %v3769_v29 = vmul.f32 %v5194_v15, %v6383_v59 }
 0x250   : > { %4782 = vmatmul.mubr.msk.f32.vlgmr.msra.gmra.mrb[48].mxu1 %vm406_vm7, %v3306_v7  ;;  %5197 = vrsqrt.f32 %v3763_v26  ;;  %v3304_v52 = vmul.f32 %v6327_v60, %v3300_v38 }
 0x251   : > { %5012 = vmatpush3.bf16.msk.msra.mxu1 %vm6272_vm13, %v5351_v10  ;;  %4784 = vmatprep.mubr.msk.f32.mxu1 %vm406_vm7, %v3307_v14  ;;  %v3764_v30 = vadd.f32 1e-05, %v3760_v8  ;;  %v5196_v55 = vpop.eup %5195  ;;  %v3773_v42 = vmul.f32 %v6327_v60, %v3769_v29 }
 0x252   : > { %5030 = vmatprep.subr.msk.bf16.mxu1 %vm6259_vm10, %v5351_v10  ;;  %v3308_v27 = vadd.f32 %v6333_v37, %v3304_v52  ;;  %v3770_v56 = vmul.f32 %v5196_v55, %v6398_v48 }
 0x253   : > { %5199 = vrsqrt.f32 %v3764_v30  ;;  %v3777_v9 = vadd.f32 %v6333_v37, %v3773_v42 }
 0x254   : > { %4785 = vmatmul.mubr.msk.f32.gmra.mrb[50].mxu1 %vm406_vm7, %v3308_v27  ;;  %v3774_v59 = vmul.f32 %v6327_v60, %v3770_v56 }
 0x255   : > { %4791 = vmatprep.mubr.msk.f32.mxu1 %vm406_vm7, %v3305_v3 }
 0x256   : > { %v3778_v51 = vadd.f32 %v6333_v37, %v3774_v59 }
 0x258   : > { %4792 = vmatmul.mubr.msk.f32.vlgmr.msra.gmra.mrb[52].mxu1 %vm406_vm7, %v3306_v7 }
 0x259   : > { %5032 = vmatpush3.bf16.msk.msra.mxu1 %vm6259_vm10, %v5351_v10  ;;  %4794 = vmatprep.mubr.msk.f32.mxu1 %vm406_vm7, %v3307_v14 }
 0x25a   : > { %v5198_v44 = vpop.eup %5197  ;;  %5034 = vmatprep.subr.msk.bf16.mxu1 %vm6272_vm13, %v5351_v10 }
 0x25b   : > { %v3771_v48 = vmul.f32 %v5198_v44, %v6426_v57 }
 0x25c   : > { %4795 = vmatmul.mubr.msk.f32.gmra.mrb[54].mxu1 %vm406_vm7, %v3308_v27 }
 0x25d   : > { %4823 = vmatprep.mubr.msk.f32.mxu1 %vm406_vm7, %v3777_v9  ;;  %v3775_v18 = vmul.f32 %v6327_v60, %v3771_v48  ;;  %v5200_v50 = vpop.eup %5199 }
 0x25e   : > { %v3772_v63 = vmul.f32 %v5200_v50, %v6434_v34 }
 0x25f   : > { %v3779_v39 = vadd.f32 %v6333_v37, %v3775_v18 }
 0x260   : > { %4824 = vmatmul.mubr.msk.f32.vlgmr.msra.gmra.mrb[56].mxu1 %vm406_vm7, %v3778_v51  ;;  %v3776_v57 = vmul.f32 %v6327_v60, %v3772_v63 }
 0x261   : > { %5036 = vmatpush3.bf16.msk.msra.mxu1 %vm6272_vm13, %v5351_v10  ;;  %4826 = vmatprep.mubr.msk.f32.mxu1 %vm406_vm7, %v3779_v39 }
 0x262   : > { %v3780_v53 = vadd.f32 %v6333_v37, %v3776_v57 }
 0x264   : > { %4827 = vmatmul.mubr.msk.f32.gmra.mrb[58].mxu1 %vm406_vm7, %v3780_v53 }
 0x265   : > { %4833 = vmatprep.mubr.msk.f32.mxu1 %vm406_vm7, %v3777_v9 }
 0x268   : > { %4834 = vmatmul.mubr.msk.f32.vlgmr.msra.gmra.mrb[60].mxu1 %vm406_vm7, %v3778_v51 }
 0x269   : > { %4836 = vmatprep.mubr.msk.f32.mxu1 %vm406_vm7, %v3779_v39 }
 0x26c   : > { %4837 = vmatmul.mubr.msk.f32.gmra.mrb[62].mxu1 %vm406_vm7, %v3780_v53 }
 0x279   : > { %v4531_v34 = vpop.f32.mrb[0].mxu1 }
 0x27a   : > { %v558_v46 = vpop.f32.mrb[1].mxu1 }
 0x27b   : > { %v4869_v16 = vpack.c.bf16 %v4531_v34, %v558_v46 }
 0x27d   : > { %4870 = vmatprep.subr.bf16.mxu0 %v4869_v16 }
 0x27e   : > { %v4534_v10 = vpop.f32.mrb[2].mxu1  ;;  %4872 = vmatpush3.bf16.msra.mxu0 %v4869_v16 }
 0x27f   : > { %v568_v17 = vpop.f32.mrb[3].mxu1 }
 0x280   : > { %v4873_v60 = vpack.c.bf16 %v4534_v10, %v568_v17 }
 0x282   : > { %v4541_v49 = vpop.f32.mrb[4].mxu1  ;;  %4874 = vmatprep.subr.bf16.mxu0 %v4873_v60 }
 0x283   : > { %v643_v37 = vpop.f32.mrb[5].mxu1  ;;  %4876 = vmatpush3.bf16.msra.mxu0 %v4873_v60 }
 0x284   : > { %v4877_v31 = vpack.c.bf16 %v4541_v49, %v643_v37 }
 0x286   : > { %v4544_v22 = vpop.f32.mrb[6].mxu1  ;;  %4878 = vmatprep.subr.bf16.mxu0 %v4877_v31 }
 0x287   : > { %v653_v54 = vpop.f32.mrb[7].mxu1  ;;  %4880 = vmatpush3.bf16.msra.mxu0 %v4877_v31 }
 0x288   : > { %v4881_v1 = vpack.c.bf16 %v4544_v22, %v653_v54 }
 0x28a   : > { %4882 = vmatprep.subr.bf16.mxu0 %v4881_v1  ;;  %v4573_v28 = vpop.f32.mrb[8].mxu1 }
 0x28b   : > { %4884 = vmatpush3.bf16.msra.mxu0 %v4881_v1  ;;  %v1027_v61 = vpop.f32.mrb[9].mxu1 }
 0x28c   : > { %v4893_v36 = vpack.c.bf16 %v4573_v28, %v1027_v61 }
 0x28e   : > { %4894 = vmatprep.subr.bf16.mxu0 %v4893_v36  ;;  %4562 = vmatmul.mubr.msk.f32.vlgmr.msra.gmra.mrb[0].mxu0 %vm662_vm14, %v6636_v62  ;;  %v4576_v0 = vpop.f32.mrb[10].mxu1 }
 0x28f   : > { %4896 = vmatpush3.bf16.msra.mxu0 %v4893_v36  ;;  %4564 = vmatprep.mubr.msk.f32.mxu0 %vm662_vm14, %v6638_v4  ;;  %v1037_v41 = vpop.f32.mrb[11].mxu1 }
 0x290   : > { %v4897_v6 = vpack.c.bf16 %v4576_v0, %v1037_v41 }
 0x292   : > { %4565 = vmatmul.mubr.msk.f32.gmra.mrb[2].mxu0 %vm662_vm14, %v6644_v32  ;;  %v4583_v43 = vpop.f32.mrb[12].mxu1  ;;  %4898 = vmatprep.subr.bf16.mxu0 %v4897_v6 }
 0x293   : > { %4603 = vmatprep.mubr.msk.f32.mxu0 %vm662_vm14, %v6559_v40  ;;  %v1112_v19 = vpop.f32.mrb[13].mxu1  ;;  %4900 = vmatpush3.bf16.msra.mxu0 %v4897_v6 }
 0x294   : > { %v4901_v25 = vpack.c.bf16 %v4583_v43, %v1112_v19 }
 0x296   : > { %v4586_v47 = vpop.f32.mrb[14].mxu1  ;;  %4902 = vmatprep.subr.bf16.mxu0 %v4901_v25 }
 0x297   : > { %v1122_v5 = vpop.f32.mrb[15].mxu1  ;;  %4904 = vmatpush3.bf16.msra.mxu0 %v4901_v25 }
 0x298   : > { %v4905_v33 = vpack.c.bf16 %v4586_v47, %v1122_v5 }
 0x29a   : > { %4906 = vmatprep.subr.bf16.mxu0 %v4905_v33  ;;  %v4615_v2 = vpop.f32.mrb[16].mxu1 }
 0x29b   : > { %4908 = vmatpush3.bf16.msra.mxu0 %v4905_v33  ;;  %v1499_v20 = vpop.f32.mrb[17].mxu1 }
 0x29c   : > { %v4917_v23 = vpack.c.bf16 %v4615_v2, %v1499_v20 }
 0x29e   : > { %4918 = vmatprep.subr.bf16.mxu0 %v4917_v23  ;;  %4604 = vmatmul.mubr.msk.f32.vlgmr.msra.gmra.mrb[4].mxu0 %vm662_vm14, %v6636_v62  ;;  %v4618_v45 = vpop.f32.mrb[18].mxu1 }
 0x29f   : > { %4920 = vmatpush3.bf16.msra.mxu0 %v4917_v23  ;;  %4606 = vmatprep.mubr.msk.f32.mxu0 %vm662_vm14, %v6638_v4  ;;  %v1509_v58 = vpop.f32.mrb[19].mxu1 }
 0x2a0   : > { %v4921_v3 = vpack.c.bf16 %v4618_v45, %v1509_v58 }
 0x2a2   : > { %4607 = vmatmul.mubr.msk.f32.gmra.mrb[6].mxu0 %vm662_vm14, %v6644_v32  ;;  %v4625_v13 = vpop.f32.mrb[20].mxu1  ;;  %4922 = vmatprep.subr.bf16.mxu0 %v4921_v3 }
 0x2a3   : > { %4645 = vmatprep.mubr.msk.f32.mxu0 %vm662_vm14, %v6559_v40  ;;  %v1584_v12 = vpop.f32.mrb[21].mxu1  ;;  %4924 = vmatpush3.bf16.msra.mxu0 %v4921_v3 }
 0x2a4   : > { %v4925_v35 = vpack.c.bf16 %v4625_v13, %v1584_v12 }
 0x2a6   : > { %v4628_v21 = vpop.f32.mrb[22].mxu1  ;;  %4926 = vmatprep.subr.bf16.mxu0 %v4925_v35 }
 0x2a7   : > { %v1594_v24 = vpop.f32.mrb[23].mxu1  ;;  %4928 = vmatpush3.bf16.msra.mxu0 %v4925_v35 }
 0x2a8   : > { %v4929_v7 = vpack.c.bf16 %v4628_v21, %v1594_v24 }
 0x2aa   : > { %4930 = vmatprep.subr.bf16.mxu0 %v4929_v7  ;;  %v4657_v26 = vpop.f32.mrb[24].mxu1 }
 0x2ab   : > { %4932 = vmatpush3.bf16.msra.mxu0 %v4929_v7  ;;  %v1971_v14 = vpop.f32.mrb[25].mxu1 }
 0x2ac   : > { %v4941_v38 = vpack.c.bf16 %v4657_v26, %v1971_v14 }
 0x2ae   : > { %4942 = vmatprep.subr.bf16.mxu0 %v4941_v38  ;;  %4646 = vmatmul.mubr.msk.f32.vlgmr.msra.gmra.mrb[8].mxu0 %vm662_vm14, %v6636_v62  ;;  %v4660_v11 = vpop.f32.mrb[26].mxu1 }
 0x2af   : > { %4944 = vmatpush3.bf16.msra.mxu0 %v4941_v38  ;;  %4648 = vmatprep.mubr.msk.f32.mxu0 %vm662_vm14, %v6638_v4  ;;  %v1981_v15 = vpop.f32.mrb[27].mxu1 }
 0x2b0   : > { %v4945_v8 = vpack.c.bf16 %v4660_v11, %v1981_v15 }
 0x2b2   : > { %4649 = vmatmul.mubr.msk.f32.gmra.mrb[10].mxu0 %vm662_vm14, %v6644_v32  ;;  %v4667_v52 = vpop.f32.mrb[28].mxu1  ;;  %4946 = vmatprep.subr.bf16.mxu0 %v4945_v8 }
 0x2b3   : > { %4687 = vmatprep.mubr.msk.f32.mxu0 %vm662_vm14, %v6559_v40  ;;  %v2056_v30 = vpop.f32.mrb[29].mxu1  ;;  %4948 = vmatpush3.bf16.msra.mxu0 %v4945_v8 }
 0x2b4   : > { %v4949_v27 = vpack.c.bf16 %v4667_v52, %v2056_v30 }
 0x2b6   : > { %v4670_v55 = vpop.f32.mrb[30].mxu1  ;;  %4950 = vmatprep.subr.bf16.mxu0 %v4949_v27 }
 0x2b7   : > { %v2066_v29 = vpop.f32.mrb[31].mxu1  ;;  %4952 = vmatpush3.bf16.msra.mxu0 %v4949_v27 }
 0x2b8   : > { %v4953_v56 = vpack.c.bf16 %v4670_v55, %v2066_v29 }
 0x2ba   : > { %4954 = vmatprep.subr.bf16.mxu0 %v4953_v56  ;;  %v4699_v42 = vpop.f32.mrb[32].mxu1 }
 0x2bb   : > { %4956 = vmatpush3.bf16.msra.mxu0 %v4953_v56  ;;  %v2443_v44 = vpop.f32.mrb[33].mxu1 }
 0x2bc   : > { %v4965_v59 = vpack.c.bf16 %v4699_v42, %v2443_v44 }
 0x2be   : > { %4966 = vmatprep.subr.bf16.mxu0 %v4965_v59  ;;  %4688 = vmatmul.mubr.msk.f32.vlgmr.msra.gmra.mrb[12].mxu0 %vm662_vm14, %v6636_v62  ;;  %v4702_v9 = vpop.f32.mrb[34].mxu1 }
 0x2bf   : > { %4968 = vmatpush3.bf16.msra.mxu0 %v4965_v59  ;;  %4690 = vmatprep.mubr.msk.f32.mxu0 %vm662_vm14, %v6638_v4  ;;  %v2453_v48 = vpop.f32.mrb[35].mxu1 }
 0x2c0   : > { %v4969_v18 = vpack.c.bf16 %v4702_v9, %v2453_v48 }
 0x2c2   : > { %4691 = vmatmul.mubr.msk.f32.gmra.mrb[14].mxu0 %vm662_vm14, %v6644_v32  ;;  %v4709_v50 = vpop.f32.mrb[36].mxu1  ;;  %4970 = vmatprep.subr.bf16.mxu0 %v4969_v18 }
 0x2c3   : > { %4729 = vmatprep.mubr.msk.f32.mxu0 %vm662_vm14, %v6559_v40  ;;  %v2528_v51 = vpop.f32.mrb[37].mxu1  ;;  %4972 = vmatpush3.bf16.msra.mxu0 %v4969_v18 }
 0x2c4   : > { %v4973_v39 = vpack.c.bf16 %v4709_v50, %v2528_v51 }
 0x2c6   : > { %v4712_v63 = vpop.f32.mrb[38].mxu1  ;;  %4974 = vmatprep.subr.bf16.mxu0 %v4973_v39 }
 0x2c7   : > { %v2538_v57 = vpop.f32.mrb[39].mxu1  ;;  %4976 = vmatpush3.bf16.msra.mxu0 %v4973_v39 }
 0x2c8   : > { %v4977_v53 = vpack.c.bf16 %v4712_v63, %v2538_v57 }
 0x2ca   : > { %4978 = vmatprep.subr.bf16.mxu0 %v4977_v53  ;;  %v4741_v34 = vpop.f32.mrb[40].mxu1 }
 0x2cb   : > { %4980 = vmatpush3.bf16.msra.mxu0 %v4977_v53  ;;  %v2915_v46 = vpop.f32.mrb[41].mxu1 }
 0x2cc   : > { %v4989_v16 = vpack.c.bf16 %v4741_v34, %v2915_v46 }
 0x2ce   : > { %4990 = vmatprep.subr.bf16.mxu0 %v4989_v16  ;;  %4730 = vmatmul.mubr.msk.f32.vlgmr.msra.gmra.mrb[16].mxu0 %vm662_vm14, %v6636_v62 }
 0x2cf   : > { %4992 = vmatpush3.bf16.msra.mxu0 %v4989_v16  ;;  %4732 = vmatprep.mubr.msk.f32.mxu0 %vm662_vm14, %v6638_v4 }
 0x2d2   : > { %4733 = vmatmul.mubr.msk.f32.gmra.mrb[18].mxu0 %vm662_vm14, %v6644_v32 }
 0x2d3   : > { %4771 = vmatprep.mubr.msk.f32.mxu0 %vm662_vm14, %v6559_v40 }
 0x317   : > { %v4744_v10 = vpop.f32.mrb[42].mxu1 }
 0x318   : > { %v2925_v17 = vpop.f32.mrb[43].mxu1 }
 0x319   : > { %v4993_v60 = vpack.c.bf16 %v4744_v10, %v2925_v17 }
 0x31b   : > { %v4751_v49 = vpop.f32.mrb[44].mxu1  ;;  %4994 = vmatprep.subr.bf16.mxu0 %v4993_v60 }
 0x31c   : > { %v3000_v37 = vpop.f32.mrb[45].mxu1  ;;  %4996 = vmatpush3.bf16.msra.mxu0 %v4993_v60 }
 0x31d   : > { %v4997_v31 = vpack.c.bf16 %v4751_v49, %v3000_v37 }
 0x31f   : > { %v4754_v22 = vpop.f32.mrb[46].mxu1  ;;  %4998 = vmatprep.subr.bf16.mxu0 %v4997_v31 }
 0x320   : > { %v3010_v54 = vpop.f32.mrb[47].mxu1  ;;  %5000 = vmatpush3.bf16.msra.mxu0 %v4997_v31 }
 0x321   : > { %v5001_v1 = vpack.c.bf16 %v4754_v22, %v3010_v54 }
 0x323   : > { %5002 = vmatprep.subr.bf16.mxu0 %v5001_v1  ;;  %v4783_v28 = vpop.f32.mrb[48].mxu1 }
 0x324   : > { %5004 = vmatpush3.bf16.msra.mxu0 %v5001_v1  ;;  %v3387_v61 = vpop.f32.mrb[49].mxu1 }
 0x325   : > { %v5013_v36 = vpack.c.bf16 %v4783_v28, %v3387_v61 }
 0x327   : > { %4772 = vmatmul.mubr.msk.f32.vlgmr.msra.gmra.mrb[20].mxu0 %vm662_vm14, %v6636_v62  ;;  %5014 = vmatprep.subr.bf16.mxu0 %v5013_v36  ;;  %v4786_v0 = vpop.f32.mrb[50].mxu1 }
 0x328   : > { %5016 = vmatpush3.bf16.msra.mxu0 %v5013_v36  ;;  %4774 = vmatprep.mubr.msk.f32.mxu0 %vm662_vm14, %v6638_v4  ;;  %v3397_v41 = vpop.f32.mrb[51].mxu1 }
 0x329   : > { %v5017_v6 = vpack.c.bf16 %v4786_v0, %v3397_v41 }
 0x32b   : > { %4775 = vmatmul.mubr.msk.f32.gmra.mrb[22].mxu0 %vm662_vm14, %v6644_v32  ;;  %v4793_v43 = vpop.f32.mrb[52].mxu1  ;;  %5018 = vmatprep.subr.bf16.mxu0 %v5017_v6 }
 0x32c   : > { %4813 = vmatprep.mubr.msk.f32.mxu0 %vm662_vm14, %v6559_v40  ;;  %v3472_v19 = vpop.f32.mrb[53].mxu1  ;;  %5020 = vmatpush3.bf16.msra.mxu0 %v5017_v6 }
 0x32d   : > { %v5021_v25 = vpack.c.bf16 %v4793_v43, %v3472_v19 }
 0x32f   : > { %v4796_v47 = vpop.f32.mrb[54].mxu1  ;;  %5022 = vmatprep.subr.bf16.mxu0 %v5021_v25 }
 0x330   : > { %v3482_v5 = vpop.f32.mrb[55].mxu1  ;;  %5024 = vmatpush3.bf16.msra.mxu0 %v5021_v25 }
 0x331   : > { %v5025_v33 = vpack.c.bf16 %v4796_v47, %v3482_v5 }
 0x333   : > { %5026 = vmatprep.subr.bf16.mxu0 %v5025_v33  ;;  %v4825_v2 = vpop.f32.mrb[56].mxu1 }
 0x334   : > { %5028 = vmatpush3.bf16.msra.mxu0 %v5025_v33  ;;  %v3859_v20 = vpop.f32.mrb[57].mxu1 }
 0x335   : > { %v5037_v23 = vpack.c.bf16 %v4825_v2, %v3859_v20 }
 0x337   : > { %4814 = vmatmul.mubr.msk.f32.vlgmr.msra.gmra.mrb[24].mxu0 %vm662_vm14, %v6636_v62  ;;  %5038 = vmatprep.subr.bf16.mxu0 %v5037_v23  ;;  %v4828_v45 = vpop.f32.mrb[58].mxu1 }
 0x338   : > { %5040 = vmatpush3.bf16.msra.mxu0 %v5037_v23  ;;  %4816 = vmatprep.mubr.msk.f32.mxu0 %vm662_vm14, %v6638_v4  ;;  %v3869_v58 = vpop.f32.mrb[59].mxu1 }
 0x339   : > { %v5041_v3 = vpack.c.bf16 %v4828_v45, %v3869_v58 }
 0x33b   : > { %4817 = vmatmul.mubr.msk.f32.gmra.mrb[26].mxu0 %vm662_vm14, %v6644_v32  ;;  %v4835_v13 = vpop.f32.mrb[60].mxu1  ;;  %5042 = vmatprep.subr.bf16.mxu0 %v5041_v3 }
 0x33c   : > { %4855 = vmatprep.mubr.msk.f32.mxu0 %vm662_vm14, %v6559_v40  ;;  %v3944_v12 = vpop.f32.mrb[61].mxu1  ;;  %5044 = vmatpush3.bf16.msra.mxu0 %v5041_v3 }
 0x33d   : > { %v5045_v35 = vpack.c.bf16 %v4835_v13, %v3944_v12 }
 0x33f   : > { %v4838_v21 = vpop.f32.mrb[62].mxu1  ;;  %5046 = vmatprep.subr.bf16.mxu0 %v5045_v35 }
 0x340   : > { %v3954_v24 = vpop.f32.mrb[63].mxu1  ;;  %5048 = vmatpush3.bf16.msra.mxu0 %v5045_v35 }
 0x341   : > { %v5049_v7 = vpack.c.bf16 %v4838_v21, %v3954_v24 }
 0x343   : > { %5050 = vmatprep.subr.bf16.mxu0 %v5049_v7 }
 0x344   : > { %5052 = vmatpush3.bf16.msra.mxu0 %v5049_v7 }
 0x347   : > { %4856 = vmatmul.mubr.msk.f32.vlgmr.msra.gmra.mrb[28].mxu0 %vm662_vm14, %v6636_v62 }
 0x348   : > { %4858 = vmatprep.mubr.msk.f32.mxu0 %vm662_vm14, %v6638_v4 }
 0x34b   : > { %4859 = vmatmul.mubr.msk.f32.gmra.mrb[30].mxu0 %vm662_vm14, %v6644_v32 }
 0x361   : > { %v4563_v40 = vpop.f32.mrb[0].mxu0 }
 0x362   : > { %762 = vst.msk [vmem:[%s6705_s22 + $0x8] sm:$0xff] %vm760_vm15, %v4563_v40  ;;  %v741_v26 = vpop.f32.mrb[1].mxu0 }
 0x363   : > { %761 = vst.msk [vmem:[%s6705_s22] sm:$0xff] %vm760_vm15, %v741_v26 }
 0x365   : > { %v4566_v14 = vpop.f32.mrb[2].mxu0 }
 0x366   : > { %764 = vst.msk [vmem:[%s6705_s22 + $0x18] sm:$0xff] %vm760_vm15, %v4566_v14  ;;  %v751_v62 = vpop.f32.mrb[3].mxu0 }
 0x367   : > { %763 = vst.msk [vmem:[%s6705_s22 + $0x10] sm:$0xff] %vm760_vm15, %v751_v62 }
 0x371   : > { %v4605_v4 = vpop.f32.mrb[4].mxu0 }
 0x372   : > { %v1197_v38 = vpop.f32.mrb[5].mxu0  ;;  %1222 = vrot.lane.b32.xlu1 %v4605_v4, %s5352_s28 }
 0x373   : > { %1220 = vrot.lane.b32.xlu0 %v1197_v38, %s5352_s28 }
 0x375   : > { %v4608_v32 = vpop.f32.mrb[6].mxu0 }
 0x376   : > { %1226 = vrot.lane.b32.xlu1 %v4608_v32, %s5352_s28  ;;  %v1207_v11 = vpop.f32.mrb[7].mxu0 }
 0x37a   : > { %1224 = vrot.lane.b32.xlu1 %v1207_v11, %s5352_s28 }
 0x381   : > { %v4647_v15 = vpop.f32.mrb[8].mxu0 }
 0x382   : > { %v1669_v8 = vpop.f32.mrb[9].mxu0  ;;  %1694 = vrot.lane.b32.xlu1 %v4647_v15, %s5353_s8 }
 0x383   : > { %1692 = vrot.lane.b32.xlu0 %v1669_v8, %s5353_s8 }
 0x385   : > { %v4650_v52 = vpop.f32.mrb[10].mxu0 }
 0x386   : > { %v1679_v30 = vpop.f32.mrb[11].mxu0  ;;  %1698 = vrot.lane.b32.xlu1 %v4650_v52, %s5353_s8 }
 0x387   : > { %1696 = vrot.lane.b32.xlu0 %v1679_v30, %s5353_s8  ;;  %s5263_s8 = sshll.u32 %s5359_s21, 4  ;;  %s5264_s8 = int_to_ptr.vmem [resolvable:$false] %s5263_s8 }
 0x388   : > { %p5266_p12 = scmp.lt.s32.totalorder %s6748_s29, %s5264_s8 }
 0x391   : > { %v4689_v27 = vpop.f32.mrb[12].mxu0 }
 0x392   : > { %v2141_v55 = vpop.f32.mrb[13].mxu0  ;;  %2166 = vrot.lane.b32.xlu1 %v4689_v27, %s5354_s6 }
 0x393   : > { %2164 = vrot.lane.b32.xlu0 %v2141_v55, %s5354_s6 }
 0x395   : > { %v4692_v29 = vpop.f32.mrb[14].mxu0 }
 0x396   : > { %v2151_v56 = vpop.f32.mrb[15].mxu0  ;;  %2170 = vrot.lane.b32.xlu1 %v4692_v29, %s5354_s6 }
 0x397   : > { %2168 = vrot.lane.b32.xlu0 %v2151_v56, %s5354_s6  ;;  %s5265_s6 = scalar_lea.vmem %s5264_s8, 1024 }
 0x398   : > { %p5267_p11 = scmp.lt.s32.totalorder %s5265_s6, %s5259_s18 }
 0x39a   : > { %p5268_p0 = por %p5267_p11, %p5266_p12 }
 0x39c   : > { %p5269_p5 = pnand %p5268_p0, %p5262_p8 }
 0x3a1   : > { %v4731_v42 = vpop.f32.mrb[16].mxu0 }
 0x3a2   : > { %v2613_v44 = vpop.f32.mrb[17].mxu0  ;;  %2638 = vrot.lane.b32.xlu1 %v4731_v42, %s5355_s9 }
 0x3a3   : > { %2636 = vrot.lane.b32.xlu0 %v2613_v44, %s5355_s9 }
 0x3a5   : > { %v4734_v59 = vpop.f32.mrb[18].mxu0 }
 0x3a6   : > { %v2623_v9 = vpop.f32.mrb[19].mxu0  ;;  %2642 = vrot.lane.b32.xlu1 %v4734_v59, %s5355_s9 }
 0x3a7   : > { %2640 = vrot.lane.b32.xlu0 %v2623_v9, %s5355_s9 }
 0x3e4   : > { %v1223_v48 = vpop.permute.xlu1 %1222 }
 0x3e5   : > { %1234 = vst.msk [vmem:[%s6705_s22 + $0x8] sm:$0xff] %vm1232_vm0, %v1223_v48  ;;  %v1221_v18 = vpop.permute.xlu0 %1220 }
 0x3e6   : > { %1233 = vst.msk [vmem:[%s6705_s22] sm:$0xff] %vm1232_vm0, %v1221_v18 }
 0x3e8   : > { %v1227_v50 = vpop.permute.xlu1 %1226 }
 0x3e9   : > { %1236 = vst.msk [vmem:[%s6705_s22 + $0x18] sm:$0xff] %vm1232_vm0, %v1227_v50 }
 0x3ec   : > { %v1225_v51 = vpop.permute.xlu1 %1224 }
 0x3ed   : > { %1235 = vst.msk [vmem:[%s6705_s22 + $0x10] sm:$0xff] %vm1232_vm0, %v1225_v51 }
 0x3f4   : > { %v1695_v39 = vpop.permute.xlu1 %1694 }
 0x3f5   : > { %1706 = vst.msk [vmem:[%s6705_s22 + $0x8] sm:$0xff] %vm1704_vm1, %v1695_v39  ;;  %v1693_v63 = vpop.permute.xlu0 %1692 }
 0x3f6   : > { %1705 = vst.msk [vmem:[%s6705_s22] sm:$0xff] %vm1704_vm1, %v1693_v63 }
 0x3f8   : > { %v1699_v53 = vpop.permute.xlu1 %1698 }
 0x3f9   : > { %1708 = vst.msk [vmem:[%s6705_s22 + $0x18] sm:$0xff] %vm1704_vm1, %v1699_v53  ;;  %v1697_v46 = vpop.permute.xlu0 %1696 }
 0x3fa   : > { %v4773_v57 = vpop.f32.mrb[20].mxu0  ;;  %1707 = vst.msk [vmem:[%s6705_s22 + $0x10] sm:$0xff] %vm1704_vm1, %v1697_v46 }
 0x3fb   : > { %v3085_v34 = vpop.f32.mrb[21].mxu0  ;;  %3110 = vrot.lane.b32.xlu1 %v4773_v57, %s5356_s11 }
 0x3fc   : > { %3108 = vrot.lane.b32.xlu0 %v3085_v34, %s5356_s11 }
 0x3fe   : > { %v4776_v16 = vpop.f32.mrb[22].mxu0 }
 0x3ff   : > { %v3095_v10 = vpop.f32.mrb[23].mxu0  ;;  %3114 = vrot.lane.b32.xlu1 %v4776_v16, %s5356_s11 }
 0x400   : > { %3112 = vrot.lane.b32.xlu0 %v3095_v10, %s5356_s11 }
 0x404   : > { %v2167_v17 = vpop.permute.xlu1 %2166 }
 0x405   : > { %2178 = vst.msk [vmem:[%s6705_s22 + $0x8] sm:$0xff] %vm2176_vm2, %v2167_v17  ;;  %v2165_v60 = vpop.permute.xlu0 %2164 }
 0x406   : > { %2177 = vst.msk [vmem:[%s6705_s22] sm:$0xff] %vm2176_vm2, %v2165_v60 }
 0x408   : > { %v2171_v37 = vpop.permute.xlu1 %2170 }
 0x409   : > { %2180 = vst.msk [vmem:[%s6705_s22 + $0x18] sm:$0xff] %vm2176_vm2, %v2171_v37  ;;  %v2169_v22 = vpop.permute.xlu0 %2168 }
 0x40a   : > { %v4815_v49 = vpop.f32.mrb[24].mxu0  ;;  %2179 = vst.msk [vmem:[%s6705_s22 + $0x10] sm:$0xff] %vm2176_vm2, %v2169_v22 }
 0x40b   : > { %v3557_v31 = vpop.f32.mrb[25].mxu0  ;;  %3582 = vrot.lane.b32.xlu1 %v4815_v49, %s5357_s13 }
 0x40c   : > { %3580 = vrot.lane.b32.xlu0 %v3557_v31, %s5357_s13 }
 0x40e   : > { %v4818_v54 = vpop.f32.mrb[26].mxu0 }
 0x40f   : > { %v3567_v1 = vpop.f32.mrb[27].mxu0  ;;  %3586 = vrot.lane.b32.xlu1 %v4818_v54, %s5357_s13 }
 0x410   : > { %3584 = vrot.lane.b32.xlu0 %v3567_v1, %s5357_s13 }
 0x414   : > { %v2639_v28 = vpop.permute.xlu1 %2638 }
 0x415   : > { %2650 = vst.msk [vmem:[%s6705_s22 + $0x8] sm:$0xff] %vm2648_vm3, %v2639_v28  ;;  %v2637_v61 = vpop.permute.xlu0 %2636 }
 0x416   : > { %2649 = vst.msk [vmem:[%s6705_s22] sm:$0xff] %vm2648_vm3, %v2637_v61 }
 0x418   : > { %v2643_v0 = vpop.permute.xlu1 %2642 }
 0x419   : > { %2652 = vst.msk [vmem:[%s6705_s22 + $0x18] sm:$0xff] %vm2648_vm3, %v2643_v0  ;;  %v2641_v6 = vpop.permute.xlu0 %2640 }
 0x41a   : > { %v4857_v36 = vpop.f32.mrb[28].mxu0  ;;  %2651 = vst.msk [vmem:[%s6705_s22 + $0x10] sm:$0xff] %vm2648_vm3, %v2641_v6 }
 0x41b   : > { %4054 = vrot.lane.b32.xlu1 %v4857_v36, %s5358_s7  ;;  %v4029_v41 = vpop.f32.mrb[29].mxu0 }
 0x41c   : > { %4052 = vrot.lane.b32.xlu0 %v4029_v41, %s5358_s7 }
 0x41e   : > { %v4860_v43 = vpop.f32.mrb[30].mxu0 }
 0x41f   : > { %4058 = vrot.lane.b32.xlu1 %v4860_v43, %s5358_s7  ;;  %v4039_v19 = vpop.f32.mrb[31].mxu0 }
 0x420   : > { %4056 = vrot.lane.b32.xlu0 %v4039_v19, %s5358_s7 }
 0x46d   : > { %v3111_v25 = vpop.permute.xlu1 %3110 }
 0x46e   : > { %3122 = vst.msk [vmem:[%s6705_s22 + $0x8] sm:$0xff] %vm3120_vm4, %v3111_v25  ;;  %v3109_v47 = vpop.permute.xlu0 %3108 }
 0x46f   : > { %3121 = vst.msk [vmem:[%s6705_s22] sm:$0xff] %vm3120_vm4, %v3109_v47 }
 0x471   : > { %v3115_v5 = vpop.permute.xlu1 %3114 }
 0x472   : > { %3124 = vst.msk [vmem:[%s6705_s22 + $0x18] sm:$0xff] %vm3120_vm4, %v3115_v5  ;;  %v3113_v33 = vpop.permute.xlu0 %3112 }
 0x473   : > { %3123 = vst.msk [vmem:[%s6705_s22 + $0x10] sm:$0xff] %vm3120_vm4, %v3113_v33 }
 0x47d   : > { %v3583_v2 = vpop.permute.xlu1 %3582 }
 0x47e   : > { %3594 = vst.msk [vmem:[%s6705_s22 + $0x8] sm:$0xff] %vm3592_vm5, %v3583_v2  ;;  %v3581_v20 = vpop.permute.xlu0 %3580 }
 0x47f   : > { %3593 = vst.msk [vmem:[%s6705_s22] sm:$0xff] %vm3592_vm5, %v3581_v20 }
 0x481   : > { %v3587_v23 = vpop.permute.xlu1 %3586 }
 0x482   : > { %3596 = vst.msk [vmem:[%s6705_s22 + $0x18] sm:$0xff] %vm3592_vm5, %v3587_v23  ;;  %v3585_v45 = vpop.permute.xlu0 %3584 }
 0x483   : > { %3595 = vst.msk [vmem:[%s6705_s22 + $0x10] sm:$0xff] %vm3592_vm5, %v3585_v45 }
 0x48d   : > { %v4055_v58 = vpop.permute.xlu1 %4054 }
 0x48e   : > { %4066 = vst.msk [vmem:[%s6705_s22 + $0x8] sm:$0xff] %vm4064_vm6, %v4055_v58  ;;  %v4053_v3 = vpop.permute.xlu0 %4052 }
 0x48f   : > { %4065 = vst.msk [vmem:[%s6705_s22] sm:$0xff] %vm4064_vm6, %v4053_v3 }
 0x491   : > { %v4059_v13 = vpop.permute.xlu1 %4058 }
 0x492   : > { %4068 = vst.msk [vmem:[%s6705_s22 + $0x18] sm:$0xff] %vm4064_vm6, %v4059_v13  ;;  %v4057_v12 = vpop.permute.xlu0 %4056 }
 0x493   : > { %4067 = vst.msk [vmem:[%s6705_s22 + $0x10] sm:$0xff] %vm4064_vm6, %v4057_v12 }
 0x494   : > { %5272 = shalt.err (!%p5269_p5)
}
 0x495   : > { %s5273_s22 = scalar_lea.hbm %s6746_s27, 512  ;;  %s5277_s13 = scalar_lea.hbm %s6804_s4, 1024 }
 0x496   : > { %p5274_p9 = scmp.ne.s32.totalorder %s6746_s27, %s5273_s22  ;;  %p5278_p3 = scmp.lt.u32.totalorder %s6746_s27, %s6804_s4 }
 0x497   : > { %p5279_p7 = scmp.lt.u32.totalorder %s5277_s13, %s5273_s22  ;;  %p5281_p4 = scmp.lt.u32.totalorder %s5273_s22, %s6746_s27 }
 0x498   : > { %p5275_p1 = pnand %p5274_p9, %p5485_p10 }
 0x499   : > { %p5280_p13 = por %p5279_p7, %p5278_p3 }
 0x49a   : > { %p5276_p2 = pneg %p5275_p1 }
 0x49b   : > { %p5282_p6 = por %p5281_p4, %p5280_p13 }
 0x49d   : > { %p5283_p8 = pnand %p5282_p6, %p5276_p2 }
 0x49f   : > { %5286 = shalt.err (!%p5283_p8)
}
 0x4a0   : > { %s5360_s23 = smov 128  }
 0x4a1   : > { %5059 = dma.vmem_to_hbm [thread:$0]  (%p5485_p10), %s6748_s29, 512, %s6746_s27, %s4070_s14, %s5360_s23, %s5360_s23, %s5352_s28  }
 0x4a2 PF: > { %s4099_s25 = sand.u32 1, %s5325_s15   ;;  %p6826_p12 = scmp.ne.s32.totalorder %s6812_s26, 0 }
 0x4a3   : > { %p6827_p11 = scmp.ge.s32.totalorder %s5345_s20, 2  ;;  %s4100_s18 = scalar_lea.sflag [#allocation4], %s4099_s25 }
 0x4a5   : > { %p5070_p0 = pnand %p6827_p11, %p6826_p12 }
 0x4a7   : > { %5320 = dma.done.wait (!%p5070_p0), %s4100_s18, 512  }
 0x4a8   : > { %5322 = vsyncadd (!%p5070_p0), %s4100_s18, 4294966784  ;;  %s21_s20 = sadd.s32 1, %s5345_s20   ;;  %s6828_s15 = smov %s5329_s16 }
 0x4a9   : > { %p18_p5 = scmp.ge.s32.totalorder %s21_s20, 4   ;;  %s6829_s16 = smov %s5333_s17 }
 0x4aa   : > { %s6830_s17 = smov %s5494_s10  ;;  %s6831_s18 = smov %s5341_s19 }
 0x4ab   : > { %s6832_s19 = smov %s6834_s5  ;;  %20 = sbr.rel (!%p18_p5) target bundleno = 7 (0x7), region = 85 }
 0x4b2   :  { %4105 = vsyncpa [#allocation3], 1 }
 0x4b3   :  { %4107 = vsyncpa [#allocation3 + $0x1], 1 }
 0x4b4   :  { %4108 = vsyncpa [#allocation6], 1 }
 0x4b5   :  { %4109 = vsyncpa [#allocation4], 1 }
 0x4b6   :  { %4111 = vsyncpa [#allocation4 + $0x1], 1 }

</bundles_post_ra>
